<compile_context>
chip_gen: v7x
topology: tpu7x:2x2x1
jax: 0.10.0
libtpu: 0.0.40
codegen_flags: <defaults>
</compile_context>

<pallas_src>
import jax
import jax.numpy as jnp
from jax import lax
from jax.experimental import pallas as pl
from jax.experimental.pallas import tpu as pltpu

IMG = 28 * 28          # 784
IMG_PAD = 896          # 7 * 128 : lane-aligned image dim used inside the kernel
LATENT = 10
BN_EPS = 1e-5
LANE = 128

ENC_DIMS = (IMG, 512, 256, 64, 32)
DEC_DIMS = (LATENT, 32, 64, 128, 256, 512)

_VMEM = pl.BlockSpec(memory_space=pltpu.MemorySpace.VMEM)
_SMEM = pl.BlockSpec(memory_space=pltpu.MemorySpace.SMEM)
_ANY = pl.BlockSpec(memory_space=pl.ANY)


# ---------------------------------------------------- packed-vector layout ----

def _pad_to_lane(n):
    return ((n + LANE - 1) // LANE) * LANE


def _vec_sizes():
    sizes = []
    for dout in ENC_DIMS[1:]:
        sizes += [dout, dout, dout]          # bias, gamma, beta
    sizes.append(2 * LATENT)                 # encoder head bias (20)
    for dout in DEC_DIMS[1:]:
        sizes += [dout, dout, dout]          # bias, gamma, beta
    sizes.append(IMG_PAD)                    # dec_last bias (padded to 896)
    return tuple(sizes)


_VEC_SIZES = _vec_sizes()
_VEC_OFFS = []
_off = 0
for _s in _VEC_SIZES:
    _VEC_OFFS.append(_off)
    _off += _pad_to_lane(_s)                 # every slice start is 128-aligned
_VEC_OFFS = tuple(_VEC_OFFS)
VEC_LEN = _off                               # 7552 f32 (~30 KB)


class _VecReader:
    """Trace-time helper that pops the packed (1, VEC_LEN) buffer in order."""

    def __init__(self, vec_ref):
        self._ref = vec_ref
        self._i = 0

    def next(self):
        start = _VEC_OFFS[self._i]
        size = _VEC_SIZES[self._i]
        self._i += 1
        return self._ref[:, start:start + size]


# ---------------------------------------------------------------- kernel -----

def _linear_relu_bn(x, w_bf16, b, g, be):
    """y = BatchNorm1d(ReLU(x @ W + b)); bf16 MXU operands, f32 everywhere else."""
    y = jnp.dot(x.astype(jnp.bfloat16), w_bf16,
                preferred_element_type=jnp.float32) + b
    y = jnp.maximum(y, 0.0)
    mean = jnp.mean(y, axis=0, keepdims=True)
    cen = y - mean
    var = jnp.mean(cen * cen, axis=0, keepdims=True)     # biased, two-pass
    scale = g * lax.rsqrt(var + BN_EPS)
    return cen * scale + be


def _make_vae_kernel(n_enc, n_dec, denom):
    """Ref order:
       inputs : x, eps, packed_vec, n_enc encoder weights, w_head,
                n_dec decoder weights (HBM/ANY), w_dec_last (HBM/ANY)
       outputs: x_hat (VMEM), kld (SMEM)
       scratch: n_dec + 1 VMEM weight buffers, DMA semaphore array
    """

    def kernel(*refs):
        it = iter(refs)
        x_ref = next(it)
        eps_ref = next(it)
        vec_ref = next(it)
        enc_w = [next(it) for _ in range(n_enc)]
        wh_ref = next(it)
        dec_w_hbm = [next(it) for _ in range(n_dec)]
        dwl_hbm = next(it)
        xhat_ref = next(it)
        kld_ref = next(it)
        dec_w_vmem = [next(it) for _ in range(n_dec)]
        dwl_vmem = next(it)
        dma_sem = next(it)

        # -------- prefetch decoder weights HBM -> VMEM (overlaps encoder) ----
        copies = []
        for i, (src, dst) in enumerate(zip(dec_w_hbm + [dwl_hbm],
                                           dec_w_vmem + [dwl_vmem])):
            cp = pltpu.make_async_copy(src, dst, dma_sem.at[i])
            cp.start()
            copies.append(cp)

        vec = _VecReader(vec_ref)

        # -------- encoder -----------------------------------------------------
        h = x_ref[...]                                     # (B, 896) f32
        for w_ref in enc_w:
            b, g, be = vec.next(), vec.next(), vec.next()
            h = _linear_relu_bn(h, w_ref[...], b, g, be)

        # encoder head: single (B,32)@(32,20) dot; mu/sigma are free lane slices
        b_head = vec.next()
        hhead = jnp.dot(h.astype(jnp.bfloat16), wh_ref[...],
                        preferred_element_type=jnp.float32) + b_head
        mu = hhead[:, :LATENT]
        sigma = hhead[:, LATENT:]

        # -------- reparameterize + KLD ----------------------------------------
        z = mu + sigma * eps_ref[...]
        s2 = sigma * sigma
        kld_term = mu * mu + s2 - jnp.log(1e-8 + s2) - 1.0
        kld_ref[0] = (0.5 / denom) * jnp.sum(kld_term)

        # -------- decoder (wait for prefetched weights first) -----------------
        for cp in copies:
            cp.wait()

        d = z
        for w_vmem in dec_w_vmem:
            b, g, be = vec.next(), vec.next(), vec.next()
            d = _linear_relu_bn(d, w_vmem[...], b, g, be)

        b_last = vec.next()
        d = jnp.dot(d.astype(jnp.bfloat16), dwl_vmem[...],
                    preferred_element_type=jnp.float32) + b_last
        xhat_ref[...] = jax.nn.sigmoid(d)                  # lane-dense (B, 896)

    return kernel


# --------------------------------------------------------------- wrapper -----

def vae_forward(params, x, noise_key):
    batch = x.shape[0]
    xf = x.reshape(batch, -1).astype(jnp.float32)          # (B, 784)
    xf = jnp.pad(xf, ((0, 0), (0, IMG_PAD - IMG)))          # (B, 896) lane-aligned
    eps = jax.random.normal(noise_key, (batch, LATENT), jnp.float32)
    # TODO(synk): move eps generation in-kernel (pltpu.prng_seed + stateful_normal
    # from an SMEM seed) to drop this tiny input DMA and the separate RNG launch.

    enc_w = params["enc_w"]
    dec_w = params["dec_w"]
    inputs = ([xf, eps, params["vec"]] + list(enc_w) + [params["w_head"]]
              + list(dec_w) + [params["w_dec_last"]])

    n_vmem = 3 + len(enc_w) + 1
    n_any = len(dec_w) + 1
    in_specs = [_VMEM] * n_vmem + [_ANY] * n_any

    scratch_shapes = (
        [pltpu.VMEM(w.shape, jnp.bfloat16) for w in dec_w]
        + [pltpu.VMEM(params["w_dec_last"].shape, jnp.bfloat16),
           pltpu.SemaphoreType.DMA((n_any,))]
    )

    kernel = _make_vae_kernel(len(enc_w), len(dec_w), float(batch * IMG))

    x_hat, kld = pl.pallas_call(
        kernel,
        out_shape=(jax.ShapeDtypeStruct((batch, IMG_PAD), jnp.float32),
                   jax.ShapeDtypeStruct((1,), jnp.float32)),
        in_specs=in_specs,
        out_specs=(_VMEM, _SMEM),
        scratch_shapes=scratch_shapes,
    )(*inputs)

    return x_hat[:, :IMG].reshape(batch, 1, 28, 28), kld[0]


# ---------------------------------------------------------------- params -----

def _init_linear(key, fan_in, fan_out):
    kw, kb = jax.random.split(key)
    bound = 1.0 / (fan_in ** 0.5)
    w = jax.random.uniform(kw, (fan_in, fan_out), jnp.float32, -bound, bound)
    b = jax.random.uniform(kb, (1, fan_out), jnp.float32, -bound, bound)
    return w, b


def init_vae_params(key):
    n_keys = (len(ENC_DIMS) - 1) + 1 + (len(DEC_DIMS) - 1) + 1
    keys = iter(jax.random.split(key, n_keys))

    enc_w, vec_pieces = [], []
    for din, dout in zip(ENC_DIMS[:-1], ENC_DIMS[1:]):
        w, b = _init_linear(next(keys), din, dout)
        if din == IMG:                                   # pad 784 -> 896 rows (x is
            w = jnp.pad(w, ((0, IMG_PAD - IMG), (0, 0)))  # zero-padded to match)
        enc_w.append(w.astype(jnp.bfloat16))
        vec_pieces += [b,
                       jnp.ones((1, dout), jnp.float32),
                       jnp.zeros((1, dout), jnp.float32)]

    # encoder head Linear(32, 20); mu/sigma sliced from the result inside the kernel
    w_head, b_head = _init_linear(next(keys), ENC_DIMS[-1], 2 * LATENT)
    vec_pieces.append(b_head)

    dec_w = []
    for din, dout in zip(DEC_DIMS[:-1], DEC_DIMS[1:]):
        w, b = _init_linear(next(keys), din, dout)
        dec_w.append(w.astype(jnp.bfloat16))
        vec_pieces += [b,
                       jnp.ones((1, dout), jnp.float32),
                       jnp.zeros((1, dout), jnp.float32)]

    w_last, b_last = _init_linear(next(keys), DEC_DIMS[-1], IMG)  # 512 -> 784
    w_last = jnp.pad(w_last, ((0, 0), (0, IMG_PAD - IMG)))        # pad cols -> 896
    b_last = jnp.pad(b_last, ((0, 0), (0, IMG_PAD - IMG)))
    vec_pieces.append(b_last)

    # pack every small (1, n) vector into one lane-aligned (1, VEC_LEN) f32 buffer
    padded = []
    for arr, size in zip(vec_pieces, _VEC_SIZES):
        assert arr.shape == (1, size)
        pad = _pad_to_lane(size) - size
        padded.append(jnp.pad(arr, ((0, 0), (0, pad))) if pad else arr)
    vec = jnp.concatenate(padded, axis=1)
    assert vec.shape == (1, VEC_LEN)

    return dict(enc_w=enc_w,
                w_head=w_head.astype(jnp.bfloat16),
                dec_w=dec_w,
                w_dec_last=w_last.astype(jnp.bfloat16),
                vec=vec)


# ------------------------------------------------------------------ main -----

if __name__ == "__main__":
    root = jax.random.PRNGKey(0)
    k_params, k_x, k_noise = jax.random.split(root, 3)

    params = init_vae_params(k_params)
    batch = 8  # multiple of the f32 sublane count (8)
    x = jax.random.uniform(k_x, (batch, 1, 28, 28), jnp.float32)  # NCHW like MNIST

    fwd = jax.jit(vae_forward)
    x_hat, kld = fwd(params, x, k_noise)
    jax.block_until_ready((x_hat, kld))

    assert x_hat.shape == (batch, 1, 28, 28)
    assert kld.shape == ()
    assert bool(jnp.all(jnp.isfinite(x_hat)))
    assert bool(jnp.isfinite(kld))
    print("KERNEL_OK")
</pallas_src>

<mosaic_0001>
module attributes {stable_mosaic.version = 11 : i64} {
  func.func @kernel(%arg0: memref<8x896xf32, #tpu.memory_space<vmem>>, %arg1: memref<8x10xf32, #tpu.memory_space<vmem>>, %arg2: memref<1x7552xf32, #tpu.memory_space<vmem>>, %arg3: memref<896x512xbf16, #tpu.memory_space<vmem>>, %arg4: memref<512x256xbf16, #tpu.memory_space<vmem>>, %arg5: memref<256x64xbf16, #tpu.memory_space<vmem>>, %arg6: memref<64x32xbf16, #tpu.memory_space<vmem>>, %arg7: memref<32x20xbf16, #tpu.memory_space<vmem>>, %arg8: memref<10x32xbf16, #tpu.memory_space<any>>, %arg9: memref<32x64xbf16, #tpu.memory_space<any>>, %arg10: memref<64x128xbf16, #tpu.memory_space<any>>, %arg11: memref<128x256xbf16, #tpu.memory_space<any>>, %arg12: memref<256x512xbf16, #tpu.memory_space<any>>, %arg13: memref<512x896xbf16, #tpu.memory_space<any>>, %arg14: memref<8x896xf32, #tpu.memory_space<vmem>>, %arg15: memref<1xf32, #tpu.memory_space<smem>>, %arg16: memref<10x32xbf16, #tpu.memory_space<vmem>>, %arg17: memref<32x64xbf16, #tpu.memory_space<vmem>>, %arg18: memref<64x128xbf16, #tpu.memory_space<vmem>>, %arg19: memref<128x256xbf16, #tpu.memory_space<vmem>>, %arg20: memref<256x512xbf16, #tpu.memory_space<vmem>>, %arg21: memref<512x896xbf16, #tpu.memory_space<vmem>>, %arg22: memref<6x!tpu.dma_semaphore, #tpu.memory_space<semaphore_mem>>) attributes {dimension_semantics = [], scalar_prefetch = 0 : i64, scratch_operands = 7 : i64, tpu.core_type = #tpu.core_type<tc>} {
    %c0_i32 = arith.constant 0 : i32
    %0 = tpu.memref_slice %arg22[%c0_i32] : memref<6x!tpu.dma_semaphore, #tpu.memory_space<semaphore_mem>> -> memref<1x!tpu.dma_semaphore, #tpu.memory_space<semaphore_mem>>
    %1 = tpu.memref_squeeze %0 : memref<1x!tpu.dma_semaphore, #tpu.memory_space<semaphore_mem>> -> memref<!tpu.dma_semaphore, #tpu.memory_space<semaphore_mem>>
    tpu.enqueue_dma source(%arg8 : memref<10x32xbf16, #tpu.memory_space<any>>) target(%arg16 : memref<10x32xbf16, #tpu.memory_space<vmem>>) target_semaphore(%1 : memref<!tpu.dma_semaphore, #tpu.memory_space<semaphore_mem>>)
    %c1_i32 = arith.constant 1 : i32
    %2 = tpu.memref_slice %arg22[%c1_i32] : memref<6x!tpu.dma_semaphore, #tpu.memory_space<semaphore_mem>> -> memref<1x!tpu.dma_semaphore, #tpu.memory_space<semaphore_mem>>
    %3 = tpu.memref_squeeze %2 : memref<1x!tpu.dma_semaphore, #tpu.memory_space<semaphore_mem>> -> memref<!tpu.dma_semaphore, #tpu.memory_space<semaphore_mem>>
    tpu.enqueue_dma source(%arg9 : memref<32x64xbf16, #tpu.memory_space<any>>) target(%arg17 : memref<32x64xbf16, #tpu.memory_space<vmem>>) target_semaphore(%3 : memref<!tpu.dma_semaphore, #tpu.memory_space<semaphore_mem>>)
    %c2_i32 = arith.constant 2 : i32
    %4 = tpu.memref_slice %arg22[%c2_i32] : memref<6x!tpu.dma_semaphore, #tpu.memory_space<semaphore_mem>> -> memref<1x!tpu.dma_semaphore, #tpu.memory_space<semaphore_mem>>
    %5 = tpu.memref_squeeze %4 : memref<1x!tpu.dma_semaphore, #tpu.memory_space<semaphore_mem>> -> memref<!tpu.dma_semaphore, #tpu.memory_space<semaphore_mem>>
    tpu.enqueue_dma source(%arg10 : memref<64x128xbf16, #tpu.memory_space<any>>) target(%arg18 : memref<64x128xbf16, #tpu.memory_space<vmem>>) target_semaphore(%5 : memref<!tpu.dma_semaphore, #tpu.memory_space<semaphore_mem>>)
    %c3_i32 = arith.constant 3 : i32
    %6 = tpu.memref_slice %arg22[%c3_i32] : memref<6x!tpu.dma_semaphore, #tpu.memory_space<semaphore_mem>> -> memref<1x!tpu.dma_semaphore, #tpu.memory_space<semaphore_mem>>
    %7 = tpu.memref_squeeze %6 : memref<1x!tpu.dma_semaphore, #tpu.memory_space<semaphore_mem>> -> memref<!tpu.dma_semaphore, #tpu.memory_space<semaphore_mem>>
    tpu.enqueue_dma source(%arg11 : memref<128x256xbf16, #tpu.memory_space<any>>) target(%arg19 : memref<128x256xbf16, #tpu.memory_space<vmem>>) target_semaphore(%7 : memref<!tpu.dma_semaphore, #tpu.memory_space<semaphore_mem>>)
    %c4_i32 = arith.constant 4 : i32
    %8 = tpu.memref_slice %arg22[%c4_i32] : memref<6x!tpu.dma_semaphore, #tpu.memory_space<semaphore_mem>> -> memref<1x!tpu.dma_semaphore, #tpu.memory_space<semaphore_mem>>
    %9 = tpu.memref_squeeze %8 : memref<1x!tpu.dma_semaphore, #tpu.memory_space<semaphore_mem>> -> memref<!tpu.dma_semaphore, #tpu.memory_space<semaphore_mem>>
    tpu.enqueue_dma source(%arg12 : memref<256x512xbf16, #tpu.memory_space<any>>) target(%arg20 : memref<256x512xbf16, #tpu.memory_space<vmem>>) target_semaphore(%9 : memref<!tpu.dma_semaphore, #tpu.memory_space<semaphore_mem>>)
    %c5_i32 = arith.constant 5 : i32
    %10 = tpu.memref_slice %arg22[%c5_i32] : memref<6x!tpu.dma_semaphore, #tpu.memory_space<semaphore_mem>> -> memref<1x!tpu.dma_semaphore, #tpu.memory_space<semaphore_mem>>
    %11 = tpu.memref_squeeze %10 : memref<1x!tpu.dma_semaphore, #tpu.memory_space<semaphore_mem>> -> memref<!tpu.dma_semaphore, #tpu.memory_space<semaphore_mem>>
    tpu.enqueue_dma source(%arg13 : memref<512x896xbf16, #tpu.memory_space<any>>) target(%arg21 : memref<512x896xbf16, #tpu.memory_space<vmem>>) target_semaphore(%11 : memref<!tpu.dma_semaphore, #tpu.memory_space<semaphore_mem>>)
    %c0 = arith.constant 0 : index
    %c0_0 = arith.constant 0 : index
    %12 = vector.load %arg0[%c0, %c0_0] : memref<8x896xf32, #tpu.memory_space<vmem>>, vector<8x896xf32>
    %c0_1 = arith.constant 0 : index
    %c0_2 = arith.constant 0 : index
    %13 = vector.load %arg2[%c0_1, %c0_2] : memref<1x7552xf32, #tpu.memory_space<vmem>>, vector<1x512xf32>
    %c0_3 = arith.constant 0 : index
    %c512 = arith.constant 512 : index
    %14 = vector.load %arg2[%c0_3, %c512] : memref<1x7552xf32, #tpu.memory_space<vmem>>, vector<1x512xf32>
    %c0_4 = arith.constant 0 : index
    %c1024 = arith.constant 1024 : index
    %15 = vector.load %arg2[%c0_4, %c1024] : memref<1x7552xf32, #tpu.memory_space<vmem>>, vector<1x512xf32>
    %c0_5 = arith.constant 0 : index
    %c0_6 = arith.constant 0 : index
    %16 = vector.load %arg3[%c0_5, %c0_6] : memref<896x512xbf16, #tpu.memory_space<vmem>>, vector<896x512xbf16>
    %17 = arith.truncf %12 : vector<8x896xf32> to vector<8x896xbf16>
    %cst = arith.constant dense<0.000000e+00> : vector<8x512xf32>
    %18 = tpu.matmul %17, %16, %cst {dimension_numbers = #tpu.dot_dimension_numbers<[1], [0], [0], [1], [0, 0, 1, 1], [], []>} : vector<8x896xbf16>, vector<896x512xbf16>, vector<8x512xf32> -> vector<8x512xf32>
    %19 = vector.broadcast %13 : vector<1x512xf32> to vector<8x512xf32>
    %20 = arith.addf %18, %19 : vector<8x512xf32>
    %cst_7 = arith.constant 0.000000e+00 : f32
    %21 = vector.broadcast %cst_7 : f32 to vector<8x512xf32>
    %22 = arith.maximumf %20, %21 : vector<8x512xf32>
    %cst_8 = arith.constant dense<0.000000e+00> : vector<512xf32>
    %23 = vector.multi_reduction <add>, %22, %cst_8 [0] : vector<8x512xf32> to vector<512xf32>
    %24 = vector.shape_cast %23 : vector<512xf32> to vector<1x512xf32>
    %cst_9 = arith.constant 8.000000e+00 : f32
    %25 = vector.broadcast %cst_9 : f32 to vector<1x512xf32>
    %26 = arith.divf %24, %25 : vector<1x512xf32>
    %27 = vector.broadcast %26 : vector<1x512xf32> to vector<8x512xf32>
    %28 = arith.subf %22, %27 : vector<8x512xf32>
    %29 = arith.mulf %28, %28 : vector<8x512xf32>
    %cst_10 = arith.constant dense<0.000000e+00> : vector<512xf32>
    %30 = vector.multi_reduction <add>, %29, %cst_10 [0] : vector<8x512xf32> to vector<512xf32>
    %31 = vector.shape_cast %30 : vector<512xf32> to vector<1x512xf32>
    %cst_11 = arith.constant 8.000000e+00 : f32
    %32 = vector.broadcast %cst_11 : f32 to vector<1x512xf32>
    %33 = arith.divf %31, %32 : vector<1x512xf32>
    %cst_12 = arith.constant 9.99999974E-6 : f32
    %34 = vector.broadcast %cst_12 : f32 to vector<1x512xf32>
    %35 = arith.addf %33, %34 : vector<1x512xf32>
    %36 = math.rsqrt %35 : vector<1x512xf32>
    %37 = arith.mulf %14, %36 : vector<1x512xf32>
    %38 = vector.broadcast %37 : vector<1x512xf32> to vector<8x512xf32>
    %39 = arith.mulf %28, %38 : vector<8x512xf32>
    %40 = vector.broadcast %15 : vector<1x512xf32> to vector<8x512xf32>
    %41 = arith.addf %39, %40 : vector<8x512xf32>
    %c0_13 = arith.constant 0 : index
    %c1536 = arith.constant 1536 : index
    %42 = vector.load %arg2[%c0_13, %c1536] : memref<1x7552xf32, #tpu.memory_space<vmem>>, vector<1x256xf32>
    %c0_14 = arith.constant 0 : index
    %c1792 = arith.constant 1792 : index
    %43 = vector.load %arg2[%c0_14, %c1792] : memref<1x7552xf32, #tpu.memory_space<vmem>>, vector<1x256xf32>
    %c0_15 = arith.constant 0 : index
    %c2048 = arith.constant 2048 : index
    %44 = vector.load %arg2[%c0_15, %c2048] : memref<1x7552xf32, #tpu.memory_space<vmem>>, vector<1x256xf32>
    %c0_16 = arith.constant 0 : index
    %c0_17 = arith.constant 0 : index
    %45 = vector.load %arg4[%c0_16, %c0_17] : memref<512x256xbf16, #tpu.memory_space<vmem>>, vector<512x256xbf16>
    %46 = arith.truncf %41 : vector<8x512xf32> to vector<8x512xbf16>
    %cst_18 = arith.constant dense<0.000000e+00> : vector<8x256xf32>
    %47 = tpu.matmul %46, %45, %cst_18 {dimension_numbers = #tpu.dot_dimension_numbers<[1], [0], [0], [1], [0, 0, 1, 1], [], []>} : vector<8x512xbf16>, vector<512x256xbf16>, vector<8x256xf32> -> vector<8x256xf32>
    %48 = vector.broadcast %42 : vector<1x256xf32> to vector<8x256xf32>
    %49 = arith.addf %47, %48 : vector<8x256xf32>
    %cst_19 = arith.constant 0.000000e+00 : f32
    %50 = vector.broadcast %cst_19 : f32 to vector<8x256xf32>
    %51 = arith.maximumf %49, %50 : vector<8x256xf32>
    %cst_20 = arith.constant dense<0.000000e+00> : vector<256xf32>
    %52 = vector.multi_reduction <add>, %51, %cst_20 [0] : vector<8x256xf32> to vector<256xf32>
    %53 = vector.shape_cast %52 : vector<256xf32> to vector<1x256xf32>
    %cst_21 = arith.constant 8.000000e+00 : f32
    %54 = vector.broadcast %cst_21 : f32 to vector<1x256xf32>
    %55 = arith.divf %53, %54 : vector<1x256xf32>
    %56 = vector.broadcast %55 : vector<1x256xf32> to vector<8x256xf32>
    %57 = arith.subf %51, %56 : vector<8x256xf32>
    %58 = arith.mulf %57, %57 : vector<8x256xf32>
    %cst_22 = arith.constant dense<0.000000e+00> : vector<256xf32>
    %59 = vector.multi_reduction <add>, %58, %cst_22 [0] : vector<8x256xf32> to vector<256xf32>
    %60 = vector.shape_cast %59 : vector<256xf32> to vector<1x256xf32>
    %cst_23 = arith.constant 8.000000e+00 : f32
    %61 = vector.broadcast %cst_23 : f32 to vector<1x256xf32>
    %62 = arith.divf %60, %61 : vector<1x256xf32>
    %cst_24 = arith.constant 9.99999974E-6 : f32
    %63 = vector.broadcast %cst_24 : f32 to vector<1x256xf32>
    %64 = arith.addf %62, %63 : vector<1x256xf32>
    %65 = math.rsqrt %64 : vector<1x256xf32>
    %66 = arith.mulf %43, %65 : vector<1x256xf32>
    %67 = vector.broadcast %66 : vector<1x256xf32> to vector<8x256xf32>
    %68 = arith.mulf %57, %67 : vector<8x256xf32>
    %69 = vector.broadcast %44 : vector<1x256xf32> to vector<8x256xf32>
    %70 = arith.addf %68, %69 : vector<8x256xf32>
    %c0_25 = arith.constant 0 : index
    %c2304 = arith.constant 2304 : index
    %71 = vector.load %arg2[%c0_25, %c2304] : memref<1x7552xf32, #tpu.memory_space<vmem>>, vector<1x64xf32>
    %c0_26 = arith.constant 0 : index
    %c2432 = arith.constant 2432 : index
    %72 = vector.load %arg2[%c0_26, %c2432] : memref<1x7552xf32, #tpu.memory_space<vmem>>, vector<1x64xf32>
    %c0_27 = arith.constant 0 : index
    %c2560 = arith.constant 2560 : index
    %73 = vector.load %arg2[%c0_27, %c2560] : memref<1x7552xf32, #tpu.memory_space<vmem>>, vector<1x64xf32>
    %c0_28 = arith.constant 0 : index
    %c0_29 = arith.constant 0 : index
    %74 = vector.load %arg5[%c0_28, %c0_29] : memref<256x64xbf16, #tpu.memory_space<vmem>>, vector<256x64xbf16>
    %75 = arith.truncf %70 : vector<8x256xf32> to vector<8x256xbf16>
    %cst_30 = arith.constant dense<0.000000e+00> : vector<8x64xf32>
    %76 = tpu.matmul %75, %74, %cst_30 {dimension_numbers = #tpu.dot_dimension_numbers<[1], [0], [0], [1], [0, 0, 1, 1], [], []>} : vector<8x256xbf16>, vector<256x64xbf16>, vector<8x64xf32> -> vector<8x64xf32>
    %77 = vector.broadcast %71 : vector<1x64xf32> to vector<8x64xf32>
    %78 = arith.addf %76, %77 : vector<8x64xf32>
    %cst_31 = arith.constant 0.000000e+00 : f32
    %79 = vector.broadcast %cst_31 : f32 to vector<8x64xf32>
    %80 = arith.maximumf %78, %79 : vector<8x64xf32>
    %cst_32 = arith.constant dense<0.000000e+00> : vector<64xf32>
    %81 = vector.multi_reduction <add>, %80, %cst_32 [0] : vector<8x64xf32> to vector<64xf32>
    %82 = vector.shape_cast %81 : vector<64xf32> to vector<1x64xf32>
    %cst_33 = arith.constant 8.000000e+00 : f32
    %83 = vector.broadcast %cst_33 : f32 to vector<1x64xf32>
    %84 = arith.divf %82, %83 : vector<1x64xf32>
    %85 = vector.broadcast %84 : vector<1x64xf32> to vector<8x64xf32>
    %86 = arith.subf %80, %85 : vector<8x64xf32>
    %87 = arith.mulf %86, %86 : vector<8x64xf32>
    %cst_34 = arith.constant dense<0.000000e+00> : vector<64xf32>
    %88 = vector.multi_reduction <add>, %87, %cst_34 [0] : vector<8x64xf32> to vector<64xf32>
    %89 = vector.shape_cast %88 : vector<64xf32> to vector<1x64xf32>
    %cst_35 = arith.constant 8.000000e+00 : f32
    %90 = vector.broadcast %cst_35 : f32 to vector<1x64xf32>
    %91 = arith.divf %89, %90 : vector<1x64xf32>
    %cst_36 = arith.constant 9.99999974E-6 : f32
    %92 = vector.broadcast %cst_36 : f32 to vector<1x64xf32>
    %93 = arith.addf %91, %92 : vector<1x64xf32>
    %94 = math.rsqrt %93 : vector<1x64xf32>
    %95 = arith.mulf %72, %94 : vector<1x64xf32>
    %96 = vector.broadcast %95 : vector<1x64xf32> to vector<8x64xf32>
    %97 = arith.mulf %86, %96 : vector<8x64xf32>
    %98 = vector.broadcast %73 : vector<1x64xf32> to vector<8x64xf32>
    %99 = arith.addf %97, %98 : vector<8x64xf32>
    %c0_37 = arith.constant 0 : index
    %c2688 = arith.constant 2688 : index
    %100 = vector.load %arg2[%c0_37, %c2688] : memref<1x7552xf32, #tpu.memory_space<vmem>>, vector<1x32xf32>
    %c0_38 = arith.constant 0 : index
    %c2816 = arith.constant 2816 : index
    %101 = vector.load %arg2[%c0_38, %c2816] : memref<1x7552xf32, #tpu.memory_space<vmem>>, vector<1x32xf32>
    %c0_39 = arith.constant 0 : index
    %c2944 = arith.constant 2944 : index
    %102 = vector.load %arg2[%c0_39, %c2944] : memref<1x7552xf32, #tpu.memory_space<vmem>>, vector<1x32xf32>
    %c0_40 = arith.constant 0 : index
    %c0_41 = arith.constant 0 : index
    %103 = vector.load %arg6[%c0_40, %c0_41] : memref<64x32xbf16, #tpu.memory_space<vmem>>, vector<64x32xbf16>
    %104 = arith.truncf %99 : vector<8x64xf32> to vector<8x64xbf16>
    %cst_42 = arith.constant dense<0.000000e+00> : vector<8x32xf32>
    %105 = tpu.matmul %104, %103, %cst_42 {dimension_numbers = #tpu.dot_dimension_numbers<[1], [0], [0], [1], [0, 0, 1, 1], [], []>} : vector<8x64xbf16>, vector<64x32xbf16>, vector<8x32xf32> -> vector<8x32xf32>
    %106 = vector.broadcast %100 : vector<1x32xf32> to vector<8x32xf32>
    %107 = arith.addf %105, %106 : vector<8x32xf32>
    %cst_43 = arith.constant 0.000000e+00 : f32
    %108 = vector.broadcast %cst_43 : f32 to vector<8x32xf32>
    %109 = arith.maximumf %107, %108 : vector<8x32xf32>
    %cst_44 = arith.constant dense<0.000000e+00> : vector<32xf32>
    %110 = vector.multi_reduction <add>, %109, %cst_44 [0] : vector<8x32xf32> to vector<32xf32>
    %111 = vector.shape_cast %110 : vector<32xf32> to vector<1x32xf32>
    %cst_45 = arith.constant 8.000000e+00 : f32
    %112 = vector.broadcast %cst_45 : f32 to vector<1x32xf32>
    %113 = arith.divf %111, %112 : vector<1x32xf32>
    %114 = vector.broadcast %113 : vector<1x32xf32> to vector<8x32xf32>
    %115 = arith.subf %109, %114 : vector<8x32xf32>
    %116 = arith.mulf %115, %115 : vector<8x32xf32>
    %cst_46 = arith.constant dense<0.000000e+00> : vector<32xf32>
    %117 = vector.multi_reduction <add>, %116, %cst_46 [0] : vector<8x32xf32> to vector<32xf32>
    %118 = vector.shape_cast %117 : vector<32xf32> to vector<1x32xf32>
    %cst_47 = arith.constant 8.000000e+00 : f32
    %119 = vector.broadcast %cst_47 : f32 to vector<1x32xf32>
    %120 = arith.divf %118, %119 : vector<1x32xf32>
    %cst_48 = arith.constant 9.99999974E-6 : f32
    %121 = vector.broadcast %cst_48 : f32 to vector<1x32xf32>
    %122 = arith.addf %120, %121 : vector<1x32xf32>
    %123 = math.rsqrt %122 : vector<1x32xf32>
    %124 = arith.mulf %101, %123 : vector<1x32xf32>
    %125 = vector.broadcast %124 : vector<1x32xf32> to vector<8x32xf32>
    %126 = arith.mulf %115, %125 : vector<8x32xf32>
    %127 = vector.broadcast %102 : vector<1x32xf32> to vector<8x32xf32>
    %128 = arith.addf %126, %127 : vector<8x32xf32>
    %c0_49 = arith.constant 0 : index
    %c3072 = arith.constant 3072 : index
    %129 = vector.load %arg2[%c0_49, %c3072] : memref<1x7552xf32, #tpu.memory_space<vmem>>, vector<1x20xf32>
    %130 = arith.truncf %128 : vector<8x32xf32> to vector<8x32xbf16>
    %c0_50 = arith.constant 0 : index
    %c0_51 = arith.constant 0 : index
    %131 = vector.load %arg7[%c0_50, %c0_51] : memref<32x20xbf16, #tpu.memory_space<vmem>>, vector<32x20xbf16>
    %cst_52 = arith.constant dense<0.000000e+00> : vector<8x20xf32>
    %132 = tpu.matmul %130, %131, %cst_52 {dimension_numbers = #tpu.dot_dimension_numbers<[1], [0], [0], [1], [0, 0, 1, 1], [], []>} : vector<8x32xbf16>, vector<32x20xbf16>, vector<8x20xf32> -> vector<8x20xf32>
    %133 = vector.broadcast %129 : vector<1x20xf32> to vector<8x20xf32>
    %134 = arith.addf %132, %133 : vector<8x20xf32>
    %135 = vector.extract_strided_slice %134 {offsets = [0, 0], sizes = [8, 10], strides = [1, 1]} : vector<8x20xf32> to vector<8x10xf32>
    %136 = vector.extract_strided_slice %134 {offsets = [0, 10], sizes = [8, 10], strides = [1, 1]} : vector<8x20xf32> to vector<8x10xf32>
    %c0_53 = arith.constant 0 : index
    %c0_54 = arith.constant 0 : index
    %137 = vector.load %arg1[%c0_53, %c0_54] : memref<8x10xf32, #tpu.memory_space<vmem>>, vector<8x10xf32>
    %138 = arith.mulf %136, %137 : vector<8x10xf32>
    %139 = arith.addf %135, %138 : vector<8x10xf32>
    %140 = arith.mulf %136, %136 : vector<8x10xf32>
    %141 = arith.mulf %135, %135 : vector<8x10xf32>
    %142 = arith.addf %141, %140 : vector<8x10xf32>
    %cst_55 = arith.constant 9.99999993E-9 : f32
    %143 = vector.broadcast %cst_55 : f32 to vector<8x10xf32>
    %144 = arith.addf %143, %140 : vector<8x10xf32>
    %145 = math.log %144 : vector<8x10xf32>
    %146 = arith.subf %142, %145 : vector<8x10xf32>
    %cst_56 = arith.constant 1.000000e+00 : f32
    %147 = vector.broadcast %cst_56 : f32 to vector<8x10xf32>
    %148 = arith.subf %146, %147 : vector<8x10xf32>
    %149 = vector.shape_cast %148 : vector<8x10xf32> to vector<1x8x10xf32>
    %cst_57 = arith.constant dense<0.000000e+00> : vector<1xf32>
    %150 = vector.multi_reduction <add>, %149, %cst_57 [1, 2] : vector<1x8x10xf32> to vector<1xf32>
    %151 = vector.shape_cast %150 : vector<1xf32> to vector<1x1x1xf32>
    %152 = vector.extract %151[0, 0, 0] : f32 from vector<1x1x1xf32>
    %cst_58 = arith.constant 7.97193861E-5 : f32
    %153 = arith.mulf %cst_58, %152 : f32
    %c0_59 = arith.constant 0 : index
    %154 = memref.load %arg15[%c0_59] : memref<1xf32, #tpu.memory_space<smem>>
    memref.store %153, %arg15[%c0_59] : memref<1xf32, #tpu.memory_space<smem>>
    %c0_i32_60 = arith.constant 0 : i32
    %155 = tpu.memref_slice %arg22[%c0_i32_60] : memref<6x!tpu.dma_semaphore, #tpu.memory_space<semaphore_mem>> -> memref<1x!tpu.dma_semaphore, #tpu.memory_space<semaphore_mem>>
    %156 = tpu.memref_squeeze %155 : memref<1x!tpu.dma_semaphore, #tpu.memory_space<semaphore_mem>> -> memref<!tpu.dma_semaphore, #tpu.memory_space<semaphore_mem>>
    tpu.wait_dma2 semaphore(%156 : memref<!tpu.dma_semaphore, #tpu.memory_space<semaphore_mem>>) src(%arg8 : memref<10x32xbf16, #tpu.memory_space<any>>) dst(%arg16 : memref<10x32xbf16, #tpu.memory_space<vmem>>)
    %c1_i32_61 = arith.constant 1 : i32
    %157 = tpu.memref_slice %arg22[%c1_i32_61] : memref<6x!tpu.dma_semaphore, #tpu.memory_space<semaphore_mem>> -> memref<1x!tpu.dma_semaphore, #tpu.memory_space<semaphore_mem>>
    %158 = tpu.memref_squeeze %157 : memref<1x!tpu.dma_semaphore, #tpu.memory_space<semaphore_mem>> -> memref<!tpu.dma_semaphore, #tpu.memory_space<semaphore_mem>>
    tpu.wait_dma2 semaphore(%158 : memref<!tpu.dma_semaphore, #tpu.memory_space<semaphore_mem>>) src(%arg9 : memref<32x64xbf16, #tpu.memory_space<any>>) dst(%arg17 : memref<32x64xbf16, #tpu.memory_space<vmem>>)
    %c2_i32_62 = arith.constant 2 : i32
    %159 = tpu.memref_slice %arg22[%c2_i32_62] : memref<6x!tpu.dma_semaphore, #tpu.memory_space<semaphore_mem>> -> memref<1x!tpu.dma_semaphore, #tpu.memory_space<semaphore_mem>>
    %160 = tpu.memref_squeeze %159 : memref<1x!tpu.dma_semaphore, #tpu.memory_space<semaphore_mem>> -> memref<!tpu.dma_semaphore, #tpu.memory_space<semaphore_mem>>
    tpu.wait_dma2 semaphore(%160 : memref<!tpu.dma_semaphore, #tpu.memory_space<semaphore_mem>>) src(%arg10 : memref<64x128xbf16, #tpu.memory_space<any>>) dst(%arg18 : memref<64x128xbf16, #tpu.memory_space<vmem>>)
    %c3_i32_63 = arith.constant 3 : i32
    %161 = tpu.memref_slice %arg22[%c3_i32_63] : memref<6x!tpu.dma_semaphore, #tpu.memory_space<semaphore_mem>> -> memref<1x!tpu.dma_semaphore, #tpu.memory_space<semaphore_mem>>
    %162 = tpu.memref_squeeze %161 : memref<1x!tpu.dma_semaphore, #tpu.memory_space<semaphore_mem>> -> memref<!tpu.dma_semaphore, #tpu.memory_space<semaphore_mem>>
    tpu.wait_dma2 semaphore(%162 : memref<!tpu.dma_semaphore, #tpu.memory_space<semaphore_mem>>) src(%arg11 : memref<128x256xbf16, #tpu.memory_space<any>>) dst(%arg19 : memref<128x256xbf16, #tpu.memory_space<vmem>>)
    %c4_i32_64 = arith.constant 4 : i32
    %163 = tpu.memref_slice %arg22[%c4_i32_64] : memref<6x!tpu.dma_semaphore, #tpu.memory_space<semaphore_mem>> -> memref<1x!tpu.dma_semaphore, #tpu.memory_space<semaphore_mem>>
    %164 = tpu.memref_squeeze %163 : memref<1x!tpu.dma_semaphore, #tpu.memory_space<semaphore_mem>> -> memref<!tpu.dma_semaphore, #tpu.memory_space<semaphore_mem>>
    tpu.wait_dma2 semaphore(%164 : memref<!tpu.dma_semaphore, #tpu.memory_space<semaphore_mem>>) src(%arg12 : memref<256x512xbf16, #tpu.memory_space<any>>) dst(%arg20 : memref<256x512xbf16, #tpu.memory_space<vmem>>)
    %c5_i32_65 = arith.constant 5 : i32
    %165 = tpu.memref_slice %arg22[%c5_i32_65] : memref<6x!tpu.dma_semaphore, #tpu.memory_space<semaphore_mem>> -> memref<1x!tpu.dma_semaphore, #tpu.memory_space<semaphore_mem>>
    %166 = tpu.memref_squeeze %165 : memref<1x!tpu.dma_semaphore, #tpu.memory_space<semaphore_mem>> -> memref<!tpu.dma_semaphore, #tpu.memory_space<semaphore_mem>>
    tpu.wait_dma2 semaphore(%166 : memref<!tpu.dma_semaphore, #tpu.memory_space<semaphore_mem>>) src(%arg13 : memref<512x896xbf16, #tpu.memory_space<any>>) dst(%arg21 : memref<512x896xbf16, #tpu.memory_space<vmem>>)
    %c0_66 = arith.constant 0 : index
    %c3200 = arith.constant 3200 : index
    %167 = vector.load %arg2[%c0_66, %c3200] : memref<1x7552xf32, #tpu.memory_space<vmem>>, vector<1x32xf32>
    %c0_67 = arith.constant 0 : index
    %c3328 = arith.constant 3328 : index
    %168 = vector.load %arg2[%c0_67, %c3328] : memref<1x7552xf32, #tpu.memory_space<vmem>>, vector<1x32xf32>
    %c0_68 = arith.constant 0 : index
    %c3456 = arith.constant 3456 : index
    %169 = vector.load %arg2[%c0_68, %c3456] : memref<1x7552xf32, #tpu.memory_space<vmem>>, vector<1x32xf32>
    %c0_69 = arith.constant 0 : index
    %c0_70 = arith.constant 0 : index
    %170 = vector.load %arg16[%c0_69, %c0_70] : memref<10x32xbf16, #tpu.memory_space<vmem>>, vector<10x32xbf16>
    %171 = arith.truncf %139 : vector<8x10xf32> to vector<8x10xbf16>
    %cst_71 = arith.constant dense<0.000000e+00> : vector<8x32xf32>
    %172 = tpu.matmul %171, %170, %cst_71 {dimension_numbers = #tpu.dot_dimension_numbers<[1], [0], [0], [1], [0, 0, 1, 1], [], []>} : vector<8x10xbf16>, vector<10x32xbf16>, vector<8x32xf32> -> vector<8x32xf32>
    %173 = vector.broadcast %167 : vector<1x32xf32> to vector<8x32xf32>
    %174 = arith.addf %172, %173 : vector<8x32xf32>
    %cst_72 = arith.constant 0.000000e+00 : f32
    %175 = vector.broadcast %cst_72 : f32 to vector<8x32xf32>
    %176 = arith.maximumf %174, %175 : vector<8x32xf32>
    %cst_73 = arith.constant dense<0.000000e+00> : vector<32xf32>
    %177 = vector.multi_reduction <add>, %176, %cst_73 [0] : vector<8x32xf32> to vector<32xf32>
    %178 = vector.shape_cast %177 : vector<32xf32> to vector<1x32xf32>
    %cst_74 = arith.constant 8.000000e+00 : f32
    %179 = vector.broadcast %cst_74 : f32 to vector<1x32xf32>
    %180 = arith.divf %178, %179 : vector<1x32xf32>
    %181 = vector.broadcast %180 : vector<1x32xf32> to vector<8x32xf32>
    %182 = arith.subf %176, %181 : vector<8x32xf32>
    %183 = arith.mulf %182, %182 : vector<8x32xf32>
    %cst_75 = arith.constant dense<0.000000e+00> : vector<32xf32>
    %184 = vector.multi_reduction <add>, %183, %cst_75 [0] : vector<8x32xf32> to vector<32xf32>
    %185 = vector.shape_cast %184 : vector<32xf32> to vector<1x32xf32>
    %cst_76 = arith.constant 8.000000e+00 : f32
    %186 = vector.broadcast %cst_76 : f32 to vector<1x32xf32>
    %187 = arith.divf %185, %186 : vector<1x32xf32>
    %cst_77 = arith.constant 9.99999974E-6 : f32
    %188 = vector.broadcast %cst_77 : f32 to vector<1x32xf32>
    %189 = arith.addf %187, %188 : vector<1x32xf32>
    %190 = math.rsqrt %189 : vector<1x32xf32>
    %191 = arith.mulf %168, %190 : vector<1x32xf32>
    %192 = vector.broadcast %191 : vector<1x32xf32> to vector<8x32xf32>
    %193 = arith.mulf %182, %192 : vector<8x32xf32>
    %194 = vector.broadcast %169 : vector<1x32xf32> to vector<8x32xf32>
    %195 = arith.addf %193, %194 : vector<8x32xf32>
    %c0_78 = arith.constant 0 : index
    %c3584 = arith.constant 3584 : index
    %196 = vector.load %arg2[%c0_78, %c3584] : memref<1x7552xf32, #tpu.memory_space<vmem>>, vector<1x64xf32>
    %c0_79 = arith.constant 0 : index
    %c3712 = arith.constant 3712 : index
    %197 = vector.load %arg2[%c0_79, %c3712] : memref<1x7552xf32, #tpu.memory_space<vmem>>, vector<1x64xf32>
    %c0_80 = arith.constant 0 : index
    %c3840 = arith.constant 3840 : index
    %198 = vector.load %arg2[%c0_80, %c3840] : memref<1x7552xf32, #tpu.memory_space<vmem>>, vector<1x64xf32>
    %c0_81 = arith.constant 0 : index
    %c0_82 = arith.constant 0 : index
    %199 = vector.load %arg17[%c0_81, %c0_82] : memref<32x64xbf16, #tpu.memory_space<vmem>>, vector<32x64xbf16>
    %200 = arith.truncf %195 : vector<8x32xf32> to vector<8x32xbf16>
    %cst_83 = arith.constant dense<0.000000e+00> : vector<8x64xf32>
    %201 = tpu.matmul %200, %199, %cst_83 {dimension_numbers = #tpu.dot_dimension_numbers<[1], [0], [0], [1], [0, 0, 1, 1], [], []>} : vector<8x32xbf16>, vector<32x64xbf16>, vector<8x64xf32> -> vector<8x64xf32>
    %202 = vector.broadcast %196 : vector<1x64xf32> to vector<8x64xf32>
    %203 = arith.addf %201, %202 : vector<8x64xf32>
    %cst_84 = arith.constant 0.000000e+00 : f32
    %204 = vector.broadcast %cst_84 : f32 to vector<8x64xf32>
    %205 = arith.maximumf %203, %204 : vector<8x64xf32>
    %cst_85 = arith.constant dense<0.000000e+00> : vector<64xf32>
    %206 = vector.multi_reduction <add>, %205, %cst_85 [0] : vector<8x64xf32> to vector<64xf32>
    %207 = vector.shape_cast %206 : vector<64xf32> to vector<1x64xf32>
    %cst_86 = arith.constant 8.000000e+00 : f32
    %208 = vector.broadcast %cst_86 : f32 to vector<1x64xf32>
    %209 = arith.divf %207, %208 : vector<1x64xf32>
    %210 = vector.broadcast %209 : vector<1x64xf32> to vector<8x64xf32>
    %211 = arith.subf %205, %210 : vector<8x64xf32>
    %212 = arith.mulf %211, %211 : vector<8x64xf32>
    %cst_87 = arith.constant dense<0.000000e+00> : vector<64xf32>
    %213 = vector.multi_reduction <add>, %212, %cst_87 [0] : vector<8x64xf32> to vector<64xf32>
    %214 = vector.shape_cast %213 : vector<64xf32> to vector<1x64xf32>
    %cst_88 = arith.constant 8.000000e+00 : f32
    %215 = vector.broadcast %cst_88 : f32 to vector<1x64xf32>
    %216 = arith.divf %214, %215 : vector<1x64xf32>
    %cst_89 = arith.constant 9.99999974E-6 : f32
    %217 = vector.broadcast %cst_89 : f32 to vector<1x64xf32>
    %218 = arith.addf %216, %217 : vector<1x64xf32>
    %219 = math.rsqrt %218 : vector<1x64xf32>
    %220 = arith.mulf %197, %219 : vector<1x64xf32>
    %221 = vector.broadcast %220 : vector<1x64xf32> to vector<8x64xf32>
    %222 = arith.mulf %211, %221 : vector<8x64xf32>
    %223 = vector.broadcast %198 : vector<1x64xf32> to vector<8x64xf32>
    %224 = arith.addf %222, %223 : vector<8x64xf32>
    %c0_90 = arith.constant 0 : index
    %c3968 = arith.constant 3968 : index
    %225 = vector.load %arg2[%c0_90, %c3968] : memref<1x7552xf32, #tpu.memory_space<vmem>>, vector<1x128xf32>
    %c0_91 = arith.constant 0 : index
    %c4096 = arith.constant 4096 : index
    %226 = vector.load %arg2[%c0_91, %c4096] : memref<1x7552xf32, #tpu.memory_space<vmem>>, vector<1x128xf32>
    %c0_92 = arith.constant 0 : index
    %c4224 = arith.constant 4224 : index
    %227 = vector.load %arg2[%c0_92, %c4224] : memref<1x7552xf32, #tpu.memory_space<vmem>>, vector<1x128xf32>
    %c0_93 = arith.constant 0 : index
    %c0_94 = arith.constant 0 : index
    %228 = vector.load %arg18[%c0_93, %c0_94] : memref<64x128xbf16, #tpu.memory_space<vmem>>, vector<64x128xbf16>
    %229 = arith.truncf %224 : vector<8x64xf32> to vector<8x64xbf16>
    %cst_95 = arith.constant dense<0.000000e+00> : vector<8x128xf32>
    %230 = tpu.matmul %229, %228, %cst_95 {dimension_numbers = #tpu.dot_dimension_numbers<[1], [0], [0], [1], [0, 0, 1, 1], [], []>} : vector<8x64xbf16>, vector<64x128xbf16>, vector<8x128xf32> -> vector<8x128xf32>
    %231 = vector.broadcast %225 : vector<1x128xf32> to vector<8x128xf32>
    %232 = arith.addf %230, %231 : vector<8x128xf32>
    %cst_96 = arith.constant 0.000000e+00 : f32
    %233 = vector.broadcast %cst_96 : f32 to vector<8x128xf32>
    %234 = arith.maximumf %232, %233 : vector<8x128xf32>
    %cst_97 = arith.constant dense<0.000000e+00> : vector<128xf32>
    %235 = vector.multi_reduction <add>, %234, %cst_97 [0] : vector<8x128xf32> to vector<128xf32>
    %236 = vector.shape_cast %235 : vector<128xf32> to vector<1x128xf32>
    %cst_98 = arith.constant 8.000000e+00 : f32
    %237 = vector.broadcast %cst_98 : f32 to vector<1x128xf32>
    %238 = arith.divf %236, %237 : vector<1x128xf32>
    %239 = vector.broadcast %238 : vector<1x128xf32> to vector<8x128xf32>
    %240 = arith.subf %234, %239 : vector<8x128xf32>
    %241 = arith.mulf %240, %240 : vector<8x128xf32>
    %cst_99 = arith.constant dense<0.000000e+00> : vector<128xf32>
    %242 = vector.multi_reduction <add>, %241, %cst_99 [0] : vector<8x128xf32> to vector<128xf32>
    %243 = vector.shape_cast %242 : vector<128xf32> to vector<1x128xf32>
    %cst_100 = arith.constant 8.000000e+00 : f32
    %244 = vector.broadcast %cst_100 : f32 to vector<1x128xf32>
    %245 = arith.divf %243, %244 : vector<1x128xf32>
    %cst_101 = arith.constant 9.99999974E-6 : f32
    %246 = vector.broadcast %cst_101 : f32 to vector<1x128xf32>
    %247 = arith.addf %245, %246 : vector<1x128xf32>
    %248 = math.rsqrt %247 : vector<1x128xf32>
    %249 = arith.mulf %226, %248 : vector<1x128xf32>
    %250 = vector.broadcast %249 : vector<1x128xf32> to vector<8x128xf32>
    %251 = arith.mulf %240, %250 : vector<8x128xf32>
    %252 = vector.broadcast %227 : vector<1x128xf32> to vector<8x128xf32>
    %253 = arith.addf %251, %252 : vector<8x128xf32>
    %c0_102 = arith.constant 0 : index
    %c4352 = arith.constant 4352 : index
    %254 = vector.load %arg2[%c0_102, %c4352] : memref<1x7552xf32, #tpu.memory_space<vmem>>, vector<1x256xf32>
    %c0_103 = arith.constant 0 : index
    %c4608 = arith.constant 4608 : index
    %255 = vector.load %arg2[%c0_103, %c4608] : memref<1x7552xf32, #tpu.memory_space<vmem>>, vector<1x256xf32>
    %c0_104 = arith.constant 0 : index
    %c4864 = arith.constant 4864 : index
    %256 = vector.load %arg2[%c0_104, %c4864] : memref<1x7552xf32, #tpu.memory_space<vmem>>, vector<1x256xf32>
    %c0_105 = arith.constant 0 : index
    %c0_106 = arith.constant 0 : index
    %257 = vector.load %arg19[%c0_105, %c0_106] : memref<128x256xbf16, #tpu.memory_space<vmem>>, vector<128x256xbf16>
    %258 = arith.truncf %253 : vector<8x128xf32> to vector<8x128xbf16>
    %cst_107 = arith.constant dense<0.000000e+00> : vector<8x256xf32>
    %259 = tpu.matmul %258, %257, %cst_107 {dimension_numbers = #tpu.dot_dimension_numbers<[1], [0], [0], [1], [0, 0, 1, 1], [], []>} : vector<8x128xbf16>, vector<128x256xbf16>, vector<8x256xf32> -> vector<8x256xf32>
    %260 = vector.broadcast %254 : vector<1x256xf32> to vector<8x256xf32>
    %261 = arith.addf %259, %260 : vector<8x256xf32>
    %cst_108 = arith.constant 0.000000e+00 : f32
    %262 = vector.broadcast %cst_108 : f32 to vector<8x256xf32>
    %263 = arith.maximumf %261, %262 : vector<8x256xf32>
    %cst_109 = arith.constant dense<0.000000e+00> : vector<256xf32>
    %264 = vector.multi_reduction <add>, %263, %cst_109 [0] : vector<8x256xf32> to vector<256xf32>
    %265 = vector.shape_cast %264 : vector<256xf32> to vector<1x256xf32>
    %cst_110 = arith.constant 8.000000e+00 : f32
    %266 = vector.broadcast %cst_110 : f32 to vector<1x256xf32>
    %267 = arith.divf %265, %266 : vector<1x256xf32>
    %268 = vector.broadcast %267 : vector<1x256xf32> to vector<8x256xf32>
    %269 = arith.subf %263, %268 : vector<8x256xf32>
    %270 = arith.mulf %269, %269 : vector<8x256xf32>
    %cst_111 = arith.constant dense<0.000000e+00> : vector<256xf32>
    %271 = vector.multi_reduction <add>, %270, %cst_111 [0] : vector<8x256xf32> to vector<256xf32>
    %272 = vector.shape_cast %271 : vector<256xf32> to vector<1x256xf32>
    %cst_112 = arith.constant 8.000000e+00 : f32
    %273 = vector.broadcast %cst_112 : f32 to vector<1x256xf32>
    %274 = arith.divf %272, %273 : vector<1x256xf32>
    %cst_113 = arith.constant 9.99999974E-6 : f32
    %275 = vector.broadcast %cst_113 : f32 to vector<1x256xf32>
    %276 = arith.addf %274, %275 : vector<1x256xf32>
    %277 = math.rsqrt %276 : vector<1x256xf32>
    %278 = arith.mulf %255, %277 : vector<1x256xf32>
    %279 = vector.broadcast %278 : vector<1x256xf32> to vector<8x256xf32>
    %280 = arith.mulf %269, %279 : vector<8x256xf32>
    %281 = vector.broadcast %256 : vector<1x256xf32> to vector<8x256xf32>
    %282 = arith.addf %280, %281 : vector<8x256xf32>
    %c0_114 = arith.constant 0 : index
    %c5120 = arith.constant 5120 : index
    %283 = vector.load %arg2[%c0_114, %c5120] : memref<1x7552xf32, #tpu.memory_space<vmem>>, vector<1x512xf32>
    %c0_115 = arith.constant 0 : index
    %c5632 = arith.constant 5632 : index
    %284 = vector.load %arg2[%c0_115, %c5632] : memref<1x7552xf32, #tpu.memory_space<vmem>>, vector<1x512xf32>
    %c0_116 = arith.constant 0 : index
    %c6144 = arith.constant 6144 : index
    %285 = vector.load %arg2[%c0_116, %c6144] : memref<1x7552xf32, #tpu.memory_space<vmem>>, vector<1x512xf32>
    %c0_117 = arith.constant 0 : index
    %c0_118 = arith.constant 0 : index
    %286 = vector.load %arg20[%c0_117, %c0_118] : memref<256x512xbf16, #tpu.memory_space<vmem>>, vector<256x512xbf16>
    %287 = arith.truncf %282 : vector<8x256xf32> to vector<8x256xbf16>
    %cst_119 = arith.constant dense<0.000000e+00> : vector<8x512xf32>
    %288 = tpu.matmul %287, %286, %cst_119 {dimension_numbers = #tpu.dot_dimension_numbers<[1], [0], [0], [1], [0, 0, 1, 1], [], []>} : vector<8x256xbf16>, vector<256x512xbf16>, vector<8x512xf32> -> vector<8x512xf32>
    %289 = vector.broadcast %283 : vector<1x512xf32> to vector<8x512xf32>
    %290 = arith.addf %288, %289 : vector<8x512xf32>
    %cst_120 = arith.constant 0.000000e+00 : f32
    %291 = vector.broadcast %cst_120 : f32 to vector<8x512xf32>
    %292 = arith.maximumf %290, %291 : vector<8x512xf32>
    %cst_121 = arith.constant dense<0.000000e+00> : vector<512xf32>
    %293 = vector.multi_reduction <add>, %292, %cst_121 [0] : vector<8x512xf32> to vector<512xf32>
    %294 = vector.shape_cast %293 : vector<512xf32> to vector<1x512xf32>
    %cst_122 = arith.constant 8.000000e+00 : f32
    %295 = vector.broadcast %cst_122 : f32 to vector<1x512xf32>
    %296 = arith.divf %294, %295 : vector<1x512xf32>
    %297 = vector.broadcast %296 : vector<1x512xf32> to vector<8x512xf32>
    %298 = arith.subf %292, %297 : vector<8x512xf32>
    %299 = arith.mulf %298, %298 : vector<8x512xf32>
    %cst_123 = arith.constant dense<0.000000e+00> : vector<512xf32>
    %300 = vector.multi_reduction <add>, %299, %cst_123 [0] : vector<8x512xf32> to vector<512xf32>
    %301 = vector.shape_cast %300 : vector<512xf32> to vector<1x512xf32>
    %cst_124 = arith.constant 8.000000e+00 : f32
    %302 = vector.broadcast %cst_124 : f32 to vector<1x512xf32>
    %303 = arith.divf %301, %302 : vector<1x512xf32>
    %cst_125 = arith.constant 9.99999974E-6 : f32
    %304 = vector.broadcast %cst_125 : f32 to vector<1x512xf32>
    %305 = arith.addf %303, %304 : vector<1x512xf32>
    %306 = math.rsqrt %305 : vector<1x512xf32>
    %307 = arith.mulf %284, %306 : vector<1x512xf32>
    %308 = vector.broadcast %307 : vector<1x512xf32> to vector<8x512xf32>
    %309 = arith.mulf %298, %308 : vector<8x512xf32>
    %310 = vector.broadcast %285 : vector<1x512xf32> to vector<8x512xf32>
    %311 = arith.addf %309, %310 : vector<8x512xf32>
    %c0_126 = arith.constant 0 : index
    %c6656 = arith.constant 6656 : index
    %312 = vector.load %arg2[%c0_126, %c6656] : memref<1x7552xf32, #tpu.memory_space<vmem>>, vector<1x896xf32>
    %313 = arith.truncf %311 : vector<8x512xf32> to vector<8x512xbf16>
    %c0_127 = arith.constant 0 : index
    %c0_128 = arith.constant 0 : index
    %314 = vector.load %arg21[%c0_127, %c0_128] : memref<512x896xbf16, #tpu.memory_space<vmem>>, vector<512x896xbf16>
    %cst_129 = arith.constant dense<0.000000e+00> : vector<8x896xf32>
    %315 = tpu.matmul %313, %314, %cst_129 {dimension_numbers = #tpu.dot_dimension_numbers<[1], [0], [0], [1], [0, 0, 1, 1], [], []>} : vector<8x512xbf16>, vector<512x896xbf16>, vector<8x896xf32> -> vector<8x896xf32>
    %316 = vector.broadcast %312 : vector<1x896xf32> to vector<8x896xf32>
    %317 = arith.addf %315, %316 : vector<8x896xf32>
    %318 = arith.negf %317 : vector<8x896xf32>
    %319 = math.exp %318 : vector<8x896xf32>
    %cst_130 = arith.constant 1.000000e+00 : f32
    %320 = vector.broadcast %cst_130 : f32 to vector<8x896xf32>
    %321 = arith.addf %320, %319 : vector<8x896xf32>
    %322 = arith.divf %320, %321 : vector<8x896xf32>
    %c0_131 = arith.constant 0 : index
    %c0_132 = arith.constant 0 : index
    %323 = vector.load %arg14[%c0_131, %c0_132] : memref<8x896xf32, #tpu.memory_space<vmem>>, vector<8x896xf32>
    tpu.vector_store %arg14[%c0_131, %c0_132], %322 {strides = array<i32>} : memref<8x896xf32, #tpu.memory_space<vmem>>, vector<8x896xf32>,
    return
  }
}

</mosaic_0001>

<bundles_post_ra>
// kernel: vae_forward.1
= control target key start
LH: loop header
LB: loop body
LE: loop exit
PB: predicated region body
PF: predicated region fallthrough
CT: control target
= control target key end

     0   :  { %21 = vsyncpa [#allocation10], 0  ;;  %s7577_s0 = inlined_call_operand.vmem [shape: f32[8,896], index: 0, kind: input, shape index: {}]   ;;  %s7578_s1 = inlined_call_operand.vmem [shape: f32[8,10], index: 1, kind: input, shape index: {}]   ;;  %s7579_s2 = inlined_call_operand.hbm [shape: f32[1,7552], index: 2, kind: input, shape index: {}]   ;;  %s7580_s3 = inlined_call_operand.hbm [shape: bf16[896,512], index: 3, kind: input, shape index: {}]   ;;  %s7581_s4 = inlined_call_operand.vmem [shape: bf16[512,256], index: 4, kind: input, shape index: {}]   ;;  %s7582_s5 = inlined_call_operand.vmem [shape: bf16[256,64], index: 5, kind: input, shape index: {}]   ;;  %s7583_s6 = inlined_call_operand.vmem [shape: bf16[64,32], index: 6, kind: input, shape index: {}]   ;;  %s7584_s7 = inlined_call_operand.vmem [shape: bf16[32,20], index: 7, kind: input, shape index: {}]   ;;  %s7585_s8 = inlined_call_operand.hbm [shape: bf16[10,32], index: 8, kind: input, shape index: {}]   ;;  %s7586_s9 = inlined_call_operand.vmem [shape: bf16[32,64], index: 9, kind: input, shape index: {}]   ;;  %s7587_s10 = inlined_call_operand.hbm [shape: bf16[64,128], index: 10, kind: input, shape index: {}]   ;;  %s7588_s11 = inlined_call_operand.vmem [shape: bf16[128,256], index: 11, kind: input, shape index: {}]   ;;  %s7589_s12 = inlined_call_operand.vmem [shape: bf16[256,512], index: 12, kind: input, shape index: {}]   ;;  %s7590_s13 = inlined_call_operand.hbm [shape: bf16[512,896], index: 13, kind: input, shape index: {}]   ;;  %s7591_s14 = inlined_call_operand.vmem [shape: f32[8,896], index: 14, kind: output, shape index: {0}]   ;;  %s7592_s15 = inlined_call_operand.hbm [shape: f32[1], index: 15, kind: output, shape index: {1}]  }
   0x1   :  { %22 = vsyncpa [#allocation13], 0 }
   0x2   :  { %23 = vsyncpa [#allocation11], 0  ;;  %s6494_s18 = smov [#allocation9]   ;;  %s6495_s20 = smov [#allocation12]  }
   0x3   :  { %s34_s19 = sshll.u32 %s6494_s18, 4  ;;  %s43_s21 = sshll.u32 %s6495_s20, 4  ;;  %s35_s19 = int_to_ptr.vmem [resolvable:$true] %s34_s19  ;;  %s6597_s21 = int_to_ptr.vmem [resolvable:$true] %s43_s21 }
   0x4   :  { %s6378_s24 = scalar_lea.hbm %s7579_s2, 944 }
   0x5   :  { %p6379_p0 = scmp.ne.s32.totalorder %s7579_s2, %s6378_s24  ;;  %p6382_p1 = scmp.lt.u32.totalorder %s6378_s24, %s7579_s2 }
   0x7   :  { %p6384_p2 = pnand %p6382_p1, %p6379_p0 }
   0x9   :  { %6387 = shalt.err (!%p6384_p2)
}
   0xa   :  { %s6388_s29 = scalar_lea.vmem %s35_s19, 944  ;;  %s6392_s30 = scalar_lea.vmem %s35_s19, 960 }
   0xb   :  { %p6389_p3 = scmp.ne.s32.totalorder %s35_s19, %s6388_s29  ;;  %p6393_p4 = scmp.lt.s32.totalorder %s35_s19, %s35_s19 }
   0xc   :  { %p6394_p5 = scmp.lt.s32.totalorder %s6392_s30, %s6388_s29 }
   0xe   :  { %p6395_p6 = por %p6394_p5, %p6393_p4 }
  0x10   :  { %p6396_p7 = pnand %p6395_p6, %p6389_p3 }
  0x12   :  { %6399 = shalt.err (!%p6396_p7)
}
  0x13   :  { %37 = dma.hbm_to_vmem [thread:$0]  %s7579_s2, 944, %s35_s19, [#allocation10]  }
  0x14   :  { %s6400_s22 = scalar_lea.hbm %s7580_s3, 28672 }
  0x15   :  { %p6401_p8 = scmp.ne.s32.totalorder %s7580_s3, %s6400_s22  ;;  %p6404_p9 = scmp.lt.u32.totalorder %s6400_s22, %s7580_s3 }
  0x17   :  { %p6406_p10 = pnand %p6404_p9, %p6401_p8 }
  0x19   :  { %6409 = shalt.err (!%p6406_p10)
}
  0x1a   :  { %s6410_s27 = scalar_lea.vmem %s6597_s21, 28672  ;;  %p6415_p12 = scmp.lt.s32.totalorder %s6597_s21, %s6597_s21 }
  0x1b   :  { %p6411_p11 = scmp.ne.s32.totalorder %s6597_s21, %s6410_s27  ;;  %p6416_p13 = scmp.lt.s32.totalorder %s6410_s27, %s6410_s27 }
  0x1d   :  { %p6417_p0 = por %p6416_p13, %p6415_p12 }
  0x1f   :  { %p6418_p1 = pnand %p6417_p0, %p6411_p11 }
  0x21   :  { %6421 = shalt.err (!%p6418_p1)
}
  0x22   :  { %s6496_s2 = smov 256   ;;  %s6497_s19 = smov 16  }
  0x23   :  { %49 = dma.hbm_to_vmem [thread:$0]  %s7580_s3, 28672, %s6597_s21, [#allocation13], %s6496_s2, %s6496_s2, %s6497_s19  }
  0x24   :  { %6476 = dma.done.wait [#allocation10], 944  }
  0x25   :  { %6477 = vsyncadd [#allocation10], 4294966352 }
  0x26   :  { %6478 = dma.done.wait [#allocation13], 28672  }
  0x27   :  { %6479 = vsyncadd [#allocation13], 4294938624  ;;  %s6498_s30 = smov [#allocation2]   ;;  %s6422_s20 = scalar_lea.hbm %s7585_s8, 128 }
  0x28   :  { %s72_s16 = sshll.u32 %s6498_s30, 4  ;;  %p6423_p2 = scmp.ne.s32.totalorder %s7585_s8, %s6422_s20  ;;  %s73_s16 = int_to_ptr.vmem [resolvable:$true] %s72_s16 }
  0x29   :  { %p6426_p3 = scmp.lt.u32.totalorder %s6422_s20, %s7585_s8 }
  0x2b   :  { %p6428_p4 = pnand %p6426_p3, %p6423_p2 }
  0x2d   :  { %6431 = shalt.err (!%p6428_p4)  }
  0x2e   :  { %s6432_s3 = scalar_lea.vmem %s73_s16, 128  ;;  %p6437_p6 = scmp.lt.s32.totalorder %s73_s16, %s73_s16 }
  0x2f   :  { %p6433_p5 = scmp.ne.s32.totalorder %s73_s16, %s6432_s3  ;;  %p6438_p7 = scmp.lt.s32.totalorder %s6432_s3, %s6432_s3 }
  0x31   :  { %p6439_p8 = por %p6438_p7, %p6437_p6 }
  0x33   :  { %p6440_p9 = pnand %p6439_p8, %p6433_p5 }
  0x35   :  { %6443 = shalt.err (!%p6440_p9)  }
  0x36   :  { %75 = dma.hbm_to_vmem [thread:$0]  %s7585_s8, 128, %s73_s16, [#allocation8]  ;;  %v6643_v0 = vld [vmem:[%s7586_s9] sm:$0xff]  ;;  %v6648_v1 = vld [vmem:[%s7586_s9 + $0x8] sm:$0xff] }
  0x37   :  { %120 = vsyncadd [#allocation8 + $0x1], 256  ;;  %v151_v2 = vld [vmem:[%s7588_s11] sm:$0xf]  ;;  %v157_v3 = vld [vmem:[%s7588_s11 + $0xc] sm:$0xff]   ;;  %s6499_s8 = smov [#allocation4]  }
  0x38   :  { %s129_s16 = sshll.u32 %s6499_s8, 4  ;;  %152 = vst [vmem:[#allocation5] sm:$0xf] %v151_v2  ;;  %v153_v4 = vld [vmem:[%s7588_s11 + $0x8] sm:$0xf]  ;;  %158 = vst [vmem:[#allocation5 + $0xc] sm:$0xff] %v157_v3   ;;  %s130_s16 = int_to_ptr.vmem [resolvable:$true] %s129_s16 }
  0x39   :  { %v155_v5 = vld [vmem:[%s7588_s11 + $0x4] sm:$0xf]  ;;  %v165_v6 = vld [vmem:[%s7588_s11 + $0x1c] sm:$0xff]   ;;  %154 = vst [vmem:[#allocation5 + $0x4] sm:$0xf] %v153_v4  ;;  %s6444_s30 = scalar_lea.hbm %s7587_s10, 512 }
  0x3a   :  { %156 = vst [vmem:[#allocation5 + $0x8] sm:$0xf] %v155_v5  ;;  %v161_v7 = vld [vmem:[%s7588_s11 + $0x18] sm:$0xf]  ;;  %v163_v8 = vld [vmem:[%s7588_s11 + $0x14] sm:$0xf]  ;;  %p6445_p10 = scmp.ne.s32.totalorder %s7587_s10, %s6444_s30  ;;  %p6448_p11 = scmp.lt.u32.totalorder %s6444_s30, %s7587_s10 }
  0x3b   :  { %166 = vst [vmem:[#allocation5 + $0x1c] sm:$0xff] %v165_v6   ;;  %v169_v9 = vld [vmem:[%s7588_s11 + $0x28] sm:$0xf] }
  0x3c   :  { %p6450_p12 = pnand %p6448_p11, %p6445_p10 }
  0x3e   :  { %6453 = shalt.err (!%p6450_p12)  }
  0x3f   :  { %s6454_s22 = scalar_lea.vmem %s130_s16, 512  ;;  %p6459_p0 = scmp.lt.s32.totalorder %s130_s16, %s130_s16 }
  0x40   :  { %p6455_p13 = scmp.ne.s32.totalorder %s130_s16, %s6454_s22  ;;  %p6460_p1 = scmp.lt.s32.totalorder %s6454_s22, %s6454_s22 }
  0x42   :  { %p6461_p2 = por %p6460_p1, %p6459_p0 }
  0x44   :  { %p6462_p3 = pnand %p6461_p2, %p6455_p13 }
  0x46   :  { %6465 = shalt.err (!%p6462_p3)  }
  0x47   :  { %132 = dma.hbm_to_vmem [thread:$0]  %s7587_s10, 512, %s130_s16, [#allocation8 + $0x2]  ;;  %162 = vst [vmem:[#allocation5 + $0x14] sm:$0xf] %v161_v7  ;;  %164 = vst [vmem:[#allocation5 + $0x18] sm:$0xf] %v163_v8 }
  0x48   :  { %170 = vst [vmem:[#allocation5 + $0x24] sm:$0xf] %v169_v9  ;;  %v171_v10 = vld [vmem:[%s7588_s11 + $0x24] sm:$0xf]  ;;  %v173_v11 = vld [vmem:[%s7588_s11 + $0x2c] sm:$0xff]   ;;  %v181_v12 = vld [vmem:[%s7588_s11 + $0x3c] sm:$0xff]  }
  0x49   :  { %172 = vst [vmem:[#allocation5 + $0x28] sm:$0xf] %v171_v10  ;;  %174 = vst [vmem:[#allocation5 + $0x2c] sm:$0xff] %v173_v11   ;;  %v177_v13 = vld [vmem:[%s7588_s11 + $0x38] sm:$0xf]  ;;  %v189_v17 = vld [vmem:[%s7588_s11 + $0x4c] sm:$0xff]  }
  0x4a   :  { %v179_v14 = vld [vmem:[%s7588_s11 + $0x34] sm:$0xf]  ;;  %182 = vst [vmem:[#allocation5 + $0x3c] sm:$0xff] %v181_v12   ;;  %v185_v15 = vld [vmem:[%s7588_s11 + $0x48] sm:$0xf]  ;;  %190 = vst [vmem:[#allocation5 + $0x4c] sm:$0xff] %v189_v17  }
  0x4b   :  { %178 = vst [vmem:[#allocation5 + $0x34] sm:$0xf] %v177_v13  ;;  %180 = vst [vmem:[#allocation5 + $0x38] sm:$0xf] %v179_v14  ;;  %v187_v16 = vld [vmem:[%s7588_s11 + $0x44] sm:$0xf] }
  0x4c   :  { %186 = vst [vmem:[#allocation5 + $0x44] sm:$0xf] %v185_v15  ;;  %v193_v18 = vld [vmem:[%s7588_s11 + $0x58] sm:$0xf]  ;;  %188 = vst [vmem:[#allocation5 + $0x48] sm:$0xf] %v187_v16 }
  0x4d   :  { %194 = vst [vmem:[#allocation5 + $0x54] sm:$0xf] %v193_v18  ;;  %v195_v19 = vld [vmem:[%s7588_s11 + $0x54] sm:$0xf]  ;;  %v197_v20 = vld [vmem:[%s7588_s11 + $0x5c] sm:$0xff]   ;;  %v205_v23 = vld [vmem:[%s7588_s11 + $0x6c] sm:$0xff]  }
  0x4e   :  { %v201_v21 = vld [vmem:[%s7588_s11 + $0x68] sm:$0xf]  ;;  %196 = vst [vmem:[#allocation5 + $0x58] sm:$0xf] %v195_v19  ;;  %198 = vst [vmem:[#allocation5 + $0x5c] sm:$0xff] %v197_v20  }
  0x4f   :  { %202 = vst [vmem:[#allocation5 + $0x64] sm:$0xf] %v201_v21  ;;  %v203_v22 = vld [vmem:[%s7588_s11 + $0x64] sm:$0xf]  ;;  %v209_v24 = vld [vmem:[%s7588_s11 + $0x78] sm:$0xf] }
  0x50   :  { %204 = vst [vmem:[#allocation5 + $0x68] sm:$0xf] %v203_v22  ;;  %206 = vst [vmem:[#allocation5 + $0x6c] sm:$0xff] %v205_v23   ;;  %v211_v25 = vld [vmem:[%s7588_s11 + $0x74] sm:$0xf] }
  0x51   :  { %210 = vst [vmem:[#allocation5 + $0x74] sm:$0xf] %v209_v24  ;;  %v213_v26 = vld [vmem:[%s7588_s11 + $0x7c] sm:$0xf]  ;;  %212 = vst [vmem:[#allocation5 + $0x78] sm:$0xf] %v211_v25 }
  0x52   :  { %214 = vst [vmem:[#allocation5 + $0x7c] sm:$0xf] %v213_v26 }
  0x53   :  { %309 = vsyncadd [#allocation8 + $0x3], 2048  ;;  %v328_v27 = vld [vmem:[%s7589_s12] sm:$0xf]  ;;  %v330_v28 = vld [vmem:[%s7589_s12 + $0x10] sm:$0xf] }
  0x54   :  { %329 = vst [vmem:[#allocation6] sm:$0xf] %v328_v27  ;;  %331 = vst [vmem:[#allocation6 + $0x4] sm:$0xf] %v330_v28  ;;  %v332_v29 = vld [vmem:[%s7589_s12 + $0x4] sm:$0xf] }
  0x55   :  { %v334_v30 = vld [vmem:[%s7589_s12 + $0x14] sm:$0xf]  ;;  %v336_v31 = vld [vmem:[%s7589_s12 + $0x8] sm:$0xf]  ;;  %333 = vst [vmem:[#allocation6 + $0x8] sm:$0xf] %v332_v29 }
  0x56   :  { %335 = vst [vmem:[#allocation6 + $0xc] sm:$0xf] %v334_v30  ;;  %337 = vst [vmem:[#allocation6 + $0x10] sm:$0xf] %v336_v31  ;;  %v338_v32 = vld [vmem:[%s7589_s12 + $0x18] sm:$0xf] }
  0x57   :  { %v340_v33 = vld [vmem:[%s7589_s12 + $0xc] sm:$0xf]  ;;  %v342_v34 = vld [vmem:[%s7589_s12 + $0x1c] sm:$0xff]   ;;  %339 = vst [vmem:[#allocation6 + $0x14] sm:$0xf] %v338_v32 }
  0x58   :  { %341 = vst [vmem:[#allocation6 + $0x18] sm:$0xf] %v340_v33  ;;  %343 = vst [vmem:[#allocation6 + $0x1c] sm:$0xff] %v342_v34   ;;  %v346_v35 = vld [vmem:[%s7589_s12 + $0x30] sm:$0xf]  ;;  %v358_v41 = vld [vmem:[%s7589_s12 + $0x3c] sm:$0xff]  }
  0x59   :  { %v348_v36 = vld [vmem:[%s7589_s12 + $0x24] sm:$0xf]  ;;  %v350_v37 = vld [vmem:[%s7589_s12 + $0x34] sm:$0xf]  ;;  %347 = vst [vmem:[#allocation6 + $0x24] sm:$0xf] %v346_v35 }
  0x5a   :  { %349 = vst [vmem:[#allocation6 + $0x28] sm:$0xf] %v348_v36  ;;  %351 = vst [vmem:[#allocation6 + $0x2c] sm:$0xf] %v350_v37  ;;  %v352_v38 = vld [vmem:[%s7589_s12 + $0x28] sm:$0xf] }
  0x5b   :  { %v354_v39 = vld [vmem:[%s7589_s12 + $0x38] sm:$0xf]  ;;  %v356_v40 = vld [vmem:[%s7589_s12 + $0x2c] sm:$0xf]  ;;  %353 = vst [vmem:[#allocation6 + $0x30] sm:$0xf] %v352_v38 }
  0x5c   :  { %355 = vst [vmem:[#allocation6 + $0x34] sm:$0xf] %v354_v39  ;;  %357 = vst [vmem:[#allocation6 + $0x38] sm:$0xf] %v356_v40  ;;  %v362_v42 = vld [vmem:[%s7589_s12 + $0x50] sm:$0xf] }
  0x5d   :  { %v364_v43 = vld [vmem:[%s7589_s12 + $0x44] sm:$0xf]  ;;  %359 = vst [vmem:[#allocation6 + $0x3c] sm:$0xff] %v358_v41   ;;  %363 = vst [vmem:[#allocation6 + $0x44] sm:$0xf] %v362_v42  ;;  %v374_v48 = vld [vmem:[%s7589_s12 + $0x5c] sm:$0xff]  }
  0x5e   :  { %365 = vst [vmem:[#allocation6 + $0x48] sm:$0xf] %v364_v43  ;;  %v366_v44 = vld [vmem:[%s7589_s12 + $0x54] sm:$0xf]  ;;  %v368_v45 = vld [vmem:[%s7589_s12 + $0x48] sm:$0xf] }
  0x5f   :  { %v370_v46 = vld [vmem:[%s7589_s12 + $0x58] sm:$0xf]  ;;  %367 = vst [vmem:[#allocation6 + $0x4c] sm:$0xf] %v366_v44  ;;  %369 = vst [vmem:[#allocation6 + $0x50] sm:$0xf] %v368_v45 }
  0x60   :  { %371 = vst [vmem:[#allocation6 + $0x54] sm:$0xf] %v370_v46  ;;  %v372_v47 = vld [vmem:[%s7589_s12 + $0x4c] sm:$0xf]  ;;  %v378_v49 = vld [vmem:[%s7589_s12 + $0x70] sm:$0xf] }
  0x61   :  { %373 = vst [vmem:[#allocation6 + $0x58] sm:$0xf] %v372_v47  ;;  %375 = vst [vmem:[#allocation6 + $0x5c] sm:$0xff] %v374_v48   ;;  %v380_v50 = vld [vmem:[%s7589_s12 + $0x64] sm:$0xf]  ;;  %v390_v55 = vld [vmem:[%s7589_s12 + $0x7c] sm:$0xff]  }
  0x62   :  { %379 = vst [vmem:[#allocation6 + $0x64] sm:$0xf] %v378_v49  ;;  %v382_v51 = vld [vmem:[%s7589_s12 + $0x74] sm:$0xf]  ;;  %v384_v52 = vld [vmem:[%s7589_s12 + $0x68] sm:$0xf] }
  0x63   :  { %381 = vst [vmem:[#allocation6 + $0x68] sm:$0xf] %v380_v50  ;;  %383 = vst [vmem:[#allocation6 + $0x6c] sm:$0xf] %v382_v51  ;;  %v386_v53 = vld [vmem:[%s7589_s12 + $0x78] sm:$0xf] }
  0x64   :  { %385 = vst [vmem:[#allocation6 + $0x70] sm:$0xf] %v384_v52  ;;  %v388_v54 = vld [vmem:[%s7589_s12 + $0x6c] sm:$0xf]  ;;  %387 = vst [vmem:[#allocation6 + $0x74] sm:$0xf] %v386_v53 }
  0x65   :  { %389 = vst [vmem:[#allocation6 + $0x78] sm:$0xf] %v388_v54  ;;  %391 = vst [vmem:[#allocation6 + $0x7c] sm:$0xff] %v390_v55   ;;  %v394_v56 = vld [vmem:[%s7589_s12 + $0x90] sm:$0xf]  ;;  %v406_v62 = vld [vmem:[%s7589_s12 + $0x9c] sm:$0xff]  }
  0x66   :  { %v396_v57 = vld [vmem:[%s7589_s12 + $0x84] sm:$0xf]  ;;  %v398_v58 = vld [vmem:[%s7589_s12 + $0x94] sm:$0xf]  ;;  %395 = vst [vmem:[#allocation6 + $0x84] sm:$0xf] %v394_v56 }
  0x67   :  { %397 = vst [vmem:[#allocation6 + $0x88] sm:$0xf] %v396_v57  ;;  %399 = vst [vmem:[#allocation6 + $0x8c] sm:$0xf] %v398_v58  ;;  %v400_v59 = vld [vmem:[%s7589_s12 + $0x88] sm:$0xf] }
  0x68   :  { %v402_v60 = vld [vmem:[%s7589_s12 + $0x98] sm:$0xf]  ;;  %v404_v61 = vld [vmem:[%s7589_s12 + $0x8c] sm:$0xf]  ;;  %401 = vst [vmem:[#allocation6 + $0x90] sm:$0xf] %v400_v59 }
  0x69   :  { %403 = vst [vmem:[#allocation6 + $0x94] sm:$0xf] %v402_v60  ;;  %405 = vst [vmem:[#allocation6 + $0x98] sm:$0xf] %v404_v61  ;;  %v410_v63 = vld [vmem:[%s7589_s12 + $0xb0] sm:$0xf] }
  0x6a   :  { %v412_v2 = vld [vmem:[%s7589_s12 + $0xa4] sm:$0xf]  ;;  %407 = vst [vmem:[#allocation6 + $0x9c] sm:$0xff] %v406_v62   ;;  %411 = vst [vmem:[#allocation6 + $0xa4] sm:$0xf] %v410_v63  ;;  %v422_v7 = vld [vmem:[%s7589_s12 + $0xbc] sm:$0xff]  }
  0x6b   :  { %413 = vst [vmem:[#allocation6 + $0xa8] sm:$0xf] %v412_v2  ;;  %v414_v3 = vld [vmem:[%s7589_s12 + $0xb4] sm:$0xf]  ;;  %v416_v4 = vld [vmem:[%s7589_s12 + $0xa8] sm:$0xf] }
  0x6c   :  { %v418_v5 = vld [vmem:[%s7589_s12 + $0xb8] sm:$0xf]  ;;  %415 = vst [vmem:[#allocation6 + $0xac] sm:$0xf] %v414_v3  ;;  %417 = vst [vmem:[#allocation6 + $0xb0] sm:$0xf] %v416_v4 }
  0x6d   :  { %419 = vst [vmem:[#allocation6 + $0xb4] sm:$0xf] %v418_v5  ;;  %v420_v6 = vld [vmem:[%s7589_s12 + $0xac] sm:$0xf]  ;;  %v426_v8 = vld [vmem:[%s7589_s12 + $0xd0] sm:$0xf] }
  0x6e   :  { %421 = vst [vmem:[#allocation6 + $0xb8] sm:$0xf] %v420_v6  ;;  %423 = vst [vmem:[#allocation6 + $0xbc] sm:$0xff] %v422_v7   ;;  %v428_v9 = vld [vmem:[%s7589_s12 + $0xc4] sm:$0xf]  ;;  %v438_v14 = vld [vmem:[%s7589_s12 + $0xdc] sm:$0xff]  }
  0x6f   :  { %427 = vst [vmem:[#allocation6 + $0xc4] sm:$0xf] %v426_v8  ;;  %v430_v10 = vld [vmem:[%s7589_s12 + $0xd4] sm:$0xf]  ;;  %v432_v11 = vld [vmem:[%s7589_s12 + $0xc8] sm:$0xf] }
  0x70   :  { %429 = vst [vmem:[#allocation6 + $0xc8] sm:$0xf] %v428_v9  ;;  %431 = vst [vmem:[#allocation6 + $0xcc] sm:$0xf] %v430_v10  ;;  %v434_v12 = vld [vmem:[%s7589_s12 + $0xd8] sm:$0xf] }
  0x71   :  { %433 = vst [vmem:[#allocation6 + $0xd0] sm:$0xf] %v432_v11  ;;  %v436_v13 = vld [vmem:[%s7589_s12 + $0xcc] sm:$0xf]  ;;  %435 = vst [vmem:[#allocation6 + $0xd4] sm:$0xf] %v434_v12 }
  0x72   :  { %437 = vst [vmem:[#allocation6 + $0xd8] sm:$0xf] %v436_v13  ;;  %439 = vst [vmem:[#allocation6 + $0xdc] sm:$0xff] %v438_v14   ;;  %v442_v15 = vld [vmem:[%s7589_s12 + $0xf0] sm:$0xf]  ;;  %v454_v21 = vld [vmem:[%s7589_s12 + $0xfc] sm:$0xff]  }
  0x73   :  { %v444_v16 = vld [vmem:[%s7589_s12 + $0xe4] sm:$0xf]  ;;  %v446_v17 = vld [vmem:[%s7589_s12 + $0xf4] sm:$0xf]  ;;  %443 = vst [vmem:[#allocation6 + $0xe4] sm:$0xf] %v442_v15 }
  0x74   :  { %445 = vst [vmem:[#allocation6 + $0xe8] sm:$0xf] %v444_v16  ;;  %447 = vst [vmem:[#allocation6 + $0xec] sm:$0xf] %v446_v17  ;;  %v448_v18 = vld [vmem:[%s7589_s12 + $0xe8] sm:$0xf] }
  0x75   :  { %v450_v19 = vld [vmem:[%s7589_s12 + $0xf8] sm:$0xf]  ;;  %v452_v20 = vld [vmem:[%s7589_s12 + $0xec] sm:$0xf]  ;;  %449 = vst [vmem:[#allocation6 + $0xf0] sm:$0xf] %v448_v18 }
  0x76   :  { %451 = vst [vmem:[#allocation6 + $0xf4] sm:$0xf] %v450_v19  ;;  %453 = vst [vmem:[#allocation6 + $0xf8] sm:$0xf] %v452_v20  ;;  %v458_v22 = vld [vmem:[%s7589_s12 + $0x110] sm:$0xf] }
  0x77   :  { %v460_v23 = vld [vmem:[%s7589_s12 + $0x104] sm:$0xf]  ;;  %455 = vst [vmem:[#allocation6 + $0xfc] sm:$0xff] %v454_v21   ;;  %459 = vst [vmem:[#allocation6 + $0x104] sm:$0xf] %v458_v22  ;;  %v470_v28 = vld [vmem:[%s7589_s12 + $0x11c] sm:$0xff]  }
  0x78   :  { %461 = vst [vmem:[#allocation6 + $0x108] sm:$0xf] %v460_v23  ;;  %v462_v24 = vld [vmem:[%s7589_s12 + $0x114] sm:$0xf]  ;;  %v464_v25 = vld [vmem:[%s7589_s12 + $0x108] sm:$0xf] }
  0x79   :  { %v466_v26 = vld [vmem:[%s7589_s12 + $0x118] sm:$0xf]  ;;  %463 = vst [vmem:[#allocation6 + $0x10c] sm:$0xf] %v462_v24  ;;  %465 = vst [vmem:[#allocation6 + $0x110] sm:$0xf] %v464_v25 }
  0x7a   :  { %467 = vst [vmem:[#allocation6 + $0x114] sm:$0xf] %v466_v26  ;;  %v468_v27 = vld [vmem:[%s7589_s12 + $0x10c] sm:$0xf]  ;;  %v474_v29 = vld [vmem:[%s7589_s12 + $0x130] sm:$0xf] }
  0x7b   :  { %469 = vst [vmem:[#allocation6 + $0x118] sm:$0xf] %v468_v27  ;;  %471 = vst [vmem:[#allocation6 + $0x11c] sm:$0xff] %v470_v28   ;;  %v476_v30 = vld [vmem:[%s7589_s12 + $0x124] sm:$0xf]  ;;  %v486_v35 = vld [vmem:[%s7589_s12 + $0x13c] sm:$0xff]  }
  0x7c   :  { %475 = vst [vmem:[#allocation6 + $0x124] sm:$0xf] %v474_v29  ;;  %v478_v31 = vld [vmem:[%s7589_s12 + $0x134] sm:$0xf]  ;;  %v480_v32 = vld [vmem:[%s7589_s12 + $0x128] sm:$0xf] }
  0x7d   :  { %477 = vst [vmem:[#allocation6 + $0x128] sm:$0xf] %v476_v30  ;;  %479 = vst [vmem:[#allocation6 + $0x12c] sm:$0xf] %v478_v31  ;;  %v482_v33 = vld [vmem:[%s7589_s12 + $0x138] sm:$0xf] }
  0x7e   :  { %481 = vst [vmem:[#allocation6 + $0x130] sm:$0xf] %v480_v32  ;;  %v484_v34 = vld [vmem:[%s7589_s12 + $0x12c] sm:$0xf]  ;;  %483 = vst [vmem:[#allocation6 + $0x134] sm:$0xf] %v482_v33 }
  0x7f   :  { %485 = vst [vmem:[#allocation6 + $0x138] sm:$0xf] %v484_v34  ;;  %487 = vst [vmem:[#allocation6 + $0x13c] sm:$0xff] %v486_v35   ;;  %v490_v36 = vld [vmem:[%s7589_s12 + $0x150] sm:$0xf]  ;;  %v502_v42 = vld [vmem:[%s7589_s12 + $0x15c] sm:$0xff]  }
  0x80   :  { %v492_v37 = vld [vmem:[%s7589_s12 + $0x144] sm:$0xf]  ;;  %v494_v38 = vld [vmem:[%s7589_s12 + $0x154] sm:$0xf]  ;;  %491 = vst [vmem:[#allocation6 + $0x144] sm:$0xf] %v490_v36 }
  0x81   :  { %493 = vst [vmem:[#allocation6 + $0x148] sm:$0xf] %v492_v37  ;;  %495 = vst [vmem:[#allocation6 + $0x14c] sm:$0xf] %v494_v38  ;;  %v496_v39 = vld [vmem:[%s7589_s12 + $0x148] sm:$0xf] }
  0x82   :  { %v498_v40 = vld [vmem:[%s7589_s12 + $0x158] sm:$0xf]  ;;  %v500_v41 = vld [vmem:[%s7589_s12 + $0x14c] sm:$0xf]  ;;  %497 = vst [vmem:[#allocation6 + $0x150] sm:$0xf] %v496_v39 }
  0x83   :  { %499 = vst [vmem:[#allocation6 + $0x154] sm:$0xf] %v498_v40  ;;  %501 = vst [vmem:[#allocation6 + $0x158] sm:$0xf] %v500_v41  ;;  %v506_v43 = vld [vmem:[%s7589_s12 + $0x170] sm:$0xf] }
  0x84   :  { %v508_v44 = vld [vmem:[%s7589_s12 + $0x164] sm:$0xf]  ;;  %503 = vst [vmem:[#allocation6 + $0x15c] sm:$0xff] %v502_v42   ;;  %507 = vst [vmem:[#allocation6 + $0x164] sm:$0xf] %v506_v43  ;;  %v518_v49 = vld [vmem:[%s7589_s12 + $0x17c] sm:$0xff]  }
  0x85   :  { %509 = vst [vmem:[#allocation6 + $0x168] sm:$0xf] %v508_v44  ;;  %v510_v45 = vld [vmem:[%s7589_s12 + $0x174] sm:$0xf]  ;;  %v512_v46 = vld [vmem:[%s7589_s12 + $0x168] sm:$0xf] }
  0x86   :  { %v514_v47 = vld [vmem:[%s7589_s12 + $0x178] sm:$0xf]  ;;  %511 = vst [vmem:[#allocation6 + $0x16c] sm:$0xf] %v510_v45  ;;  %513 = vst [vmem:[#allocation6 + $0x170] sm:$0xf] %v512_v46 }
  0x87   :  { %515 = vst [vmem:[#allocation6 + $0x174] sm:$0xf] %v514_v47  ;;  %v516_v48 = vld [vmem:[%s7589_s12 + $0x16c] sm:$0xf]  ;;  %v522_v50 = vld [vmem:[%s7589_s12 + $0x190] sm:$0xf] }
  0x88   :  { %517 = vst [vmem:[#allocation6 + $0x178] sm:$0xf] %v516_v48  ;;  %519 = vst [vmem:[#allocation6 + $0x17c] sm:$0xff] %v518_v49   ;;  %v524_v51 = vld [vmem:[%s7589_s12 + $0x184] sm:$0xf]  ;;  %v534_v56 = vld [vmem:[%s7589_s12 + $0x19c] sm:$0xff]  }
  0x89   :  { %523 = vst [vmem:[#allocation6 + $0x184] sm:$0xf] %v522_v50  ;;  %v526_v52 = vld [vmem:[%s7589_s12 + $0x194] sm:$0xf]  ;;  %v528_v53 = vld [vmem:[%s7589_s12 + $0x188] sm:$0xf] }
  0x8a   :  { %525 = vst [vmem:[#allocation6 + $0x188] sm:$0xf] %v524_v51  ;;  %527 = vst [vmem:[#allocation6 + $0x18c] sm:$0xf] %v526_v52  ;;  %v530_v54 = vld [vmem:[%s7589_s12 + $0x198] sm:$0xf] }
  0x8b   :  { %529 = vst [vmem:[#allocation6 + $0x190] sm:$0xf] %v528_v53  ;;  %v532_v55 = vld [vmem:[%s7589_s12 + $0x18c] sm:$0xf]  ;;  %531 = vst [vmem:[#allocation6 + $0x194] sm:$0xf] %v530_v54 }
  0x8c   :  { %533 = vst [vmem:[#allocation6 + $0x198] sm:$0xf] %v532_v55  ;;  %535 = vst [vmem:[#allocation6 + $0x19c] sm:$0xff] %v534_v56   ;;  %v538_v57 = vld [vmem:[%s7589_s12 + $0x1b0] sm:$0xf]  ;;  %v550_v63 = vld [vmem:[%s7589_s12 + $0x1bc] sm:$0xff]  }
  0x8d   :  { %v540_v58 = vld [vmem:[%s7589_s12 + $0x1a4] sm:$0xf]  ;;  %v542_v59 = vld [vmem:[%s7589_s12 + $0x1b4] sm:$0xf]  ;;  %539 = vst [vmem:[#allocation6 + $0x1a4] sm:$0xf] %v538_v57 }
  0x8e   :  { %541 = vst [vmem:[#allocation6 + $0x1a8] sm:$0xf] %v540_v58  ;;  %543 = vst [vmem:[#allocation6 + $0x1ac] sm:$0xf] %v542_v59  ;;  %v544_v60 = vld [vmem:[%s7589_s12 + $0x1a8] sm:$0xf] }
  0x8f   :  { %v546_v61 = vld [vmem:[%s7589_s12 + $0x1b8] sm:$0xf]  ;;  %v548_v62 = vld [vmem:[%s7589_s12 + $0x1ac] sm:$0xf]  ;;  %545 = vst [vmem:[#allocation6 + $0x1b0] sm:$0xf] %v544_v60 }
  0x90   :  { %547 = vst [vmem:[#allocation6 + $0x1b4] sm:$0xf] %v546_v61  ;;  %549 = vst [vmem:[#allocation6 + $0x1b8] sm:$0xf] %v548_v62  ;;  %v554_v2 = vld [vmem:[%s7589_s12 + $0x1d0] sm:$0xf] }
  0x91   :  { %v556_v3 = vld [vmem:[%s7589_s12 + $0x1c4] sm:$0xf]  ;;  %551 = vst [vmem:[#allocation6 + $0x1bc] sm:$0xff] %v550_v63   ;;  %555 = vst [vmem:[#allocation6 + $0x1c4] sm:$0xf] %v554_v2  ;;  %v566_v8 = vld [vmem:[%s7589_s12 + $0x1dc] sm:$0xff]  }
  0x92   :  { %557 = vst [vmem:[#allocation6 + $0x1c8] sm:$0xf] %v556_v3  ;;  %v558_v4 = vld [vmem:[%s7589_s12 + $0x1d4] sm:$0xf]  ;;  %v560_v5 = vld [vmem:[%s7589_s12 + $0x1c8] sm:$0xf] }
  0x93   :  { %v562_v6 = vld [vmem:[%s7589_s12 + $0x1d8] sm:$0xf]  ;;  %559 = vst [vmem:[#allocation6 + $0x1cc] sm:$0xf] %v558_v4  ;;  %561 = vst [vmem:[#allocation6 + $0x1d0] sm:$0xf] %v560_v5 }
  0x94   :  { %563 = vst [vmem:[#allocation6 + $0x1d4] sm:$0xf] %v562_v6  ;;  %v564_v7 = vld [vmem:[%s7589_s12 + $0x1cc] sm:$0xf]  ;;  %v570_v9 = vld [vmem:[%s7589_s12 + $0x1f0] sm:$0xf] }
  0x95   :  { %565 = vst [vmem:[#allocation6 + $0x1d8] sm:$0xf] %v564_v7  ;;  %567 = vst [vmem:[#allocation6 + $0x1dc] sm:$0xff] %v566_v8   ;;  %v572_v10 = vld [vmem:[%s7589_s12 + $0x1e4] sm:$0xf] }
  0x96   :  { %571 = vst [vmem:[#allocation6 + $0x1e4] sm:$0xf] %v570_v9  ;;  %v574_v11 = vld [vmem:[%s7589_s12 + $0x1f4] sm:$0xf]  ;;  %v576_v12 = vld [vmem:[%s7589_s12 + $0x1e8] sm:$0xf] }
  0x97   :  { %573 = vst [vmem:[#allocation6 + $0x1e8] sm:$0xf] %v572_v10  ;;  %575 = vst [vmem:[#allocation6 + $0x1ec] sm:$0xf] %v574_v11  ;;  %v578_v13 = vld [vmem:[%s7589_s12 + $0x1f8] sm:$0xf] }
  0x98   :  { %577 = vst [vmem:[#allocation6 + $0x1f0] sm:$0xf] %v576_v12  ;;  %v580_v14 = vld [vmem:[%s7589_s12 + $0x1ec] sm:$0xf]  ;;  %v582_v15 = vld [vmem:[%s7589_s12 + $0x1fc] sm:$0xf] }
  0x99   :  { %579 = vst [vmem:[#allocation6 + $0x1f4] sm:$0xf] %v578_v13  ;;  %581 = vst [vmem:[#allocation6 + $0x1f8] sm:$0xf] %v580_v14 }
  0x9a   :  { %583 = vst [vmem:[#allocation6 + $0x1fc] sm:$0xf] %v582_v15 }
  0x9b   :  { %870 = vsyncadd [#allocation8 + $0x4], 8192  ;;  %s876_s16 = sld [smem:[#allocation0]]   ;;  %s6500_s28 = smov [#allocation7]   ;;  %vm6513_vm0 = vmmov 0   ;;  %vm3521_vm1 = vcmask 523264  }
  0x9c   :  { %s884_s29 = sshll.u32 %s6500_s28, 4  ;;  %s6501_s30 = smov 896   ;;  %vm3643_vm2 = vcmask 261120   ;;  %vm3772_vm3 = vcmask 80896   ;;  %s885_s29 = int_to_ptr.vmem [resolvable:$true] %s884_s29 }
  0x9d   :  { %888 = sst [smem:[#allocation25]] %s6501_s30  ;;  %s6502_s17 = smov 7  }
  0x9e   :  { %890 = sst [smem:[#allocation25 + $0x1]] %s6501_s30  ;;  %s6503_s18 = smov 64  }
  0x9f   :  { %892 = sst [smem:[#allocation25 + $0x2]] %s6502_s17  ;;  %s6504_s20 = smov 128  }
  0xa0   :  { %894 = sst [smem:[#allocation25 + $0x3]] %s6503_s18  ;;  %s6505_s12 = smov 2  }
  0xa1   :  { %s5311_s8 = sshll.u32 %s876_s16, 26  ;;  %896 = sst [smem:[#allocation25 + $0x4]] %s6504_s20 }
  0xa2   :  { %s5312_s22 = sadd.s32 134217728, %s5311_s8  ;;  %898 = sst [smem:[#allocation25 + $0x5]] %s6505_s12 }
  0xa3   :  { %s6506_s23 = smov 448   ;;  %902 = sst [smem:[#allocation25 + $0x7]] %s6503_s18 }
  0xa4   :  { %900 = sst [smem:[#allocation25 + $0x6]] %s6506_s23  ;;  %s6507_s24 = smov 4  }
  0xa5   :  { %904 = sst [smem:[#allocation25 + $0x8]] %s6507_s24  ;;  %s6508_s9 = smov [#allocation8 + $0x5]  }
  0xa6   :  { %s6509_s25 = smov [#allocation24]  }
  0xa7   :  { %906 = dma.general %s7590_s13, 28672, %s885_s29, %s6508_s9, %s6509_s25, [#allocation25], %s5312_s22, 0  }
  0xa8   :  { %v5859_v16 = vld [vmem:[#allocation12 + $0x4] ss:$16 sps:$4 sm:$0xff]   ;;  %v5861_v17 = vld [vmem:[#allocation12 + $0xc] ss:$16 sps:$4 sm:$0xff]   ;;  %v5863_v18 = vld [vmem:[#allocation12] ss:$16 sps:$4 sm:$0xff]  }
  0xa9   :  { %2289 = vmatprep.subr.bf16.mxu0 %v5859_v16  ;;  %v5864_v19 = vld [vmem:[#allocation12 + $0x8] ss:$16 sps:$4 sm:$0xff]   ;;  %2453 = vmatprep.subr.bf16.mxu1 %v5861_v17  ;;  %v5865_v20 = vld [vmem:[#allocation12 + $0x24] ss:$16 sps:$4 sm:$0xff]   ;;  %v5867_v21 = vld [vmem:[#allocation12 + $0x2c] ss:$16 sps:$4 sm:$0xff]  }
  0xaa   :  { %2290 = vmatpush1.bf16.msra.mxu0 %v5863_v18  ;;  %2454 = vmatpush1.bf16.msra.mxu1 %v5864_v19  ;;  %v5869_v22 = vld [vmem:[#allocation12 + $0x20] ss:$16 sps:$4 sm:$0xff]   ;;  %v5870_v23 = vld [vmem:[#allocation12 + $0x28] ss:$16 sps:$4 sm:$0xff]   ;;  %v5871_v24 = vld [vmem:[#allocation12 + $0x44] ss:$16 sps:$4 sm:$0xff]  }
  0xab   :  { %2291 = vmatprep.subr.bf16.mxu0 %v5865_v20  ;;  %2455 = vmatprep.subr.bf16.mxu1 %v5867_v21  ;;  %v5873_v25 = vld [vmem:[#allocation12 + $0x4c] ss:$16 sps:$4 sm:$0xff]   ;;  %v5875_v26 = vld [vmem:[#allocation12 + $0x40] ss:$16 sps:$4 sm:$0xff]   ;;  %v5876_v27 = vld [vmem:[#allocation12 + $0x48] ss:$16 sps:$4 sm:$0xff]  }
  0xac   :  { %v5877_v28 = vld [vmem:[#allocation12 + $0x64] ss:$16 sps:$4 sm:$0xff]   ;;  %v5879_v29 = vld [vmem:[#allocation12 + $0x6c] ss:$16 sps:$4 sm:$0xff]   ;;  %v5881_v30 = vld [vmem:[#allocation12 + $0x60] ss:$16 sps:$4 sm:$0xff]  }
  0xad   :  { %v5882_v31 = vld [vmem:[#allocation12 + $0x68] ss:$16 sps:$4 sm:$0xff]   ;;  %v5883_v32 = vld [vmem:[#allocation12 + $0x84] ss:$16 sps:$4 sm:$0xff]   ;;  %v5885_v33 = vld [vmem:[#allocation12 + $0x8c] ss:$16 sps:$4 sm:$0xff]  }
  0xae   :  { %2292 = vmatpush1.bf16.msra.mxu0 %v5869_v22  ;;  %2456 = vmatpush1.bf16.msra.mxu1 %v5870_v23  ;;  %v5887_v34 = vld [vmem:[#allocation12 + $0x80] ss:$16 sps:$4 sm:$0xff]   ;;  %v5888_v35 = vld [vmem:[#allocation12 + $0x88] ss:$16 sps:$4 sm:$0xff]   ;;  %v5889_v36 = vld [vmem:[#allocation12 + $0xa4] ss:$16 sps:$4 sm:$0xff]  }
  0xaf   :  { %2293 = vmatprep.subr.bf16.mxu0 %v5871_v24  ;;  %2457 = vmatprep.subr.bf16.mxu1 %v5873_v25  ;;  %v5891_v37 = vld [vmem:[#allocation12 + $0xac] ss:$16 sps:$4 sm:$0xff]   ;;  %v5893_v38 = vld [vmem:[#allocation12 + $0xa0] ss:$16 sps:$4 sm:$0xff]   ;;  %v5894_v39 = vld [vmem:[#allocation12 + $0xa8] ss:$16 sps:$4 sm:$0xff]  }
  0xb0   :  { %v5895_v40 = vld [vmem:[#allocation12 + $0xc4] ss:$16 sps:$4 sm:$0xff]   ;;  %v5897_v41 = vld [vmem:[#allocation12 + $0xcc] ss:$16 sps:$4 sm:$0xff]   ;;  %v5899_v42 = vld [vmem:[#allocation12 + $0xc0] ss:$16 sps:$4 sm:$0xff]  }
  0xb1   :  { %v5900_v43 = vld [vmem:[#allocation12 + $0xc8] ss:$16 sps:$4 sm:$0xff]   ;;  %v5901_v44 = vld [vmem:[#allocation12 + $0xe4] ss:$16 sps:$4 sm:$0xff]   ;;  %v5903_v45 = vld [vmem:[#allocation12 + $0xec] ss:$16 sps:$4 sm:$0xff]  }
  0xb2   :  { %2294 = vmatpush1.bf16.msra.mxu0 %v5875_v26  ;;  %2458 = vmatpush1.bf16.msra.mxu1 %v5876_v27  ;;  %v5905_v46 = vld [vmem:[#allocation12 + $0xe0] ss:$16 sps:$4 sm:$0xff]   ;;  %v5906_v47 = vld [vmem:[#allocation12 + $0xe8] ss:$16 sps:$4 sm:$0xff]   ;;  %v5907_v48 = vld [vmem:[#allocation12 + $0x104] ss:$16 sps:$4 sm:$0xff]  }
  0xb3   :  { %2295 = vmatprep.subr.bf16.mxu0 %v5877_v28  ;;  %2459 = vmatprep.subr.bf16.mxu1 %v5879_v29  ;;  %v5909_v49 = vld [vmem:[#allocation12 + $0x10c] ss:$16 sps:$4 sm:$0xff]   ;;  %v5911_v50 = vld [vmem:[#allocation12 + $0x100] ss:$16 sps:$4 sm:$0xff]   ;;  %v5912_v51 = vld [vmem:[#allocation12 + $0x108] ss:$16 sps:$4 sm:$0xff]  }
  0xb4   :  { %v5913_v52 = vld [vmem:[#allocation12 + $0x124] ss:$16 sps:$4 sm:$0xff]   ;;  %v5915_v53 = vld [vmem:[#allocation12 + $0x12c] ss:$16 sps:$4 sm:$0xff]   ;;  %v5917_v54 = vld [vmem:[#allocation12 + $0x120] ss:$16 sps:$4 sm:$0xff]  }
  0xb5   :  { %v5918_v55 = vld [vmem:[#allocation12 + $0x128] ss:$16 sps:$4 sm:$0xff]   ;;  %v5919_v56 = vld [vmem:[#allocation12 + $0x144] ss:$16 sps:$4 sm:$0xff]   ;;  %v5921_v57 = vld [vmem:[#allocation12 + $0x14c] ss:$16 sps:$4 sm:$0xff]  }
  0xb6   :  { %2296 = vmatpush1.bf16.msra.mxu0 %v5881_v30  ;;  %2460 = vmatpush1.bf16.msra.mxu1 %v5882_v31  ;;  %v5923_v58 = vld [vmem:[#allocation12 + $0x140] ss:$16 sps:$4 sm:$0xff]   ;;  %v5924_v59 = vld [vmem:[#allocation12 + $0x148] ss:$16 sps:$4 sm:$0xff]   ;;  %v5925_v60 = vld [vmem:[#allocation12 + $0x164] ss:$16 sps:$4 sm:$0xff]  }
  0xb7   :  { %2297 = vmatprep.subr.bf16.mxu0 %v5883_v32  ;;  %2461 = vmatprep.subr.bf16.mxu1 %v5885_v33  ;;  %v5927_v61 = vld [vmem:[#allocation12 + $0x16c] ss:$16 sps:$4 sm:$0xff]   ;;  %v908_v62 = vld [vmem:[%s7577_s0 + $0x8] sm:$0xff]  ;;  %v5929_v63 = vld [vmem:[#allocation12 + $0x160] ss:$16 sps:$4 sm:$0xff]   ;;  %s6515_s22 = smov 10  }
  0xb8   :  { %v1142_v2 = vpack.c.bf16 %v908_v62, %v908_v62  ;;  %v5930_v3 = vld [vmem:[#allocation12 + $0x168] ss:$16 sps:$4 sm:$0xff]   ;;  %v5931_v4 = vld [vmem:[#allocation12 + $0x184] ss:$16 sps:$4 sm:$0xff]   ;;  %v5933_v5 = vld [vmem:[#allocation12 + $0x18c] ss:$16 sps:$4 sm:$0xff]  }
  0xb9   :  { %v5935_v6 = vld [vmem:[#allocation12 + $0x180] ss:$16 sps:$4 sm:$0xff]   ;;  %v5936_v7 = vld [vmem:[#allocation12 + $0x188] ss:$16 sps:$4 sm:$0xff]   ;;  %v5937_v8 = vld [vmem:[#allocation12 + $0x1a4] ss:$16 sps:$4 sm:$0xff]  }
  0xba   :  { %2298 = vmatpush1.bf16.msra.mxu0 %v5887_v34  ;;  %2462 = vmatpush1.bf16.msra.mxu1 %v5888_v35  ;;  %v5939_v9 = vld [vmem:[#allocation12 + $0x1ac] ss:$16 sps:$4 sm:$0xff]   ;;  %v5941_v10 = vld [vmem:[#allocation12 + $0x1a0] ss:$16 sps:$4 sm:$0xff]   ;;  %v5942_v11 = vld [vmem:[#allocation12 + $0x1a8] ss:$16 sps:$4 sm:$0xff]  }
  0xbb   :  { %2299 = vmatprep.subr.bf16.mxu0 %v5889_v36  ;;  %2463 = vmatprep.subr.bf16.mxu1 %v5891_v37  ;;  %v5943_v12 = vld [vmem:[#allocation12 + $0x1c4] ss:$16 sps:$4 sm:$0xff]   ;;  %v5945_v13 = vld [vmem:[#allocation12 + $0x1cc] ss:$16 sps:$4 sm:$0xff]   ;;  %v5947_v14 = vld [vmem:[#allocation12 + $0x1c0] ss:$16 sps:$4 sm:$0xff]  }
  0xbc   :  { %2321 = vmatprep.mubr.bf16.mxu0 %v1142_v2  ;;  %2485 = vmatprep.mubr.bf16.mxu1 %v1142_v2  ;;  %v5948_v15 = vld [vmem:[#allocation12 + $0x1c8] ss:$16 sps:$4 sm:$0xff]   ;;  %v5949_v16 = vld [vmem:[#allocation12 + $0x1e4] ss:$16 sps:$4 sm:$0xff]   ;;  %v5951_v17 = vld [vmem:[#allocation12 + $0x1ec] ss:$16 sps:$4 sm:$0xff]  }
  0xbd   :  { %v5953_v18 = vld [vmem:[#allocation12 + $0x1e0] ss:$16 sps:$4 sm:$0xff]   ;;  %v5954_v19 = vld [vmem:[#allocation12 + $0x1e8] ss:$16 sps:$4 sm:$0xff]   ;;  %v5957_v21 = vld [vmem:[#allocation12 + $0x204] ss:$16 sps:$4 sm:$0xff]  }
  0xbe   :  { %2300 = vmatpush1.bf16.msra.mxu0 %v5893_v38  ;;  %2464 = vmatpush1.bf16.msra.mxu1 %v5894_v39  ;;  %v907_v20 = vld [vmem:[%s7577_s0] sm:$0xff]  ;;  %v5958_v25 = vld [vmem:[#allocation12 + $0x208] ss:$16 sps:$4 sm:$0xff]   ;;  %v5963_v26 = vld [vmem:[#allocation12 + $0x224] ss:$16 sps:$4 sm:$0xff]  }
  0xbf   :  { %2301 = vmatprep.subr.bf16.mxu0 %v5895_v40  ;;  %2465 = vmatprep.subr.bf16.mxu1 %v5897_v41  ;;  %v5960_v22 = vld [vmem:[#allocation12 + $0x20c] ss:$16 sps:$4 sm:$0xff]   ;;  %v1141_v23 = vpack.c.bf16 %v907_v20, %v907_v20  ;;  %v5955_v24 = vld [vmem:[#allocation12 + $0x200] ss:$16 sps:$4 sm:$0xff]   ;;  %v5964_v29 = vld [vmem:[#allocation12 + $0x228] ss:$16 sps:$4 sm:$0xff]  }
  0xc0   :  { %v5966_v27 = vld [vmem:[#allocation12 + $0x22c] ss:$16 sps:$4 sm:$0xff]   ;;  %v5961_v28 = vld [vmem:[#allocation12 + $0x220] ss:$16 sps:$4 sm:$0xff]   ;;  %v5969_v30 = vld [vmem:[#allocation12 + $0x244] ss:$16 sps:$4 sm:$0xff]  }
  0xc1   :  { %v5972_v31 = vld [vmem:[#allocation12 + $0x24c] ss:$16 sps:$4 sm:$0xff]   ;;  %v5967_v32 = vld [vmem:[#allocation12 + $0x240] ss:$16 sps:$4 sm:$0xff]   ;;  %v5970_v33 = vld [vmem:[#allocation12 + $0x248] ss:$16 sps:$4 sm:$0xff]  }
  0xc2   :  { %2302 = vmatpush1.bf16.msra.mxu0 %v5899_v42  ;;  %2466 = vmatpush1.bf16.msra.mxu1 %v5900_v43  ;;  %v5975_v34 = vld [vmem:[#allocation12 + $0x264] ss:$16 sps:$4 sm:$0xff]   ;;  %v5978_v35 = vld [vmem:[#allocation12 + $0x26c] ss:$16 sps:$4 sm:$0xff]   ;;  %v5973_v36 = vld [vmem:[#allocation12 + $0x260] ss:$16 sps:$4 sm:$0xff]  }
  0xc3   :  { %2303 = vmatprep.subr.bf16.mxu0 %v5901_v44  ;;  %2467 = vmatprep.subr.bf16.mxu1 %v5903_v45  ;;  %v5976_v37 = vld [vmem:[#allocation12 + $0x268] ss:$16 sps:$4 sm:$0xff]   ;;  %v5981_v38 = vld [vmem:[#allocation12 + $0x284] ss:$16 sps:$4 sm:$0xff]   ;;  %v5984_v39 = vld [vmem:[#allocation12 + $0x28c] ss:$16 sps:$4 sm:$0xff]  }
  0xc4   :  { %v5979_v40 = vld [vmem:[#allocation12 + $0x280] ss:$16 sps:$4 sm:$0xff]   ;;  %v5982_v41 = vld [vmem:[#allocation12 + $0x288] ss:$16 sps:$4 sm:$0xff]   ;;  %v5987_v42 = vld [vmem:[#allocation12 + $0x2a4] ss:$16 sps:$4 sm:$0xff]  }
  0xc5   :  { %v5990_v43 = vld [vmem:[#allocation12 + $0x2ac] ss:$16 sps:$4 sm:$0xff]   ;;  %v5985_v44 = vld [vmem:[#allocation12 + $0x2a0] ss:$16 sps:$4 sm:$0xff]   ;;  %v5988_v45 = vld [vmem:[#allocation12 + $0x2a8] ss:$16 sps:$4 sm:$0xff]  }
  0xc6   :  { %2304 = vmatpush1.bf16.msra.mxu0 %v5905_v46  ;;  %2468 = vmatpush1.bf16.msra.mxu1 %v5906_v47  ;;  %v5993_v46 = vld [vmem:[#allocation12 + $0x2c4] ss:$16 sps:$4 sm:$0xff]   ;;  %v5996_v47 = vld [vmem:[#allocation12 + $0x2cc] ss:$16 sps:$4 sm:$0xff]   ;;  %v6009_v62 = vld [vmem:[#allocation12 + $0x320] ss:$16 sps:$4 sm:$0xff]  }
  0xc7   :  { %2305 = vmatprep.subr.bf16.mxu0 %v5907_v48  ;;  %2469 = vmatprep.subr.bf16.mxu1 %v5909_v49  ;;  %v910_v48 = vld [vmem:[%s7577_s0 + $0x18] sm:$0xff]  ;;  %v5991_v49 = vld [vmem:[#allocation12 + $0x2c0] ss:$16 sps:$4 sm:$0xff]  }
  0xc8   :  { %v6017_v2 = vld [vmem:[#allocation12 + $0x344] ss:$16 sps:$4 sm:$0xff]   ;;  %v6039_v20 = vld [vmem:[#allocation12 + $0x3c0] ss:$16 sps:$4 sm:$0xff]  }
  0xca   :  { %2306 = vmatpush1.bf16.msra.mxu0 %v5911_v50  ;;  %2470 = vmatpush1.bf16.msra.mxu1 %v5912_v51  ;;  %v1144_v50 = vpack.c.bf16 %v910_v48, %v910_v48  ;;  %v5994_v51 = vld [vmem:[#allocation12 + $0x2c8] ss:$16 sps:$4 sm:$0xff]   ;;  %v6075_v48 = vld [vmem:[#allocation12 + $0x480] ss:$16 sps:$4 sm:$0xff]  }
  0xcb   :  { %2307 = vmatprep.subr.bf16.mxu0 %v5913_v52  ;;  %2471 = vmatprep.subr.bf16.mxu1 %v5915_v53  ;;  %v5999_v52 = vld [vmem:[#allocation12 + $0x2e4] ss:$16 sps:$4 sm:$0xff]   ;;  %v6002_v53 = vld [vmem:[#allocation12 + $0x2ec] ss:$16 sps:$4 sm:$0xff]  }
  0xce   :  { %2308 = vmatpush1.bf16.msra.mxu0 %v5917_v54  ;;  %2472 = vmatpush1.bf16.msra.mxu1 %v5918_v55  ;;  %v5997_v54 = vld [vmem:[#allocation12 + $0x2e0] ss:$16 sps:$4 sm:$0xff]   ;;  %v6000_v55 = vld [vmem:[#allocation12 + $0x2e8] ss:$16 sps:$4 sm:$0xff]  }
  0xcf   :  { %2309 = vmatprep.subr.bf16.mxu0 %v5919_v56  ;;  %2473 = vmatprep.subr.bf16.mxu1 %v5921_v57  ;;  %v6005_v56 = vld [vmem:[#allocation12 + $0x304] ss:$16 sps:$4 sm:$0xff]   ;;  %v6008_v57 = vld [vmem:[#allocation12 + $0x30c] ss:$16 sps:$4 sm:$0xff]  }
  0xd2   :  { %2310 = vmatpush1.bf16.msra.mxu0 %v5923_v58  ;;  %2474 = vmatpush1.bf16.msra.mxu1 %v5924_v59  ;;  %v6003_v58 = vld [vmem:[#allocation12 + $0x300] ss:$16 sps:$4 sm:$0xff]   ;;  %v6006_v59 = vld [vmem:[#allocation12 + $0x308] ss:$16 sps:$4 sm:$0xff]  }
  0xd3   :  { %2311 = vmatprep.subr.bf16.mxu0 %v5925_v60  ;;  %2475 = vmatprep.subr.bf16.mxu1 %v5927_v61  ;;  %v6011_v60 = vld [vmem:[#allocation12 + $0x324] ss:$16 sps:$4 sm:$0xff]   ;;  %v6014_v61 = vld [vmem:[#allocation12 + $0x32c] ss:$16 sps:$4 sm:$0xff]  }
  0xd6   :  { %2312 = vmatpush1.bf16.msra.mxu0 %v5929_v63  ;;  %2476 = vmatpush1.bf16.msra.mxu1 %v5930_v3  ;;  %v6012_v63 = vld [vmem:[#allocation12 + $0x328] ss:$16 sps:$4 sm:$0xff]   ;;  %v6020_v3 = vld [vmem:[#allocation12 + $0x34c] ss:$16 sps:$4 sm:$0xff]  }
  0xd7   :  { %2313 = vmatprep.subr.bf16.mxu0 %v5931_v4  ;;  %2477 = vmatprep.subr.bf16.mxu1 %v5933_v5  ;;  %v6015_v4 = vld [vmem:[#allocation12 + $0x340] ss:$16 sps:$4 sm:$0xff]   ;;  %v6018_v5 = vld [vmem:[#allocation12 + $0x348] ss:$16 sps:$4 sm:$0xff]  }
  0xda   :  { %2314 = vmatpush1.bf16.msra.mxu0 %v5935_v6  ;;  %2478 = vmatpush1.bf16.msra.mxu1 %v5936_v7  ;;  %v6023_v6 = vld [vmem:[#allocation12 + $0x364] ss:$16 sps:$4 sm:$0xff]   ;;  %v6026_v7 = vld [vmem:[#allocation12 + $0x36c] ss:$16 sps:$4 sm:$0xff]  }
  0xdb   :  { %2315 = vmatprep.subr.bf16.mxu0 %v5937_v8  ;;  %2479 = vmatprep.subr.bf16.mxu1 %v5939_v9  ;;  %v6021_v8 = vld [vmem:[#allocation12 + $0x360] ss:$16 sps:$4 sm:$0xff]   ;;  %v6024_v9 = vld [vmem:[#allocation12 + $0x368] ss:$16 sps:$4 sm:$0xff]  }
  0xde   :  { %2316 = vmatpush1.bf16.msra.mxu0 %v5941_v10  ;;  %2480 = vmatpush1.bf16.msra.mxu1 %v5942_v11  ;;  %v6029_v10 = vld [vmem:[#allocation12 + $0x384] ss:$16 sps:$4 sm:$0xff]   ;;  %v6032_v11 = vld [vmem:[#allocation12 + $0x38c] ss:$16 sps:$4 sm:$0xff]  }
  0xdf   :  { %2317 = vmatprep.subr.bf16.mxu0 %v5943_v12  ;;  %2481 = vmatprep.subr.bf16.mxu1 %v5945_v13  ;;  %v6027_v12 = vld [vmem:[#allocation12 + $0x380] ss:$16 sps:$4 sm:$0xff]   ;;  %v6030_v13 = vld [vmem:[#allocation12 + $0x388] ss:$16 sps:$4 sm:$0xff]  }
  0xe2   :  { %2318 = vmatpush1.bf16.msra.mxu0 %v5947_v14  ;;  %2482 = vmatpush1.bf16.msra.mxu1 %v5948_v15  ;;  %v6035_v14 = vld [vmem:[#allocation12 + $0x3a4] ss:$16 sps:$4 sm:$0xff]   ;;  %v6038_v15 = vld [vmem:[#allocation12 + $0x3ac] ss:$16 sps:$4 sm:$0xff]  }
  0xe3   :  { %2319 = vmatprep.subr.bf16.mxu0 %v5949_v16  ;;  %2483 = vmatprep.subr.bf16.mxu1 %v5951_v17  ;;  %v6033_v16 = vld [vmem:[#allocation12 + $0x3a0] ss:$16 sps:$4 sm:$0xff]   ;;  %v6036_v17 = vld [vmem:[#allocation12 + $0x3a8] ss:$16 sps:$4 sm:$0xff]  }
  0xe6   :  { %2320 = vmatpush1.bf16.msra.mxu0 %v5953_v18  ;;  %2484 = vmatpush1.bf16.msra.mxu1 %v5954_v19  ;;  %v6041_v18 = vld [vmem:[#allocation12 + $0x3c4] ss:$16 sps:$4 sm:$0xff]   ;;  %v6044_v19 = vld [vmem:[#allocation12 + $0x3cc] ss:$16 sps:$4 sm:$0xff]  }
  0xe7   :  { %2330 = vmatprep.subr.bf16.mxu0 %v5957_v21  ;;  %2494 = vmatprep.subr.bf16.mxu1 %v5960_v22  ;;  %v6042_v21 = vld [vmem:[#allocation12 + $0x3c8] ss:$16 sps:$4 sm:$0xff]   ;;  %v6047_v22 = vld [vmem:[#allocation12 + $0x3e4] ss:$16 sps:$4 sm:$0xff]  }
  0xe9   :  { %2322 = vmatmul.mubr.bf16.vlgmr.msra.gmra.mrb[0].mxu0 %v1141_v23  ;;  %2486 = vmatmul.mubr.bf16.vlgmr.msra.gmra.mrb[0].mxu1 %v1141_v23  ;;  %v6050_v23 = vld [vmem:[#allocation12 + $0x3ec] ss:$16 sps:$4 sm:$0xff]  }
  0xea   :  { %2331 = vmatpush1.bf16.msra.mxu0 %v5955_v24  ;;  %2495 = vmatpush1.bf16.msra.mxu1 %v5958_v25  ;;  %v6045_v24 = vld [vmem:[#allocation12 + $0x3e0] ss:$16 sps:$4 sm:$0xff]   ;;  %v6048_v25 = vld [vmem:[#allocation12 + $0x3e8] ss:$16 sps:$4 sm:$0xff]  }
  0xeb   :  { %2332 = vmatprep.subr.bf16.mxu0 %v5963_v26  ;;  %2496 = vmatprep.subr.bf16.mxu1 %v5966_v27  ;;  %v6053_v26 = vld [vmem:[#allocation12 + $0x404] ss:$16 sps:$4 sm:$0xff]   ;;  %v909_v27 = vld [vmem:[%s7577_s0 + $0x10] sm:$0xff] }
  0xec   :  { %2362 = vmatprep.mubr.bf16.mxu0 %v1144_v50  ;;  %2526 = vmatprep.mubr.bf16.mxu1 %v1144_v50  ;;  %v6083_v50 = vld [vmem:[#allocation12 + $0x4a4] ss:$16 sps:$4 sm:$0xff]  }
  0xee   :  { %2333 = vmatpush1.bf16.msra.mxu0 %v5961_v28  ;;  %2497 = vmatpush1.bf16.msra.mxu1 %v5964_v29  ;;  %v6056_v28 = vld [vmem:[#allocation12 + $0x40c] ss:$16 sps:$4 sm:$0xff]   ;;  %v6051_v29 = vld [vmem:[#allocation12 + $0x400] ss:$16 sps:$4 sm:$0xff]  }
  0xef   :  { %2334 = vmatprep.subr.bf16.mxu0 %v5969_v30  ;;  %2498 = vmatprep.subr.bf16.mxu1 %v5972_v31  ;;  %v6054_v30 = vld [vmem:[#allocation12 + $0x408] ss:$16 sps:$4 sm:$0xff]   ;;  %v1143_v31 = vpack.c.bf16 %v909_v27, %v909_v27 }
  0xf0   :  { %v6138_v27 = vld [vmem:[#allocation12 + $0x5c8] ss:$16 sps:$4 sm:$0xff]  }
  0xf2   :  { %2335 = vmatpush1.bf16.msra.mxu0 %v5967_v32  ;;  %2499 = vmatpush1.bf16.msra.mxu1 %v5970_v33  ;;  %v6059_v32 = vld [vmem:[#allocation12 + $0x424] ss:$16 sps:$4 sm:$0xff]   ;;  %v6062_v33 = vld [vmem:[#allocation12 + $0x42c] ss:$16 sps:$4 sm:$0xff]  }
  0xf3   :  { %2336 = vmatprep.subr.bf16.mxu0 %v5975_v34  ;;  %2500 = vmatprep.subr.bf16.mxu1 %v5978_v35  ;;  %v912_v34 = vld [vmem:[%s7577_s0 + $0x28] sm:$0xff] }
  0xf4   :  { %v1146_v35 = vpack.c.bf16 %v912_v34, %v912_v34 }
  0xf6   :  { %2337 = vmatpush1.bf16.msra.mxu0 %v5973_v36  ;;  %2501 = vmatpush1.bf16.msra.mxu1 %v5976_v37  ;;  %v6057_v36 = vld [vmem:[#allocation12 + $0x420] ss:$16 sps:$4 sm:$0xff]   ;;  %v6060_v37 = vld [vmem:[#allocation12 + $0x428] ss:$16 sps:$4 sm:$0xff]  }
  0xf7   :  { %2338 = vmatprep.subr.bf16.mxu0 %v5981_v38  ;;  %2502 = vmatprep.subr.bf16.mxu1 %v5984_v39  ;;  %v6065_v38 = vld [vmem:[#allocation12 + $0x444] ss:$16 sps:$4 sm:$0xff]   ;;  %v6068_v39 = vld [vmem:[#allocation12 + $0x44c] ss:$16 sps:$4 sm:$0xff]  }
  0xfa   :  { %2339 = vmatpush1.bf16.msra.mxu0 %v5979_v40  ;;  %2503 = vmatpush1.bf16.msra.mxu1 %v5982_v41  ;;  %v6063_v40 = vld [vmem:[#allocation12 + $0x440] ss:$16 sps:$4 sm:$0xff]   ;;  %v6066_v41 = vld [vmem:[#allocation12 + $0x448] ss:$16 sps:$4 sm:$0xff]  }
  0xfb   :  { %2340 = vmatprep.subr.bf16.mxu0 %v5987_v42  ;;  %2504 = vmatprep.subr.bf16.mxu1 %v5990_v43  ;;  %v6071_v42 = vld [vmem:[#allocation12 + $0x464] ss:$16 sps:$4 sm:$0xff]   ;;  %v6074_v43 = vld [vmem:[#allocation12 + $0x46c] ss:$16 sps:$4 sm:$0xff]  }
  0xfe   :  { %2341 = vmatpush1.bf16.msra.mxu0 %v5985_v44  ;;  %2505 = vmatpush1.bf16.msra.mxu1 %v5988_v45  ;;  %v6069_v44 = vld [vmem:[#allocation12 + $0x460] ss:$16 sps:$4 sm:$0xff]   ;;  %v6072_v45 = vld [vmem:[#allocation12 + $0x468] ss:$16 sps:$4 sm:$0xff]  }
  0xff   :  { %2342 = vmatprep.subr.bf16.mxu0 %v5993_v46  ;;  %2506 = vmatprep.subr.bf16.mxu1 %v5996_v47  ;;  %v6077_v46 = vld [vmem:[#allocation12 + $0x484] ss:$16 sps:$4 sm:$0xff]   ;;  %v6080_v47 = vld [vmem:[#allocation12 + $0x48c] ss:$16 sps:$4 sm:$0xff]  }
 0x102   :  { %2343 = vmatpush1.bf16.msra.mxu0 %v5991_v49  ;;  %2507 = vmatpush1.bf16.msra.mxu1 %v5994_v51  ;;  %v6078_v49 = vld [vmem:[#allocation12 + $0x488] ss:$16 sps:$4 sm:$0xff]   ;;  %v6086_v51 = vld [vmem:[#allocation12 + $0x4ac] ss:$16 sps:$4 sm:$0xff]  }
 0x103   :  { %2344 = vmatprep.subr.bf16.mxu0 %v5999_v52  ;;  %2508 = vmatprep.subr.bf16.mxu1 %v6002_v53  ;;  %v6081_v52 = vld [vmem:[#allocation12 + $0x4a0] ss:$16 sps:$4 sm:$0xff]   ;;  %v6084_v53 = vld [vmem:[#allocation12 + $0x4a8] ss:$16 sps:$4 sm:$0xff]  }
 0x106   :  { %2345 = vmatpush1.bf16.msra.mxu0 %v5997_v54  ;;  %2509 = vmatpush1.bf16.msra.mxu1 %v6000_v55  ;;  %v6089_v54 = vld [vmem:[#allocation12 + $0x4c4] ss:$16 sps:$4 sm:$0xff]   ;;  %v6092_v55 = vld [vmem:[#allocation12 + $0x4cc] ss:$16 sps:$4 sm:$0xff]  }
 0x107   :  { %2346 = vmatprep.subr.bf16.mxu0 %v6005_v56  ;;  %2510 = vmatprep.subr.bf16.mxu1 %v6008_v57  ;;  %v6087_v56 = vld [vmem:[#allocation12 + $0x4c0] ss:$16 sps:$4 sm:$0xff]   ;;  %v6090_v57 = vld [vmem:[#allocation12 + $0x4c8] ss:$16 sps:$4 sm:$0xff]  }
 0x10a   :  { %2347 = vmatpush1.bf16.msra.mxu0 %v6003_v58  ;;  %2511 = vmatpush1.bf16.msra.mxu1 %v6006_v59  ;;  %v6095_v58 = vld [vmem:[#allocation12 + $0x4e4] ss:$16 sps:$4 sm:$0xff]   ;;  %v6098_v59 = vld [vmem:[#allocation12 + $0x4ec] ss:$16 sps:$4 sm:$0xff]  }
 0x10b   :  { %2348 = vmatprep.subr.bf16.mxu0 %v6011_v60  ;;  %2512 = vmatprep.subr.bf16.mxu1 %v6014_v61  ;;  %v6093_v60 = vld [vmem:[#allocation12 + $0x4e0] ss:$16 sps:$4 sm:$0xff]   ;;  %v6096_v61 = vld [vmem:[#allocation12 + $0x4e8] ss:$16 sps:$4 sm:$0xff]  }
 0x10e   :  { %2349 = vmatpush1.bf16.msra.mxu0 %v6009_v62  ;;  %2513 = vmatpush1.bf16.msra.mxu1 %v6012_v63  ;;  %v6101_v62 = vld [vmem:[#allocation12 + $0x504] ss:$16 sps:$4 sm:$0xff]   ;;  %v6104_v63 = vld [vmem:[#allocation12 + $0x50c] ss:$16 sps:$4 sm:$0xff]  }
 0x10f   :  { %2350 = vmatprep.subr.bf16.mxu0 %v6017_v2  ;;  %2514 = vmatprep.subr.bf16.mxu1 %v6020_v3  ;;  %v6099_v2 = vld [vmem:[#allocation12 + $0x500] ss:$16 sps:$4 sm:$0xff]   ;;  %v6102_v3 = vld [vmem:[#allocation12 + $0x508] ss:$16 sps:$4 sm:$0xff]  }
 0x112   :  { %2351 = vmatpush1.bf16.msra.mxu0 %v6015_v4  ;;  %2515 = vmatpush1.bf16.msra.mxu1 %v6018_v5  ;;  %v6107_v4 = vld [vmem:[#allocation12 + $0x524] ss:$16 sps:$4 sm:$0xff]   ;;  %v6110_v5 = vld [vmem:[#allocation12 + $0x52c] ss:$16 sps:$4 sm:$0xff]  }
 0x113   :  { %2352 = vmatprep.subr.bf16.mxu0 %v6023_v6  ;;  %2516 = vmatprep.subr.bf16.mxu1 %v6026_v7  ;;  %v6105_v6 = vld [vmem:[#allocation12 + $0x520] ss:$16 sps:$4 sm:$0xff]   ;;  %v6108_v7 = vld [vmem:[#allocation12 + $0x528] ss:$16 sps:$4 sm:$0xff]  }
 0x116   :  { %2353 = vmatpush1.bf16.msra.mxu0 %v6021_v8  ;;  %2517 = vmatpush1.bf16.msra.mxu1 %v6024_v9  ;;  %v6113_v8 = vld [vmem:[#allocation12 + $0x544] ss:$16 sps:$4 sm:$0xff]   ;;  %v6116_v9 = vld [vmem:[#allocation12 + $0x54c] ss:$16 sps:$4 sm:$0xff]  }
 0x117   :  { %2354 = vmatprep.subr.bf16.mxu0 %v6029_v10  ;;  %2518 = vmatprep.subr.bf16.mxu1 %v6032_v11  ;;  %v6111_v10 = vld [vmem:[#allocation12 + $0x540] ss:$16 sps:$4 sm:$0xff]   ;;  %v6114_v11 = vld [vmem:[#allocation12 + $0x548] ss:$16 sps:$4 sm:$0xff]  }
 0x11a   :  { %2355 = vmatpush1.bf16.msra.mxu0 %v6027_v12  ;;  %2519 = vmatpush1.bf16.msra.mxu1 %v6030_v13  ;;  %v6119_v12 = vld [vmem:[#allocation12 + $0x564] ss:$16 sps:$4 sm:$0xff]   ;;  %v6122_v13 = vld [vmem:[#allocation12 + $0x56c] ss:$16 sps:$4 sm:$0xff]  }
 0x11b   :  { %2356 = vmatprep.subr.bf16.mxu0 %v6035_v14  ;;  %2520 = vmatprep.subr.bf16.mxu1 %v6038_v15  ;;  %v6117_v14 = vld [vmem:[#allocation12 + $0x560] ss:$16 sps:$4 sm:$0xff]   ;;  %v6120_v15 = vld [vmem:[#allocation12 + $0x568] ss:$16 sps:$4 sm:$0xff]  }
 0x11e   :  { %2357 = vmatpush1.bf16.msra.mxu0 %v6033_v16  ;;  %2521 = vmatpush1.bf16.msra.mxu1 %v6036_v17  ;;  %v6125_v16 = vld [vmem:[#allocation12 + $0x584] ss:$16 sps:$4 sm:$0xff]   ;;  %v6128_v17 = vld [vmem:[#allocation12 + $0x58c] ss:$16 sps:$4 sm:$0xff]  }
 0x11f   :  { %2358 = vmatprep.subr.bf16.mxu0 %v6041_v18  ;;  %2522 = vmatprep.subr.bf16.mxu1 %v6044_v19  ;;  %v6123_v18 = vld [vmem:[#allocation12 + $0x580] ss:$16 sps:$4 sm:$0xff]   ;;  %v6126_v19 = vld [vmem:[#allocation12 + $0x588] ss:$16 sps:$4 sm:$0xff]  }
 0x122   :  { %2359 = vmatpush1.bf16.msra.mxu0 %v6039_v20  ;;  %2523 = vmatpush1.bf16.msra.mxu1 %v6042_v21  ;;  %v6131_v20 = vld [vmem:[#allocation12 + $0x5a4] ss:$16 sps:$4 sm:$0xff]   ;;  %v6134_v21 = vld [vmem:[#allocation12 + $0x5ac] ss:$16 sps:$4 sm:$0xff]  }
 0x123   :  { %2360 = vmatprep.subr.bf16.mxu0 %v6047_v22  ;;  %2524 = vmatprep.subr.bf16.mxu1 %v6050_v23  ;;  %v6129_v22 = vld [vmem:[#allocation12 + $0x5a0] ss:$16 sps:$4 sm:$0xff]   ;;  %v6132_v23 = vld [vmem:[#allocation12 + $0x5a8] ss:$16 sps:$4 sm:$0xff]  }
 0x126   :  { %2361 = vmatpush1.bf16.msra.mxu0 %v6045_v24  ;;  %2525 = vmatpush1.bf16.msra.mxu1 %v6048_v25  ;;  %v6137_v24 = vld [vmem:[#allocation12 + $0x5c4] ss:$16 sps:$4 sm:$0xff]   ;;  %v6140_v25 = vld [vmem:[#allocation12 + $0x5cc] ss:$16 sps:$4 sm:$0xff]  }
 0x127   :  { %2371 = vmatprep.subr.bf16.mxu0 %v6053_v26  ;;  %2535 = vmatprep.subr.bf16.mxu1 %v6056_v28  ;;  %v6135_v26 = vld [vmem:[#allocation12 + $0x5c0] ss:$16 sps:$4 sm:$0xff]   ;;  %v6143_v28 = vld [vmem:[#allocation12 + $0x5e4] ss:$16 sps:$4 sm:$0xff]  }
 0x129   :  { %2363 = vmatmul.mubr.bf16.vlgmr.msra.gmra.mrb[0].mxu0 %v1143_v31  ;;  %2527 = vmatmul.mubr.bf16.vlgmr.msra.gmra.mrb[0].mxu1 %v1143_v31  ;;  %v6144_v31 = vld [vmem:[#allocation12 + $0x5e8] ss:$16 sps:$4 sm:$0xff]  }
 0x12a   :  { %2372 = vmatpush1.bf16.msra.mxu0 %v6051_v29  ;;  %2536 = vmatpush1.bf16.msra.mxu1 %v6054_v30  ;;  %v6146_v29 = vld [vmem:[#allocation12 + $0x5ec] ss:$16 sps:$4 sm:$0xff]   ;;  %v6141_v30 = vld [vmem:[#allocation12 + $0x5e0] ss:$16 sps:$4 sm:$0xff]  }
 0x12b   :  { %2373 = vmatprep.subr.bf16.mxu0 %v6059_v32  ;;  %2537 = vmatprep.subr.bf16.mxu1 %v6062_v33  ;;  %v911_v32 = vld [vmem:[%s7577_s0 + $0x20] sm:$0xff]  ;;  %v6149_v33 = vld [vmem:[#allocation12 + $0x604] ss:$16 sps:$4 sm:$0xff]  }
 0x12c   :  { %2567 = vmatprep.mubr.bf16.mxu1 %v1146_v35  ;;  %2403 = vmatprep.mubr.bf16.mxu0 %v1146_v35  ;;  %v1145_v34 = vpack.c.bf16 %v911_v32, %v911_v32  ;;  %v6147_v35 = vld [vmem:[#allocation12 + $0x600] ss:$16 sps:$4 sm:$0xff]   ;;  %v6231_v32 = vld [vmem:[%s7581_s4 + $0xc0] ss:$8 sps:$4 sm:$0xff]  }
 0x12e   :  { %2374 = vmatpush1.bf16.msra.mxu0 %v6057_v36  ;;  %2538 = vmatpush1.bf16.msra.mxu1 %v6060_v37  ;;  %v6152_v36 = vld [vmem:[#allocation12 + $0x624] ss:$16 sps:$4 sm:$0xff]   ;;  %v6150_v37 = vld [vmem:[#allocation12 + $0x620] ss:$16 sps:$4 sm:$0xff]  }
 0x12f   :  { %2375 = vmatprep.subr.bf16.mxu0 %v6065_v38  ;;  %2539 = vmatprep.subr.bf16.mxu1 %v6068_v39  ;;  %v6510_v38 = vmov 0   ;;  %v6155_v39 = vld [vmem:[#allocation12 + $0x644] ss:$16 sps:$4 sm:$0xff]  }
 0x132   :  { %2376 = vmatpush1.bf16.msra.mxu0 %v6063_v40  ;;  %2540 = vmatpush1.bf16.msra.mxu1 %v6066_v41  ;;  %v6153_v40 = vld [vmem:[#allocation12 + $0x640] ss:$16 sps:$4 sm:$0xff]   ;;  %v6158_v41 = vld [vmem:[#allocation12 + $0x664] ss:$16 sps:$4 sm:$0xff]  }
 0x133   :  { %2377 = vmatprep.subr.bf16.mxu0 %v6071_v42  ;;  %2541 = vmatprep.subr.bf16.mxu1 %v6074_v43  ;;  %v6156_v42 = vld [vmem:[#allocation12 + $0x660] ss:$16 sps:$4 sm:$0xff]   ;;  %v6161_v43 = vld [vmem:[#allocation12 + $0x684] ss:$16 sps:$4 sm:$0xff]  }
 0x136   :  { %2378 = vmatpush1.bf16.msra.mxu0 %v6069_v44  ;;  %2542 = vmatpush1.bf16.msra.mxu1 %v6072_v45  ;;  %v6159_v44 = vld [vmem:[#allocation12 + $0x680] ss:$16 sps:$4 sm:$0xff]   ;;  %v6164_v45 = vld [vmem:[#allocation12 + $0x6a4] ss:$16 sps:$4 sm:$0xff]  }
 0x137   :  { %2379 = vmatprep.subr.bf16.mxu0 %v6077_v46  ;;  %2543 = vmatprep.subr.bf16.mxu1 %v6080_v47  ;;  %v6162_v46 = vld [vmem:[#allocation12 + $0x6a0] ss:$16 sps:$4 sm:$0xff]   ;;  %v6167_v47 = vld [vmem:[#allocation12 + $0x6c4] ss:$16 sps:$4 sm:$0xff]  }
 0x13a   :  { %2380 = vmatpush1.bf16.msra.mxu0 %v6075_v48  ;;  %2544 = vmatpush1.bf16.msra.mxu1 %v6078_v49  ;;  %v6165_v48 = vld [vmem:[#allocation12 + $0x6c0] ss:$16 sps:$4 sm:$0xff]   ;;  %v6170_v49 = vld [vmem:[#allocation12 + $0x6e4] ss:$16 sps:$4 sm:$0xff]  }
 0x13b   :  { %2381 = vmatprep.subr.bf16.mxu0 %v6083_v50  ;;  %2545 = vmatprep.subr.bf16.mxu1 %v6086_v51  ;;  %v6168_v50 = vld [vmem:[#allocation12 + $0x6e0] ss:$16 sps:$4 sm:$0xff]  }
 0x13c   :  { %v913_v51 = vld [vmem:[%s7577_s0 + $0x30] sm:$0xff] }
 0x13e   :  { %2382 = vmatpush1.bf16.msra.mxu0 %v6081_v52  ;;  %2546 = vmatpush1.bf16.msra.mxu1 %v6084_v53  ;;  %v6173_v52 = vld [vmem:[#allocation12 + $0x60c] ss:$16 sps:$4 sm:$0xff]   ;;  %v1147_v53 = vpack.c.bf16 %v913_v51, %v913_v51 }
 0x13f   :  { %2383 = vmatprep.subr.bf16.mxu0 %v6089_v54  ;;  %2547 = vmatprep.subr.bf16.mxu1 %v6092_v55  ;;  %v6171_v54 = vld [vmem:[#allocation12 + $0x608] ss:$16 sps:$4 sm:$0xff]   ;;  %v6176_v55 = vld [vmem:[#allocation12 + $0x62c] ss:$16 sps:$4 sm:$0xff]  }
 0x142   :  { %2384 = vmatpush1.bf16.msra.mxu0 %v6087_v56  ;;  %2548 = vmatpush1.bf16.msra.mxu1 %v6090_v57  ;;  %v6174_v56 = vld [vmem:[#allocation12 + $0x628] ss:$16 sps:$4 sm:$0xff]   ;;  %v6179_v57 = vld [vmem:[#allocation12 + $0x64c] ss:$16 sps:$4 sm:$0xff]  }
 0x143   :  { %2385 = vmatprep.subr.bf16.mxu0 %v6095_v58  ;;  %2549 = vmatprep.subr.bf16.mxu1 %v6098_v59  ;;  %v6177_v58 = vld [vmem:[#allocation12 + $0x648] ss:$16 sps:$4 sm:$0xff]   ;;  %v6182_v59 = vld [vmem:[#allocation12 + $0x66c] ss:$16 sps:$4 sm:$0xff]  }
 0x146   :  { %2386 = vmatpush1.bf16.msra.mxu0 %v6093_v60  ;;  %2550 = vmatpush1.bf16.msra.mxu1 %v6096_v61  ;;  %v6180_v60 = vld [vmem:[#allocation12 + $0x668] ss:$16 sps:$4 sm:$0xff]   ;;  %v6185_v61 = vld [vmem:[#allocation12 + $0x68c] ss:$16 sps:$4 sm:$0xff]  }
 0x147   :  { %2387 = vmatprep.subr.bf16.mxu0 %v6101_v62  ;;  %2551 = vmatprep.subr.bf16.mxu1 %v6104_v63  ;;  %v6183_v62 = vld [vmem:[#allocation12 + $0x688] ss:$16 sps:$4 sm:$0xff]   ;;  %v6188_v63 = vld [vmem:[#allocation12 + $0x6ac] ss:$16 sps:$4 sm:$0xff]  }
 0x14a   :  { %2388 = vmatpush1.bf16.msra.mxu0 %v6099_v2  ;;  %2552 = vmatpush1.bf16.msra.mxu1 %v6102_v3  ;;  %v6186_v2 = vld [vmem:[#allocation12 + $0x6a8] ss:$16 sps:$4 sm:$0xff]   ;;  %v6191_v3 = vld [vmem:[#allocation12 + $0x6cc] ss:$16 sps:$4 sm:$0xff]  }
 0x14b   :  { %2389 = vmatprep.subr.bf16.mxu0 %v6107_v4  ;;  %2553 = vmatprep.subr.bf16.mxu1 %v6110_v5  ;;  %v6189_v4 = vld [vmem:[#allocation12 + $0x6c8] ss:$16 sps:$4 sm:$0xff]   ;;  %v6194_v5 = vld [vmem:[#allocation12 + $0x6ec] ss:$16 sps:$4 sm:$0xff]  }
 0x14e   :  { %2390 = vmatpush1.bf16.msra.mxu0 %v6105_v6  ;;  %2554 = vmatpush1.bf16.msra.mxu1 %v6108_v7  ;;  %v6192_v6 = vld [vmem:[#allocation12 + $0x6e8] ss:$16 sps:$4 sm:$0xff]  }
 0x14f   :  { %2391 = vmatprep.subr.bf16.mxu0 %v6113_v8  ;;  %2555 = vmatprep.subr.bf16.mxu1 %v6116_v9  ;;  %v6197_v7 = vld [vmem:[%s7581_s4 + $0x4] ss:$8 sps:$4 sm:$0xff]   ;;  %v6195_v8 = vld [vmem:[%s7581_s4] ss:$8 sps:$4 sm:$0xff]   ;;  %v6200_v9 = vld [vmem:[%s7581_s4 + $0x14] ss:$8 sps:$4 sm:$0xff]  }
 0x152   :  { %2392 = vmatpush1.bf16.msra.mxu0 %v6111_v10  ;;  %2556 = vmatpush1.bf16.msra.mxu1 %v6114_v11  ;;  %v6198_v10 = vld [vmem:[%s7581_s4 + $0x10] ss:$8 sps:$4 sm:$0xff]   ;;  %v6203_v11 = vld [vmem:[%s7581_s4 + $0x24] ss:$8 sps:$4 sm:$0xff]  }
 0x153   :  { %2393 = vmatprep.subr.bf16.mxu0 %v6119_v12  ;;  %2557 = vmatprep.subr.bf16.mxu1 %v6122_v13  ;;  %v6201_v12 = vld [vmem:[%s7581_s4 + $0x20] ss:$8 sps:$4 sm:$0xff]   ;;  %v6206_v13 = vld [vmem:[%s7581_s4 + $0x34] ss:$8 sps:$4 sm:$0xff]  }
 0x156   :  { %2394 = vmatpush1.bf16.msra.mxu0 %v6117_v14  ;;  %2558 = vmatpush1.bf16.msra.mxu1 %v6120_v15  ;;  %v6204_v14 = vld [vmem:[%s7581_s4 + $0x30] ss:$8 sps:$4 sm:$0xff]   ;;  %v6209_v15 = vld [vmem:[%s7581_s4 + $0x44] ss:$8 sps:$4 sm:$0xff]  }
 0x157   :  { %2395 = vmatprep.subr.bf16.mxu0 %v6125_v16  ;;  %2559 = vmatprep.subr.bf16.mxu1 %v6128_v17  ;;  %v6207_v16 = vld [vmem:[%s7581_s4 + $0x40] ss:$8 sps:$4 sm:$0xff]   ;;  %v6212_v17 = vld [vmem:[%s7581_s4 + $0x54] ss:$8 sps:$4 sm:$0xff]  }
 0x15a   :  { %2396 = vmatpush1.bf16.msra.mxu0 %v6123_v18  ;;  %2560 = vmatpush1.bf16.msra.mxu1 %v6126_v19  ;;  %v6210_v18 = vld [vmem:[%s7581_s4 + $0x50] ss:$8 sps:$4 sm:$0xff]   ;;  %v6215_v19 = vld [vmem:[%s7581_s4 + $0x64] ss:$8 sps:$4 sm:$0xff]  }
 0x15b   :  { %2397 = vmatprep.subr.bf16.mxu0 %v6131_v20  ;;  %2561 = vmatprep.subr.bf16.mxu1 %v6134_v21  ;;  %v6213_v20 = vld [vmem:[%s7581_s4 + $0x60] ss:$8 sps:$4 sm:$0xff]   ;;  %v6218_v21 = vld [vmem:[%s7581_s4 + $0x74] ss:$8 sps:$4 sm:$0xff]  }
 0x15e   :  { %2398 = vmatpush1.bf16.msra.mxu0 %v6129_v22  ;;  %2562 = vmatpush1.bf16.msra.mxu1 %v6132_v23  ;;  %v6216_v22 = vld [vmem:[%s7581_s4 + $0x70] ss:$8 sps:$4 sm:$0xff]   ;;  %v6221_v23 = vld [vmem:[%s7581_s4 + $0x84] ss:$8 sps:$4 sm:$0xff]  }
 0x15f   :  { %2399 = vmatprep.subr.bf16.mxu0 %v6137_v24  ;;  %2563 = vmatprep.subr.bf16.mxu1 %v6140_v25  ;;  %v6219_v24 = vld [vmem:[%s7581_s4 + $0x80] ss:$8 sps:$4 sm:$0xff]   ;;  %v6224_v25 = vld [vmem:[%s7581_s4 + $0x94] ss:$8 sps:$4 sm:$0xff]  }
 0x162   :  { %2400 = vmatpush1.bf16.msra.mxu0 %v6135_v26  ;;  %2564 = vmatpush1.bf16.msra.mxu1 %v6138_v27  ;;  %v6222_v26 = vld [vmem:[%s7581_s4 + $0x90] ss:$8 sps:$4 sm:$0xff]   ;;  %v6227_v27 = vld [vmem:[%s7581_s4 + $0xa4] ss:$8 sps:$4 sm:$0xff]  }
 0x163   :  { %2401 = vmatprep.subr.bf16.mxu0 %v6143_v28  ;;  %2565 = vmatprep.subr.bf16.mxu1 %v6146_v29  ;;  %v6225_v28 = vld [vmem:[%s7581_s4 + $0xa0] ss:$8 sps:$4 sm:$0xff]   ;;  %v6230_v29 = vld [vmem:[%s7581_s4 + $0xb4] ss:$8 sps:$4 sm:$0xff]  }
 0x166   :  { %2402 = vmatpush1.bf16.msra.mxu0 %v6141_v30  ;;  %2566 = vmatpush1.bf16.msra.mxu1 %v6144_v31  ;;  %v6228_v30 = vld [vmem:[%s7581_s4 + $0xb0] ss:$8 sps:$4 sm:$0xff]   ;;  %v6233_v31 = vld [vmem:[%s7581_s4 + $0xc4] ss:$8 sps:$4 sm:$0xff]  }
 0x167   :  { %2412 = vmatprep.subr.bf16.mxu0 %v6149_v33  ;;  %v6236_v33 = vld [vmem:[%s7581_s4 + $0xd4] ss:$8 sps:$4 sm:$0xff]  }
 0x169   :  { %2568 = vmatmul.mubr.bf16.vlgmr.msra.gmra.mrb[0].mxu1 %v1145_v34  ;;  %2404 = vmatmul.mubr.bf16.vlgmr.msra.gmra.mrb[0].mxu0 %v1145_v34  ;;  %v6234_v34 = vld [vmem:[%s7581_s4 + $0xd0] ss:$8 sps:$4 sm:$0xff]  }
 0x16a   :  { %2413 = vmatpush1.bf16.msra.mxu0 %v6147_v35  ;;  %2444 = vmatprep.mubr.bf16.mxu0 %v6510_v38  ;;  %v6239_v35 = vld [vmem:[%s7581_s4 + $0xe4] ss:$8 sps:$4 sm:$0xff]  }
 0x16b   :  { %2414 = vmatprep.subr.bf16.mxu0 %v6152_v36  ;;  %v6237_v36 = vld [vmem:[%s7581_s4 + $0xe0] ss:$8 sps:$4 sm:$0xff]  }
 0x16e   :  { %2415 = vmatpush1.bf16.msra.mxu0 %v6150_v37  ;;  %v6242_v37 = vld [vmem:[%s7581_s4 + $0xf4] ss:$8 sps:$4 sm:$0xff]  }
 0x16f   :  { %2416 = vmatprep.subr.bf16.mxu0 %v6155_v39  ;;  %v6240_v39 = vld [vmem:[%s7581_s4 + $0xf0] ss:$8 sps:$4 sm:$0xff]  }
 0x172   :  { %2417 = vmatpush1.bf16.msra.mxu0 %v6153_v40 }
 0x173   :  { %2418 = vmatprep.subr.bf16.mxu0 %v6158_v41 }
 0x176   :  { %2419 = vmatpush1.bf16.msra.mxu0 %v6156_v42 }
 0x177   :  { %2420 = vmatprep.subr.bf16.mxu0 %v6161_v43 }
 0x17a   :  { %2421 = vmatpush1.bf16.msra.mxu0 %v6159_v44  ;;  %v6245_v44 = vld [vmem:[%s7581_s4 + $0x104] ss:$8 sps:$4 sm:$0xff]  }
 0x17b   :  { %2422 = vmatprep.subr.bf16.mxu0 %v6164_v45  ;;  %v1149_v45 = vlaneseq }
 0x17e   :  { %2423 = vmatpush1.bf16.msra.mxu0 %v6162_v46  ;;  %v7201_v46 = vshrl.u32 %v1149_v45, 7 }
 0x17f   :  { %2424 = vmatprep.subr.bf16.mxu0 %v6167_v47 }
 0x180   :  { %v7204_v47 = vsub.s32 0, %v7201_v46 }
 0x182   :  { %2425 = vmatpush1.bf16.msra.mxu0 %v6165_v48  ;;  %v7207_v48 = vsub.s32 1, %v7201_v46 }
 0x183   :  { %2426 = vmatprep.subr.bf16.mxu0 %v6170_v49  ;;  %v914_v49 = vld [vmem:[#allocation9] sm:$0xf] }
 0x184   :  { %v1156_v51 = vrot.slane %v914_v49, %v7207_v48 }
 0x186   :  { %2427 = vmatpush1.bf16.msra.mxu0 %v6168_v50  ;;  %v1152_v50 = vrot.slane %v914_v49, %v7204_v47 }
 0x187   :  { %2576 = vmatprep.subr.bf16.mxu0 %v6173_v52 }
 0x189   :  { %2445 = vmatmul.mubr.bf16.vlgmr.msra.gmra.mrb[0].mxu0 %v1147_v53 }
 0x18a   :  { %2577 = vmatpush1.bf16.msra.mxu0 %v6171_v54  ;;  %2608 = vmatprep.mubr.bf16.mxu0 %v6510_v38 }
 0x18b   :  { %2578 = vmatprep.subr.bf16.mxu0 %v6176_v55 }
 0x18e   :  { %2579 = vmatpush1.bf16.msra.mxu0 %v6174_v56 }
 0x18f   :  { %2580 = vmatprep.subr.bf16.mxu0 %v6179_v57 }
 0x192   :  { %2581 = vmatpush1.bf16.msra.mxu0 %v6177_v58 }
 0x193   :  { %2582 = vmatprep.subr.bf16.mxu0 %v6182_v59 }
 0x196   :  { %2583 = vmatpush1.bf16.msra.mxu0 %v6180_v60 }
 0x197   :  { %2584 = vmatprep.subr.bf16.mxu0 %v6185_v61 }
 0x19a   :  { %2585 = vmatpush1.bf16.msra.mxu0 %v6183_v62 }
 0x19b   :  { %2586 = vmatprep.subr.bf16.mxu0 %v6188_v63 }
 0x19e   :  { %2587 = vmatpush1.bf16.msra.mxu0 %v6186_v2 }
 0x19f   :  { %2588 = vmatprep.subr.bf16.mxu0 %v6191_v3 }
 0x1a2   :  { %2589 = vmatpush1.bf16.msra.mxu0 %v6189_v4 }
 0x1a3   :  { %2590 = vmatprep.subr.bf16.mxu0 %v6194_v5 }
 0x1a6   :  { %2591 = vmatpush1.bf16.msra.mxu0 %v6192_v6 }
 0x1a7   :  { %3176 = vmatprep.subr.bf16.mxu0 %v6197_v7 }
 0x1a9   :  { %2609 = vmatmul.mubr.bf16.vlgmr.msra.gmra.mrb[4].mxu0 %v1147_v53 }
 0x1aa   :  { %3177 = vmatpush1.bf16.msra.mxu0 %v6195_v8 }
 0x1ab   :  { %3178 = vmatprep.subr.bf16.mxu0 %v6200_v9 }
 0x1ae   :  { %3179 = vmatpush1.bf16.msra.mxu0 %v6198_v10 }
 0x1af   :  { %3180 = vmatprep.subr.bf16.mxu0 %v6203_v11 }
 0x1b2   :  { %3181 = vmatpush1.bf16.msra.mxu0 %v6201_v12 }
 0x1b3   :  { %3182 = vmatprep.subr.bf16.mxu0 %v6206_v13 }
 0x1b6   :  { %3183 = vmatpush1.bf16.msra.mxu0 %v6204_v14 }
 0x1b7   :  { %3184 = vmatprep.subr.bf16.mxu0 %v6209_v15 }
 0x1ba   :  { %3185 = vmatpush1.bf16.msra.mxu0 %v6207_v16  ;;  %v7220_v16 = vsub.s32 2, %v7201_v46 }
 0x1bb   :  { %3186 = vmatprep.subr.bf16.mxu0 %v6212_v17 }
 0x1be   :  { %3187 = vmatpush1.bf16.msra.mxu0 %v6210_v18  ;;  %v7223_v18 = vsub.s32 3, %v7201_v46 }
 0x1bf   :  { %3188 = vmatprep.subr.bf16.mxu0 %v6215_v19 }
 0x1c2   :  { %3189 = vmatpush1.bf16.msra.mxu0 %v6213_v20 }
 0x1c3   :  { %3190 = vmatprep.subr.bf16.mxu0 %v6218_v21 }
 0x1c6   :  { %3191 = vmatpush1.bf16.msra.mxu0 %v6216_v22  ;;  %v1160_v22 = vrot.slane %v914_v49, %v7220_v16 }
 0x1c7   :  { %3192 = vmatprep.subr.bf16.mxu0 %v6221_v23 }
 0x1ca   :  { %3193 = vmatpush1.bf16.msra.mxu0 %v6219_v24  ;;  %v1164_v24 = vrot.slane %v914_v49, %v7223_v18 }
 0x1cb   :  { %3194 = vmatprep.subr.bf16.mxu0 %v6224_v25 }
 0x1ce   :  { %3195 = vmatpush1.bf16.msra.mxu0 %v6222_v26 }
 0x1cf   :  { %3196 = vmatprep.subr.bf16.mxu0 %v6227_v27 }
 0x1d2   :  { %3197 = vmatpush1.bf16.msra.mxu0 %v6225_v28 }
 0x1d3   :  { %3198 = vmatprep.subr.bf16.mxu0 %v6230_v29 }
 0x1d6   :  { %3199 = vmatpush1.bf16.msra.mxu0 %v6228_v30 }
 0x1d7   :  { %3200 = vmatprep.subr.bf16.mxu0 %v6233_v31 }
 0x1da   :  { %3201 = vmatpush1.bf16.msra.mxu0 %v6231_v32 }
 0x1db   :  { %3202 = vmatprep.subr.bf16.mxu0 %v6236_v33 }
 0x1de   :  { %3203 = vmatpush1.bf16.msra.mxu0 %v6234_v34 }
 0x1df   :  { %3204 = vmatprep.subr.bf16.mxu0 %v6239_v35 }
 0x1e2   :  { %3205 = vmatpush1.bf16.msra.mxu0 %v6237_v36 }
 0x1e3   :  { %3206 = vmatprep.subr.bf16.mxu0 %v6242_v37 }
 0x1e6   :  { %3207 = vmatpush1.bf16.msra.mxu0 %v6240_v39 }
 0x1e7   :  { %3217 = vmatprep.subr.bf16.mxu0 %v6245_v44 }
 0x23c   :  { %v2569_v40 = vpop.f32.mrb[0].mxu1 }
 0x23d   :  { %v2571_v41 = vpop.f32.mrb[1].mxu1  ;;  %v5786_v28 = vadd.f32 %v2569_v40, %v1160_v22 }
 0x23e   :  { %v2573_v42 = vpop.f32.mrb[2].mxu1  ;;  %v5788_v30 = vadd.f32 %v2571_v41, %v1164_v24 }
 0x23f   :  { %v2574_v43 = vpop.f32.mrb[3].mxu1 }
 0x25c   :  { %v2446_v52 = vpop.f32.mrb[0].mxu0 }
 0x25d   :  { %v5784_v53 = vadd.f32 %v2446_v52, %v1152_v50  ;;  %v2448_v54 = vpop.f32.mrb[1].mxu0 }
 0x25e   :  { %v5785_v55 = vadd.f32 %v2448_v54, %v1156_v51  ;;  %v2450_v56 = vpop.f32.mrb[2].mxu0 }
 0x25f   :  { %v2617_v57 = vmax.f32 %v5784_v53, 0.0  ;;  %v2451_v58 = vpop.f32.mrb[3].mxu0 }
 0x260   :  { %v2618_v59 = vmax.f32 %v5785_v55, 0.0 }
 0x261   :  { %v2621_v60 = vrot.slane %v2617_v57, 4 }
 0x262   :  { %v2627_v61 = vrot.slane %v2618_v59, 4 }
 0x263   :  { %v2622_v62 = vadd.f32 %v2621_v60, %v2617_v57 }
 0x264   :  { %v2628_v63 = vadd.f32 %v2627_v61, %v2618_v59 }
 0x265   :  { %v2623_v2 = vrot.slane %v2622_v62, 2 }
 0x266   :  { %v2629_v3 = vrot.slane %v2628_v63, 2 }
 0x267   :  { %v2624_v4 = vadd.f32 %v2623_v2, %v2622_v62 }
 0x268   :  { %v2630_v5 = vadd.f32 %v2629_v3, %v2628_v63 }
 0x269   :  { %v2625_v6 = vrot.slane %v2624_v4, 1 }
 0x26a   :  { %v2631_v7 = vrot.slane %v2630_v5, 1 }
 0x26b   :  { %v2626_v8 = vadd.f32 %v2625_v6, %v2624_v4 }
 0x26c   :  { %v2632_v9 = vadd.f32 %v2631_v7, %v2630_v5 }
 0x26d   :  { %v2646_v10 = vmul.f32 0.125, %v2626_v8 }
 0x26e   :  { %v2647_v11 = vmul.f32 0.125, %v2632_v9 }
 0x26f   :  { %v7211_v12 = vsub.f32 %v2617_v57, %v2646_v10 }
 0x270   :  { %v7213_v13 = vsub.f32 %v2618_v59, %v2647_v11 }
 0x271   :  { %v2654_v14 = vmul.f32 %v7211_v12, %v7211_v12 }
 0x272   :  { %v2655_v15 = vmul.f32 %v7213_v13, %v7213_v13 }
 0x273   :  { %v2658_v17 = vrot.slane %v2654_v14, 4 }
 0x274   :  { %v2664_v19 = vrot.slane %v2655_v15, 4 }
 0x275   :  { %v2659_v20 = vadd.f32 %v2658_v17, %v2654_v14 }
 0x276   :  { %v2665_v21 = vadd.f32 %v2664_v19, %v2655_v15 }
 0x277   :  { %v2660_v23 = vrot.slane %v2659_v20, 2 }
 0x278   :  { %v2666_v25 = vrot.slane %v2665_v21, 2 }
 0x279   :  { %v2661_v26 = vadd.f32 %v2660_v23, %v2659_v20 }
 0x27a   :  { %v2667_v27 = vadd.f32 %v2666_v25, %v2665_v21 }
 0x27b   :  { %v2662_v29 = vrot.slane %v2661_v26, 1 }
 0x27c   :  { %v2668_v31 = vrot.slane %v2667_v27, 1  ;;  %v2610_v32 = vpop.f32.mrb[4].mxu0 }
 0x27d   :  { %v2663_v33 = vadd.f32 %v2662_v29, %v2661_v26  ;;  %v5787_v34 = vadd.f32 %v5786_v28, %v2610_v32  ;;  %v2612_v35 = vpop.f32.mrb[5].mxu0  ;;  %v6511_v29 = vmov 1966171168  }
 0x27e   :  { %v2669_v36 = vadd.f32 %v2668_v31, %v2667_v27  ;;  %v5789_v37 = vadd.f32 %v5788_v30, %v2612_v35  ;;  %v2614_v39 = vpop.f32.mrb[6].mxu0  ;;  %v2701_v30 = vunpack.c.l.s4 %v6511_v29  ;;  %v6281_v29 = vld [vmem:[%s7581_s4 + $0x1c4] ss:$8 sps:$4 sm:$0xff]  }
 0x27f   :  { %v2682_v42 = vmul.f32 0.125, %v2663_v33  ;;  %v2619_v43 = vmax.f32 %v5787_v34, 0.0  ;;  %v2615_v44 = vpop.f32.mrb[7].mxu0 }
 0x280   :  { %v2683_v45 = vmul.f32 0.125, %v2669_v36  ;;  %v2620_v50 = vmax.f32 %v5789_v37, 0.0  ;;  %v2702_v31 = vunpack.c.0.s8 %v2701_v30  ;;  %v6279_v30 = vld [vmem:[%s7581_s4 + $0x1c0] ss:$8 sps:$4 sm:$0xff]  }
 0x281   :  { %v2686_v49 = vadd.f32 1e-05, %v2682_v42  ;;  %v2633_v51 = vrot.slane %v2619_v43, 4  ;;  %v915_v42 = vld [vmem:[#allocation9 + $0x4] sm:$0xf] }
 0x282   :  { %v2687_v52 = vadd.f32 1e-05, %v2683_v45  ;;  %v2639_v53 = vrot.slane %v2620_v50, 4  ;;  %v7228_v33 = vsub.s32 %v2702_v31, %v7201_v46  ;;  %v6284_v31 = vld [vmem:[%s7581_s4 + $0x1d4] ss:$8 sps:$4 sm:$0xff]  }
 0x283   :  { %6313 = vrsqrt.f32 %v2686_v49  ;;  %v2634_v40 = vadd.f32 %v2633_v51, %v2619_v43 }
 0x284   :  { %6315 = vrsqrt.f32 %v2687_v52  ;;  %v2640_v41 = vadd.f32 %v2639_v53, %v2620_v50 }
 0x285   :  { %v2635_v54 = vrot.slane %v2634_v40, 2 }
 0x286   :  { %v2641_v55 = vrot.slane %v2640_v41, 2 }
 0x287   :  { %v2636_v56 = vadd.f32 %v2635_v54, %v2634_v40 }
 0x288   :  { %v2642_v57 = vadd.f32 %v2641_v55, %v2640_v41 }
 0x289   :  { %v2637_v58 = vrot.slane %v2636_v56, 1 }
 0x28a   :  { %v2643_v59 = vrot.slane %v2642_v57, 1 }
 0x28b   :  { %v2638_v60 = vadd.f32 %v2637_v58, %v2636_v56 }
 0x28c   :  { %v2644_v61 = vadd.f32 %v2643_v59, %v2642_v57 }
 0x28d   :  { %v6314_v62 = vpop.eup %6313  ;;  %v2648_v63 = vmul.f32 0.125, %v2638_v60 }
 0x28e   :  { %v6316_v2 = vpop.eup %6315  ;;  %v2649_v3 = vmul.f32 0.125, %v2644_v61 }
 0x28f   :  { %v2652_v4 = vsub.f32 %v2619_v43, %v2648_v63  ;;  %v2698_v5 = vcombine.low %v6314_v62, %v6316_v2  ;;  %v916_v43 = vld [vmem:[#allocation9 + $0x8] sm:$0xf]  ;;  %v6243_v2 = vld [vmem:[%s7581_s4 + $0x100] ss:$8 sps:$4 sm:$0xff]  }
 0x290   :  { %v2653_v6 = vsub.f32 %v2620_v50, %v2649_v3  ;;  %v2757_v50 = vrot.slane %v916_v43, %v7207_v48  ;;  %v2753_v49 = vrot.slane %v916_v43, %v7204_v47  ;;  %v2765_v51 = vrot.slane %v916_v43, %v7223_v18 }
 0x291   :  { %v2656_v7 = vmul.f32 %v2652_v4, %v2652_v4  ;;  %v2706_v36 = vrot.slane %v2698_v5, %v7228_v33  ;;  %v2761_v52 = vrot.slane %v916_v43, %v7220_v16  ;;  %v6248_v5 = vld [vmem:[%s7581_s4 + $0x114] ss:$8 sps:$4 sm:$0xff]   ;;  %v6292_v43 = vld [vmem:[%s7582_s5] sm:$0xff]  }
 0x292   :  { %v2657_v8 = vmul.f32 %v2653_v6, %v2653_v6 }
 0x293   :  { %v2670_v9 = vrot.slane %v2656_v7, 4 }
 0x294   :  { %v2676_v10 = vrot.slane %v2657_v8, 4 }
 0x295   :  { %v2671_v11 = vadd.f32 %v2670_v9, %v2656_v7  ;;  %v6254_v7 = vld [vmem:[%s7581_s4 + $0x134] ss:$8 sps:$4 sm:$0xff]   ;;  %v6257_v9 = vld [vmem:[%s7581_s4 + $0x144] ss:$8 sps:$4 sm:$0xff]  }
 0x296   :  { %v2677_v14 = vadd.f32 %v2676_v10, %v2657_v8  ;;  %v6252_v8 = vld [vmem:[%s7581_s4 + $0x130] ss:$8 sps:$4 sm:$0xff]   ;;  %v6255_v10 = vld [vmem:[%s7581_s4 + $0x140] ss:$8 sps:$4 sm:$0xff]  }
 0x297   :  { %v2672_v15 = vrot.slane %v2671_v11, 2 }
 0x298   :  { %v2678_v17 = vrot.slane %v2677_v14, 2 }
 0x299   :  { %v2673_v19 = vadd.f32 %v2672_v15, %v2671_v11  ;;  %v6260_v11 = vld [vmem:[%s7581_s4 + $0x154] ss:$8 sps:$4 sm:$0xff]   ;;  %v6263_v15 = vld [vmem:[%s7581_s4 + $0x164] ss:$8 sps:$4 sm:$0xff]  }
 0x29a   :  { %v2679_v20 = vadd.f32 %v2678_v17, %v2677_v14  ;;  %v6258_v14 = vld [vmem:[%s7581_s4 + $0x150] ss:$8 sps:$4 sm:$0xff]   ;;  %v6261_v17 = vld [vmem:[%s7581_s4 + $0x160] ss:$8 sps:$4 sm:$0xff]  }
 0x29b   :  { %v2674_v21 = vrot.slane %v2673_v19, 1 }
 0x29c   :  { %v2680_v22 = vrot.slane %v2679_v20, 1 }
 0x29d   :  { %v2675_v23 = vadd.f32 %v2674_v21, %v2673_v19  ;;  %v6266_v19 = vld [vmem:[%s7581_s4 + $0x174] ss:$8 sps:$4 sm:$0xff]   ;;  %v6269_v21 = vld [vmem:[%s7581_s4 + $0x184] ss:$8 sps:$4 sm:$0xff]  }
 0x29e   :  { %v2681_v24 = vadd.f32 %v2680_v22, %v2679_v20  ;;  %v6264_v20 = vld [vmem:[%s7581_s4 + $0x170] ss:$8 sps:$4 sm:$0xff]   ;;  %v6267_v22 = vld [vmem:[%s7581_s4 + $0x180] ss:$8 sps:$4 sm:$0xff]  }
 0x29f   :  { %v2684_v25 = vmul.f32 0.125, %v2675_v23  ;;  %v6272_v23 = vld [vmem:[%s7581_s4 + $0x194] ss:$8 sps:$4 sm:$0xff]  }
 0x2a0   :  { %v2685_v26 = vmul.f32 0.125, %v2681_v24  ;;  %v6270_v24 = vld [vmem:[%s7581_s4 + $0x190] ss:$8 sps:$4 sm:$0xff]  }
 0x2a1   :  { %v2688_v27 = vadd.f32 1e-05, %v2684_v25  ;;  %v6275_v25 = vld [vmem:[%s7581_s4 + $0x1a4] ss:$8 sps:$4 sm:$0xff]  }
 0x2a2   :  { %v2689_v28 = vadd.f32 1e-05, %v2685_v26  ;;  %v6273_v26 = vld [vmem:[%s7581_s4 + $0x1a0] ss:$8 sps:$4 sm:$0xff]  }
 0x2a3   :  { %6317 = vrsqrt.f32 %v2688_v27  ;;  %v6278_v27 = vld [vmem:[%s7581_s4 + $0x1b4] ss:$8 sps:$4 sm:$0xff]  }
 0x2a4   :  { %6319 = vrsqrt.f32 %v2689_v28  ;;  %v6276_v28 = vld [vmem:[%s7581_s4 + $0x1b0] ss:$8 sps:$4 sm:$0xff]  }
 0x2ad   :  { %v6318_v32 = vpop.eup %6317 }
 0x2ae   :  { %v6320_v34 = vpop.eup %6319 }
 0x2af   :  { %v2699_v35 = vcombine.low %v6318_v32, %v6320_v34  ;;  %v6282_v32 = vld [vmem:[%s7581_s4 + $0x1d0] ss:$8 sps:$4 sm:$0xff]   ;;  %v6287_v34 = vld [vmem:[%s7581_s4 + $0x1e4] ss:$8 sps:$4 sm:$0xff]  }
 0x2b1   :  { %v2713_v37 = vrot.slane %v2699_v35, %v7228_v33  ;;  %v6285_v35 = vld [vmem:[%s7581_s4 + $0x1e0] ss:$8 sps:$4 sm:$0xff]  }
 0x2b3   :  { %v2714_v39 = vcombine.low %v2706_v36, %v2713_v37  ;;  %v6290_v36 = vld [vmem:[%s7581_s4 + $0x1f4] ss:$8 sps:$4 sm:$0xff]   ;;  %v6288_v37 = vld [vmem:[%s7581_s4 + $0x1f0] ss:$8 sps:$4 sm:$0xff]  }
 0x2b5   :  { %v2721_v44 = vrot.slane %v2714_v39, %v7228_v33 }
 0x2b7   :  { %v2723_v45 = vmul.f32 %v2721_v44, %v915_v42  ;;  %v6291_v42 = vld [vmem:[%s7582_s5 + $0x40] sm:$0xff]   ;;  %v6293_v44 = vld [vmem:[%s7582_s5 + $0x48] sm:$0xff]  }
 0x2b8   :  { %5654 = vmatprep.subr.bf16.mxu1 %v6291_v42 }
 0x2b9   :  { %v2732_v53 = vrot.slane %v2723_v45, %v7207_v48  ;;  %v2728_v40 = vrot.slane %v2723_v45, %v7204_v47  ;;  %v2740_v41 = vrot.slane %v2723_v45, %v7223_v18  ;;  %v2736_v54 = vrot.slane %v2723_v45, %v7220_v16  ;;  %5655 = vmatpush3.bf16.msra.mxu1 %v6292_v43  ;;  %v6294_v45 = vld [vmem:[%s7582_s5 + $0x8] sm:$0xff]  }
 0x2ba   :  { %5656 = vmatprep.subr.bf16.mxu1 %v6293_v44 }
 0x2bb   :  { %v2746_v55 = vmul.f32 %v2732_v53, %v7213_v13  ;;  %v2745_v56 = vmul.f32 %v2728_v40, %v7211_v12  ;;  %v2748_v57 = vmul.f32 %v2740_v41, %v2653_v6  ;;  %v2747_v58 = vmul.f32 %v2736_v54, %v2652_v4  ;;  %v6246_v12 = vld [vmem:[%s7581_s4 + $0x110] ss:$8 sps:$4 sm:$0xff]   ;;  %v6251_v4 = vld [vmem:[%s7581_s4 + $0x124] ss:$8 sps:$4 sm:$0xff]   ;;  %v6249_v6 = vld [vmem:[%s7581_s4 + $0x120] ss:$8 sps:$4 sm:$0xff]  }
 0x2bc   :  { %v6299_v53 = vld [vmem:[%s7582_s5 + $0x60] sm:$0xff]   ;;  %v6301_v41 = vld [vmem:[%s7582_s5 + $0x68] sm:$0xff]  }
 0x2bd   :  { %v2771_v59 = vadd.f32 %v2757_v50, %v2746_v55  ;;  %v2770_v60 = vadd.f32 %v2753_v49, %v2745_v56  ;;  %v2773_v61 = vadd.f32 %v2765_v51, %v2748_v57  ;;  %v7243_v62 = vadd.f32 %v2761_v52, %v2747_v58  ;;  %v6295_v50 = vld [vmem:[%s7582_s5 + $0x50] sm:$0xff]   ;;  %5657 = vmatpush3.bf16.msra.mxu1 %v6294_v45  ;;  %v6297_v51 = vld [vmem:[%s7582_s5 + $0x58] sm:$0xff]   ;;  %v6300_v40 = vld [vmem:[%s7582_s5 + $0x20] sm:$0xff]  }
 0x2be   :  { %v6296_v49 = vld [vmem:[%s7582_s5 + $0x10] sm:$0xff]   ;;  %5658 = vmatprep.subr.bf16.mxu1 %v6295_v50  ;;  %v6298_v52 = vld [vmem:[%s7582_s5 + $0x18] sm:$0xff]   ;;  %v6302_v54 = vld [vmem:[%s7582_s5 + $0x28] sm:$0xff]  }
 0x2bf   :  { %v2842_v63 = vpack.c.bf16 %v2771_v59, %v2771_v59  ;;  %v2841_v3 = vpack.c.bf16 %v2770_v60, %v2770_v60  ;;  %v2844_v13 = vpack.c.bf16 %v2773_v61, %v2773_v61  ;;  %v2843_v39 = vpack.c.bf16 %v7243_v62, %v7243_v62  ;;  %v6303_v55 = vld [vmem:[%s7582_s5 + $0x70] sm:$0xff]   ;;  %v6305_v57 = vld [vmem:[%s7582_s5 + $0x78] sm:$0xff]  }
 0x2c0   :  { %v6304_v56 = vld [vmem:[%s7582_s5 + $0x30] sm:$0xff]   ;;  %v6306_v58 = vld [vmem:[%s7582_s5 + $0x38] sm:$0xff]  }
 0x2c1   :  { %3208 = vmatprep.mubr.bf16.mxu0 %v2842_v63  ;;  %5659 = vmatpush3.bf16.msra.mxu1 %v6296_v49  ;;  %v2774_v59 = vld [vmem:[#allocation9 + $0xc] sm:$0x3] }
 0x2c2   :  { %3209 = vmatmul.mubr.bf16.vlgmr.msra.gmra.mrb[8].mxu0 %v2841_v3  ;;  %5660 = vmatprep.subr.bf16.mxu1 %v6297_v51  ;;  %v2849_v60 = vrot.slane %v2774_v59, %v7204_v47  ;;  %v2853_v61 = vrot.slane %v2774_v59, %v7207_v48 }
 0x2c3   :  { %3218 = vmatpush1.bf16.msra.mxu0 %v6243_v2  ;;  %3249 = vmatprep.mubr.bf16.mxu0 %v2844_v13 }
 0x2c4   :  { %3219 = vmatprep.subr.bf16.mxu0 %v6248_v5 }
 0x2c5   :  { %5661 = vmatpush3.bf16.msra.mxu1 %v6298_v52 }
 0x2c6   :  { %5662 = vmatprep.subr.bf16.mxu1 %v6299_v53 }
 0x2c7   :  { %3220 = vmatpush1.bf16.msra.mxu0 %v6246_v12 }
 0x2c8   :  { %3221 = vmatprep.subr.bf16.mxu0 %v6251_v4 }
 0x2c9   :  { %5663 = vmatpush3.bf16.msra.mxu1 %v6300_v40 }
 0x2ca   :  { %5664 = vmatprep.subr.bf16.mxu1 %v6301_v41  ;;  %v2775_v41 = vld [vmem:[#allocation9 + $0xe] sm:$0x3] }
 0x2cb   :  { %3222 = vmatpush1.bf16.msra.mxu0 %v6249_v6 }
 0x2cc   :  { %3223 = vmatprep.subr.bf16.mxu0 %v6254_v7 }
 0x2cd   :  { %5665 = vmatpush3.bf16.msra.mxu1 %v6302_v54 }
 0x2ce   :  { %5666 = vmatprep.subr.bf16.mxu1 %v6303_v55  ;;  %v2776_v55 = vld [vmem:[#allocation9 + $0x10] sm:$0x3] }
 0x2cf   :  { %3224 = vmatpush1.bf16.msra.mxu0 %v6252_v8  ;;  %v3336_v59 = vrot.slane %v2776_v55, %v7207_v48 }
 0x2d0   :  { %3225 = vmatprep.subr.bf16.mxu0 %v6257_v9 }
 0x2d1   :  { %5667 = vmatpush3.bf16.msra.mxu1 %v6304_v56 }
 0x2d2   :  { %5668 = vmatprep.subr.bf16.mxu1 %v6305_v57 }
 0x2d3   :  { %3226 = vmatpush1.bf16.msra.mxu0 %v6255_v10 }
 0x2d4   :  { %3227 = vmatprep.subr.bf16.mxu0 %v6260_v11 }
 0x2d5   :  { %5669 = vmatpush3.bf16.msra.mxu1 %v6306_v58  ;;  %v3332_v58 = vrot.slane %v2776_v55, %v7204_v47 }
 0x2d7   :  { %3228 = vmatpush1.bf16.msra.mxu0 %v6258_v14 }
 0x2d8   :  { %3229 = vmatprep.subr.bf16.mxu0 %v6263_v15 }
 0x2db   :  { %3230 = vmatpush1.bf16.msra.mxu0 %v6261_v17 }
 0x2dc   :  { %3231 = vmatprep.subr.bf16.mxu0 %v6266_v19 }
 0x2df   :  { %3232 = vmatpush1.bf16.msra.mxu0 %v6264_v20 }
 0x2e0   :  { %3233 = vmatprep.subr.bf16.mxu0 %v6269_v21 }
 0x2e3   :  { %3234 = vmatpush1.bf16.msra.mxu0 %v6267_v22 }
 0x2e4   :  { %3235 = vmatprep.subr.bf16.mxu0 %v6272_v23 }
 0x2e7   :  { %3236 = vmatpush1.bf16.msra.mxu0 %v6270_v24 }
 0x2e8   :  { %3237 = vmatprep.subr.bf16.mxu0 %v6275_v25 }
 0x2eb   :  { %3238 = vmatpush1.bf16.msra.mxu0 %v6273_v26 }
 0x2ec   :  { %3239 = vmatprep.subr.bf16.mxu0 %v6278_v27 }
 0x2ef   :  { %3240 = vmatpush1.bf16.msra.mxu0 %v6276_v28 }
 0x2f0   :  { %3241 = vmatprep.subr.bf16.mxu0 %v6281_v29 }
 0x2f3   :  { %3242 = vmatpush1.bf16.msra.mxu0 %v6279_v30 }
 0x2f4   :  { %3243 = vmatprep.subr.bf16.mxu0 %v6284_v31 }
 0x2f7   :  { %3244 = vmatpush1.bf16.msra.mxu0 %v6282_v32 }
 0x2f8   :  { %3245 = vmatprep.subr.bf16.mxu0 %v6287_v34 }
 0x2fb   :  { %3246 = vmatpush1.bf16.msra.mxu0 %v6285_v35 }
 0x2fc   :  { %3247 = vmatprep.subr.bf16.mxu0 %v6290_v36 }
 0x2ff   :  { %3248 = vmatpush1.bf16.msra.mxu0 %v6288_v37 }
 0x302   :  { %3250 = vmatmul.mubr.bf16.vlgmr.msra.gmra.mrb[8].mxu0 %v2843_v39 }
 0x3d5   :  { %v3251_v62 = vpop.f32.mrb[8].mxu0 }
 0x3d6   :  { %v5790_v63 = vadd.f32 %v3251_v62, %v2849_v60  ;;  %v3253_v2 = vpop.f32.mrb[9].mxu0 }
 0x3d7   :  { %v5791_v3 = vadd.f32 %v3253_v2, %v2853_v61  ;;  %v3255_v5 = vpop.f32.mrb[10].mxu0 }
 0x3d8   :  { %v3258_v13 = vmax.f32 %v5790_v63, 0.0  ;;  %v3256_v12 = vpop.f32.mrb[11].mxu0 }
 0x3d9   :  { %v3259_v4 = vmax.f32 %v5791_v3, 0.0  ;;  %v6512_v12 = vmov 0.0  }
 0x3da   :  { %v3260_v6 = vrot.slane %v3258_v13, 4  ;;  %5738 = vmatprep.subr.bf16.mxu1 %v6512_v12 }
 0x3db   :  { %v3266_v7 = vrot.slane %v3259_v4, 4 }
 0x3dc   :  { %v3261_v8 = vadd.f32 %v3260_v6, %v3258_v13  ;;  %v6309_v6 = vld [vmem:[%s7583_s6 + $0x10] sm:$0xff]  }
 0x3dd   :  { %v3267_v9 = vadd.f32 %v3266_v7, %v3259_v4  ;;  %v6310_v7 = vld [vmem:[%s7583_s6 + $0x18] sm:$0xff]  }
 0x3de   :  { %v3262_v10 = vrot.slane %v3261_v8, 2 }
 0x3df   :  { %v3268_v11 = vrot.slane %v3267_v9, 2 }
 0x3e0   :  { %v3263_v14 = vadd.f32 %v3262_v10, %v3261_v8 }
 0x3e1   :  { %v3269_v15 = vadd.f32 %v3268_v11, %v3267_v9  ;;  %v5601_v9 = vld [vmem:[#allocation9 + $0x12] ss:$0 sm:$0xff] }
 0x3e2   :  { %v3264_v17 = vrot.slane %v3263_v14, 1 }
 0x3e3   :  { %v3270_v19 = vrot.slane %v3269_v15, 1 }
 0x3e4   :  { %v3265_v20 = vadd.f32 %v3264_v17, %v3263_v14 }
 0x3e5   :  { %v3271_v21 = vadd.f32 %v3270_v19, %v3269_v15 }
 0x3e6   :  { %v3272_v22 = vmul.f32 0.125, %v3265_v20 }
 0x3e7   :  { %v3273_v23 = vmul.f32 0.125, %v3271_v21 }
 0x3e8   :  { %v3274_v24 = vsub.f32 %v3258_v13, %v3272_v22  ;;  %v6307_v13 = vld [vmem:[%s7583_s6] sm:$0xff]  }
 0x3e9   :  { %v3275_v25 = vsub.f32 %v3259_v4, %v3273_v23  ;;  %v6308_v4 = vld [vmem:[%s7583_s6 + $0x8] sm:$0xff]  }
 0x3ea   :  { %v3276_v26 = vmul.f32 %v3274_v24, %v3274_v24 }
 0x3eb   :  { %v3277_v27 = vmul.f32 %v3275_v25, %v3275_v25 }
 0x3ec   :  { %v3278_v28 = vrot.slane %v3276_v26, 4 }
 0x3ed   :  { %v3284_v29 = vrot.slane %v3277_v27, 4 }
 0x3ee   :  { %v3279_v30 = vadd.f32 %v3278_v28, %v3276_v26 }
 0x3ef   :  { %v3285_v31 = vadd.f32 %v3284_v29, %v3277_v27 }
 0x3f0   :  { %v3280_v32 = vrot.slane %v3279_v30, 2 }
 0x3f1   :  { %v3286_v34 = vrot.slane %v3285_v31, 2 }
 0x3f2   :  { %v3281_v35 = vadd.f32 %v3280_v32, %v3279_v30 }
 0x3f3   :  { %v3287_v36 = vadd.f32 %v3286_v34, %v3285_v31 }
 0x3f4   :  { %v3282_v37 = vrot.slane %v3281_v35, 1 }
 0x3f5   :  { %v3288_v39 = vrot.slane %v3287_v36, 1 }
 0x3f6   :  { %v3283_v42 = vadd.f32 %v3282_v37, %v3281_v35 }
 0x3f7   :  { %v3289_v43 = vadd.f32 %v3288_v39, %v3287_v36 }
 0x3f8   :  { %v3290_v44 = vmul.f32 0.125, %v3283_v42 }
 0x3f9   :  { %v3291_v45 = vmul.f32 0.125, %v3289_v43  ;;  %v3342_v43 = vld [vmem:[#allocation9 + $0x13] sm:$0x1] }
 0x3fa   :  { %v3292_v50 = vadd.f32 1e-05, %v3290_v44 }
 0x3fb   :  { %v3293_v49 = vadd.f32 1e-05, %v3291_v45 }
 0x3fc   :  { %6321 = vrsqrt.f32 %v3292_v50 }
 0x3fd   :  { %6323 = vrsqrt.f32 %v3293_v49  ;;  %v5618_v49 = vld [vmem:[#allocation9 + $0x14] ss:$0 sm:$0xff] }
 0x406   :  { %v6322_v51 = vpop.eup %6321 }
 0x407   :  { %v6324_v52 = vpop.eup %6323 }
 0x408   :  { %v3298_v53 = vcombine.low %v6322_v51, %v6324_v52 }
 0x40a   :  { %v3305_v40 = vrot.slane %v3298_v53, %v7228_v33 }
 0x40c   :  { %v3312_v54 = vrot.slane %v3305_v40, %v7228_v33  ;;  %v6311_v40 = vld [vmem:[%s7584_s7] sm:$0xff]  }
 0x40e   :  { %v3314_v56 = vmul.f32 %v3312_v54, %v2775_v41  ;;  %v6312_v41 = vld [vmem:[%s7584_s7 + $0x8] sm:$0xff]   ;;  %v5619_v54 = vld [vmem:[#allocation9 + $0x15] ss:$0 sm:$0xff]  ;;  %s6514_s7 = smov 118  }
 0x410   :  { %v3323_v57 = vrot.slane %v3314_v56, %v7207_v48  ;;  %v3319_v60 = vrot.slane %v3314_v56, %v7204_v47 }
 0x412   :  { %v3327_v61 = vmul.f32 %v3323_v57, %v3275_v25  ;;  %v3326_v62 = vmul.f32 %v3319_v60, %v3274_v24 }
 0x414   :  { %v3340_v63 = vadd.f32 %v3336_v59, %v3327_v61  ;;  %v3339_v2 = vadd.f32 %v3332_v58, %v3326_v62 }
 0x416   :  { %v3377_v3 = vpack.c.bf16 %v3340_v63, %v3340_v63  ;;  %v3376_v5 = vpack.c.bf16 %v3339_v2, %v3339_v2 }
 0x418   :  { %3512 = vmatprep.mubr.bf16.mxu1 %v3377_v3 }
 0x419   :  { %3513 = vmatmul.mubr.bf16.vlgmr.msra.gmra.mrb[4].mxu1 %v3376_v5 }
 0x41a   :  { %5739 = vmatpush3.bf16.msra.mxu1 %v6307_v13  ;;  %5746 = vmatprep.mubr.msk.bf16.mxu1 %vm6513_vm0, %v6512_v12 }
 0x41b   :  { %5740 = vmatprep.subr.bf16.mxu1 %v6512_v12 }
 0x41e   :  { %5741 = vmatpush3.bf16.msra.mxu1 %v6308_v4 }
 0x41f   :  { %5742 = vmatprep.subr.bf16.mxu1 %v6512_v12 }
 0x422   :  { %5743 = vmatpush3.bf16.msra.mxu1 %v6309_v6 }
 0x423   :  { %5744 = vmatprep.subr.bf16.mxu1 %v6512_v12 }
 0x426   :  { %5745 = vmatpush3.bf16.msra.mxu1 %v6310_v7 }
 0x427   :  { %5750 = vmatprep.subr.bf16.mxu1 %v6512_v12 }
 0x4ec   :  { %v5670_v8 = vpop.f32.mrb[4].mxu1 }
 0x4ed   :  { %v5671_v10 = vpop.f32.mrb[5].mxu1 }
 0x4ee   :  { %v5672_v11 = vadd.f32 %v5671_v10, %v5670_v8  ;;  %v5673_v14 = vpop.f32.mrb[6].mxu1 }
 0x4ef   :  { %v5674_v15 = vpop.f32.mrb[7].mxu1 }
 0x4f0   :  { %v3515_v17 = vadd.f32 %v5672_v11, %v5601_v9 }
 0x4f2   :  { %v3520_v19 = vmax.f32 %v3515_v17, 0.0 }
 0x4f4   :  { %v3522_v20 = vsel %vm3521_vm1, %v3520_v19, 0.0 }
 0x4f5   :  { %v3523_v21 = vrot.slane %v3522_v20, 4 }
 0x4f7   :  { %v3524_v22 = vadd.f32 %v3523_v21, %v3522_v20  ;;  %v3558_v21 = vld [vmem:[#allocation9 + $0x16] sm:$0x1] }
 0x4f9   :  { %v3525_v23 = vrot.slane %v3524_v22, 2 }
 0x4fb   :  { %v3526_v24 = vadd.f32 %v3525_v23, %v3524_v22 }
 0x4fd   :  { %v3527_v25 = vrot.slane %v3526_v24, 1 }
 0x4ff   :  { %v3528_v26 = vadd.f32 %v3527_v25, %v3526_v24  ;;  %v5625_v25 = vld [vmem:[#allocation9 + $0x17] ss:$0 sm:$0xff] }
 0x501   :  { %v3529_v27 = vmul.f32 0.125, %v3528_v26 }
 0x503   :  { %v3530_v28 = vsub.f32 %v3520_v19, %v3529_v27 }
 0x505   :  { %v3531_v29 = vmul.f32 %v3530_v28, %v3530_v28 }
 0x507   :  { %v3532_v30 = vsel %vm3521_vm1, %v3531_v29, 0.0  ;;  %v5626_v29 = vld [vmem:[#allocation9 + $0x18] ss:$0 sm:$0xff] }
 0x508   :  { %v3533_v31 = vrot.slane %v3532_v30, 4 }
 0x50a   :  { %v3534_v32 = vadd.f32 %v3533_v31, %v3532_v30 }
 0x50c   :  { %v3535_v34 = vrot.slane %v3534_v32, 2 }
 0x50e   :  { %v3536_v35 = vadd.f32 %v3535_v34, %v3534_v32 }
 0x510   :  { %v3537_v36 = vrot.slane %v3536_v35, 1 }
 0x512   :  { %v3538_v37 = vadd.f32 %v3537_v36, %v3536_v35 }
 0x514   :  { %v3539_v39 = vmul.f32 0.125, %v3538_v37 }
 0x516   :  { %v3540_v42 = vadd.f32 1e-05, %v3539_v39 }
 0x518   :  { %6325 = vrsqrt.f32 %v3540_v42 }
 0x522   :  { %v6326_v44 = vpop.eup %6325 }
 0x523   :  { %v3542_v45 = vmul.f32 %v6326_v44, %v3342_v43 }
 0x525   :  { %v3547_v50 = vrot.slane %v3542_v45, %v7204_v47 }
 0x527   :  { %v3549_v51 = vmul.f32 %v3547_v50, %v3530_v28 }
 0x529   :  { %v3556_v52 = vadd.f32 %v5618_v49, %v3549_v51 }
 0x52b   :  { %v3568_v53 = vpack.c.bf16 %v3556_v52, %v3556_v52  ;;  %v3746_v52 = vld [vmem:[%s7578_s1] sm:$0xff] }
 0x52d   :  { %5747 = vmatmul.mubr.msk.bf16.vlgmr.msra.gmra.mrb[8].mxu1 %vm3521_vm1, %v3568_v53 }
 0x52e   :  { %5754 = vmatprep.mubr.msk.bf16.mxu1 %vm6513_vm0, %v6512_v12  ;;  %5751 = vmatpush3.bf16.msra.mxu1 %v6311_v40 }
 0x52f   :  { %5752 = vmatprep.subr.bf16.mxu1 %v6512_v12 }
 0x532   :  { %5753 = vmatpush3.bf16.msra.mxu1 %v6312_v41 }
 0x600   :  { %v3636_v55 = vpop.f32.mrb[8].mxu1 }
 0x601   :  { %v3637_v56 = vadd.f32 %v5619_v54, %v3636_v55  ;;  %v5748_v57 = vpop.f32.mrb[9].mxu1 }
 0x602   :  { %v3639_v58 = vpop.f32.mrb[10].mxu1 }
 0x603   :  { %v3642_v59 = vmax.f32 %v3637_v56, 0.0  ;;  %v5749_v60 = vpop.f32.mrb[11].mxu1 }
 0x605   :  { %v3644_v61 = vsel %vm3643_vm2, %v3642_v59, 0.0 }
 0x606   :  { %v3645_v62 = vrot.slane %v3644_v61, 4 }
 0x608   :  { %v3646_v63 = vadd.f32 %v3645_v62, %v3644_v61 }
 0x60a   :  { %v3647_v2 = vrot.slane %v3646_v63, 2 }
 0x60c   :  { %v3648_v3 = vadd.f32 %v3647_v2, %v3646_v63 }
 0x60e   :  { %v3649_v5 = vrot.slane %v3648_v3, 1 }
 0x610   :  { %v3650_v13 = vadd.f32 %v3649_v5, %v3648_v3 }
 0x612   :  { %v3651_v4 = vmul.f32 0.125, %v3650_v13 }
 0x614   :  { %v3652_v6 = vsub.f32 %v3642_v59, %v3651_v4 }
 0x616   :  { %v3653_v7 = vmul.f32 %v3652_v6, %v3652_v6 }
 0x618   :  { %v3654_v8 = vsel %vm3643_vm2, %v3653_v7, 0.0 }
 0x619   :  { %v3655_v9 = vrot.slane %v3654_v8, 4 }
 0x61b   :  { %v3656_v10 = vadd.f32 %v3655_v9, %v3654_v8 }
 0x61d   :  { %v3657_v11 = vrot.slane %v3656_v10, 2 }
 0x61f   :  { %v3658_v14 = vadd.f32 %v3657_v11, %v3656_v10 }
 0x621   :  { %v3659_v15 = vrot.slane %v3658_v14, 1 }
 0x623   :  { %v3660_v17 = vadd.f32 %v3659_v15, %v3658_v14 }
 0x625   :  { %v3661_v19 = vmul.f32 0.125, %v3660_v17 }
 0x627   :  { %v3662_v20 = vadd.f32 1e-05, %v3661_v19 }
 0x629   :  { %6327 = vrsqrt.f32 %v3662_v20 }
 0x633   :  { %v6328_v22 = vpop.eup %6327 }
 0x634   :  { %v3664_v23 = vmul.f32 %v6328_v22, %v3558_v21 }
 0x636   :  { %v3669_v24 = vrot.slane %v3664_v23, %v7204_v47 }
 0x638   :  { %v3671_v26 = vmul.f32 %v3669_v24, %v3652_v6 }
 0x63a   :  { %v3678_v27 = vadd.f32 %v5625_v25, %v3671_v26 }
 0x63c   :  { %v3680_v28 = vpack.c.bf16 %v3678_v27, %v3678_v27 }
 0x63e   :  { %5755 = vmatmul.mubr.msk.bf16.vlgmr.msra.gmra.mrb[12].mxu1 %vm3643_vm2, %v3680_v28 }
 0x711   :  { %v3740_v30 = vpop.f32.mrb[12].mxu1 }
 0x712   :  { %v3741_v31 = vadd.f32 %v5626_v29, %v3740_v30  ;;  %v5756_v32 = vpop.f32.mrb[13].mxu1 }
 0x713   :  { %v3743_v34 = vpop.f32.mrb[14].mxu1 }
 0x714   :  { %v5757_v35 = vpop.f32.mrb[15].mxu1  ;;  %v3757_v36 = vmul.f32 %v3741_v31, %v3741_v31 }
 0x716   :  { %3759 = vrot.lane.b32.xlu0 %v3757_v36, %s6514_s7  ;;  %v3763_v37 = vadd.f32 1e-08, %v3757_v36 }
 0x718   :  { %6329 = vlog2.f32 %v3763_v37 }
 0x722   :  { %v6330_v39 = vpop.eup %6329 }
 0x723   :  { %v3765_v42 = vmul.f32 0.6931472, %v6330_v39 }
 0x725   :  { %3767 = vrot.lane.b32.xlu0 %v3765_v42, %s6514_s7 }
 0x788   :  { %v3760_v43 = vpop.permute.xlu0 %3759 }
 0x789   :  { %v3762_v44 = vadd.f32 %v3760_v43, %v3757_v36 }
 0x797   :  { %v3768_v45 = vpop.permute.xlu0 %3767 }
 0x798   :  { %v3770_v50 = vsub.f32 %v3762_v44, %v3768_v45 }
 0x79a   :  { %v5630_v49 = vadd.f32 -1.0, %v3770_v50 }
 0x79c   :  { %v3773_v51 = vsel %vm3772_vm3, %v5630_v49, 0.0 }
 0x79d   :  { %3774 = vadd.xlane.f32.xlu1 %v3773_v51 }
 0x7ae   :  { %3748 = vrot.lane.b32.xlu1 %v3746_v52, %s6515_s22 }
 0x82a   :  { %v3775_v53 = vpop.xlane.xlu1 %3774 }
 0x82b   :  { %v3776_v40 = vrot.slane %v3775_v53, 4 }
 0x82d   :  { %v3777_v41 = vadd.f32 %v3776_v40, %v3775_v53 }
 0x82e   :  { %v3749_v54 = vpop.permute.xlu1 %3748 }
 0x82f   :  { %v3778_v55 = vrot.slane %v3777_v41, 2  ;;  %v3751_v56 = vmul.f32 %v3749_v54, %v3741_v31 }
 0x831   :  { %3753 = vrot.lane.b32.xlu0 %v3751_v56, %s6514_s7  ;;  %v3779_v57 = vadd.f32 %v3778_v55, %v3777_v41 }
 0x833   :  { %v3780_v58 = vrot.slane %v3779_v57, 1 }
 0x835   :  { %v3781_v59 = vadd.f32 %v3780_v58, %v3779_v57 }
 0x837   :  { %5834 = vpush %v3781_v59 }
 0x868   :  { %s5835_s12 = spop %5834 }
 0x869   :  { %s3783_s23 = smul.f32 7.9719386e-05, %s5835_s12 }
 0x86b   :  { %3785 = sst [smem:[#allocation14]] %s3783_s23 }
 0x8a3   :  { %v3754_v60 = vpop.permute.xlu0 %3753 }
 0x8a4   :  { %v3756_v61 = vadd.f32 %v3754_v60, %v3741_v31 }
 0x8a5   :  { %6480 = dma.done.wait [#allocation8], 128 }
 0x8a6   :  { %6481 = vsyncadd [#allocation8], 4294967168 }
 0x8a7   :  { %6482 = dma.done.wait [#allocation8 + $0x1], 256 }
 0x8a8   :  { %6483 = vsyncadd [#allocation8 + $0x1], 4294967040 }
 0x8a9   :  { %6484 = dma.done.wait [#allocation8 + $0x2], 512 }
 0x8aa   :  { %6485 = vsyncadd [#allocation8 + $0x2], 4294966784 }
 0x8ab   :  { %6486 = dma.done.wait [#allocation8 + $0x3], 2048 }
 0x8ac   :  { %6487 = vsyncadd [#allocation8 + $0x3], 4294965248 }
 0x8ad   :  { %6488 = dma.done.wait [#allocation8 + $0x4], 8192 }
 0x8ae   :  { %6489 = vsyncadd [#allocation8 + $0x4], 4294959104 }
 0x8af   :  { %6490 = dma.done.wait [#allocation8 + $0x5], 28672 }
 0x8b0   :  { %6491 = vsyncadd [#allocation8 + $0x5], 4294938624  ;;  %5758 = vmatprep.subr.bf16.mxu1 %v6512_v12  ;;  %5760 = vmatprep.mubr.msk.bf16.mxu1 %vm6513_vm0, %v6512_v12  ;;  %vm3830_vm4 = vcmask 1044480   ;;  %v6331_v62 = vld [vmem:[#allocation2] sm:$0x1f]   ;;  %v3815_v2 = vpack.c.bf16 %v3756_v61, %v3756_v61  ;;  %v4004_v42 = vld [vmem:[#allocation4] sm:$0xff] }
 0x8b1   :  { %v3832_v63 = vsel %vm3830_vm4, %v6331_v62, 0  ;;  %v5631_v3 = vld [vmem:[#allocation9 + $0x19] ss:$0 sm:$0xff]  ;;  %v3811_v30 = vld [vmem:[#allocation9 + $0x1a] sm:$0x1]  ;;  %v4005_v43 = vld [vmem:[#allocation4 + $0x8] sm:$0xff] }
 0x8b2   :  { %5759 = vmatpush3.bf16.msra.mxu1 %v3832_v63  ;;  %v5634_v35 = vld [vmem:[#allocation9 + $0x1b] ss:$0 sm:$0xff]  ;;  %v4006_v44 = vld [vmem:[#allocation4 + $0x10] sm:$0xff]  ;;  %v5635_v50 = vld [vmem:[#allocation9 + $0x1c] ss:$0 sm:$0xff]  ;;  %s6466_s26 = scalar_lea.hbm %s7592_s15, 16 }
 0x8b3   :  { %5764 = vmatprep.subr.bf16.mxu1 %v6512_v12  ;;  %v4007_v45 = vld [vmem:[#allocation4 + $0x18] sm:$0xff]  ;;  %p6467_p4 = scmp.ne.s32.totalorder %s7592_s15, %s6466_s26  ;;  %p6470_p5 = scmp.lt.u32.totalorder %s6466_s26, %s7592_s15 }
 0x8b5   :  { %5761 = vmatmul.mubr.msk.bf16.vlgmr.msra.gmra.mrb[16].mxu1 %vm3772_vm3, %v3815_v2  ;;  %p6472_p6 = pnand %p6470_p5, %p6467_p4 }
 0x8b6   :  { %5765 = vmatpush3.bf16.msra.mxu1 %v6643_v0  ;;  %5768 = vmatprep.mubr.msk.bf16.mxu1 %vm6513_vm0, %v6512_v12 }
 0x8b7   :  { %5766 = vmatprep.subr.bf16.mxu1 %v6512_v12 }
 0x8ba   :  { %5767 = vmatpush3.bf16.msra.mxu1 %v6648_v1 }
 0x8bb   :  { %5772 = vmatprep.subr.bf16.mxu1 %v6512_v12 }
 0x988   :  { %v3868_v5 = vpop.f32.mrb[16].mxu1 }
 0x989   :  { %v3869_v13 = vadd.f32 %v5631_v3, %v3868_v5  ;;  %v5762_v4 = vpop.f32.mrb[17].mxu1 }
 0x98a   :  { %v3871_v6 = vpop.f32.mrb[18].mxu1 }
 0x98b   :  { %v3874_v7 = vmax.f32 %v3869_v13, 0.0  ;;  %v5763_v8 = vpop.f32.mrb[19].mxu1 }
 0x98d   :  { %v3875_v9 = vsel %vm3643_vm2, %v3874_v7, 0.0 }
 0x98e   :  { %v3876_v10 = vrot.slane %v3875_v9, 4 }
 0x990   :  { %v3877_v0 = vadd.f32 %v3876_v10, %v3875_v9  ;;  %v3911_v9 = vld [vmem:[#allocation9 + $0x1d] sm:$0x1] }
 0x992   :  { %v3878_v11 = vrot.slane %v3877_v0, 2 }
 0x994   :  { %v3879_v14 = vadd.f32 %v3878_v11, %v3877_v0 }
 0x996   :  { %v3880_v15 = vrot.slane %v3879_v14, 1 }
 0x998   :  { %v3881_v17 = vadd.f32 %v3880_v15, %v3879_v14  ;;  %v5637_v14 = vld [vmem:[#allocation9 + $0x1e] ss:$0 sm:$0xff] }
 0x99a   :  { %v3882_v19 = vmul.f32 0.125, %v3881_v17 }
 0x99c   :  { %v3883_v20 = vsub.f32 %v3874_v7, %v3882_v19 }
 0x99e   :  { %v3884_v1 = vmul.f32 %v3883_v20, %v3883_v20 }
 0x9a0   :  { %v3885_v21 = vsel %vm3643_vm2, %v3884_v1, 0.0  ;;  %v4095_v1 = vld [vmem:[#allocation5] sm:$0xff] }
 0x9a1   :  { %v3886_v22 = vrot.slane %v3885_v21, 4 }
 0x9a3   :  { %v3887_v23 = vadd.f32 %v3886_v22, %v3885_v21  ;;  %v4098_v21 = vld [vmem:[#allocation5 + $0x18] sm:$0xff]  ;;  %v4097_v22 = vld [vmem:[#allocation5 + $0x10] sm:$0xff] }
 0x9a5   :  { %v3888_v24 = vrot.slane %v3887_v23, 2 }
 0x9a7   :  { %v3889_v25 = vadd.f32 %v3888_v24, %v3887_v23  ;;  %v4100_v23 = vld [vmem:[#allocation5 + $0x28] sm:$0xff]  ;;  %v4099_v24 = vld [vmem:[#allocation5 + $0x20] sm:$0xff] }
 0x9a9   :  { %v3890_v26 = vrot.slane %v3889_v25, 1 }
 0x9ab   :  { %v3891_v27 = vadd.f32 %v3890_v26, %v3889_v25  ;;  %v4102_v25 = vld [vmem:[#allocation5 + $0x38] sm:$0xff]  ;;  %v4101_v26 = vld [vmem:[#allocation5 + $0x30] sm:$0xff] }
 0x9ad   :  { %v3892_v28 = vmul.f32 0.125, %v3891_v27  ;;  %v4104_v27 = vld [vmem:[#allocation5 + $0x48] sm:$0xff] }
 0x9af   :  { %v3893_v29 = vadd.f32 1e-05, %v3892_v28  ;;  %v4103_v28 = vld [vmem:[#allocation5 + $0x40] sm:$0xff] }
 0x9b1   :  { %6332 = vrsqrt.f32 %v3893_v29  ;;  %v4105_v29 = vld [vmem:[#allocation5 + $0x50] sm:$0xff] }
 0x9bb   :  { %v6333_v31 = vpop.eup %6332 }
 0x9bc   :  { %v3895_v32 = vmul.f32 %v6333_v31, %v3811_v30  ;;  %v4108_v30 = vld [vmem:[#allocation5 + $0x68] sm:$0xff]  ;;  %v4107_v31 = vld [vmem:[#allocation5 + $0x60] sm:$0xff] }
 0x9be   :  { %v3900_v34 = vrot.slane %v3895_v32, %v7204_v47  ;;  %v4110_v32 = vld [vmem:[#allocation5 + $0x78] sm:$0xff] }
 0x9c0   :  { %v3902_v36 = vmul.f32 %v3900_v34, %v3883_v20  ;;  %v4096_v20 = vld [vmem:[#allocation5 + $0x8] sm:$0xff]  ;;  %v4109_v34 = vld [vmem:[#allocation5 + $0x70] sm:$0xff] }
 0x9c2   :  { %v3909_v37 = vadd.f32 %v5634_v35, %v3902_v36  ;;  %v5638_v35 = vld [vmem:[#allocation9 + $0x1f] ss:$0 sm:$0xff] }
 0x9c4   :  { %v3915_v39 = vpack.c.bf16 %v3909_v37, %v3909_v37 }
 0x9c6   :  { %5769 = vmatmul.mubr.msk.bf16.vlgmr.msra.gmra.mrb[20].mxu1 %vm3643_vm2, %v3915_v39 }
 0x9c7   :  { %5780 = vmatprep.mubr.msk.bf16.mxu1 %vm6513_vm0, %v6512_v12  ;;  %5773 = vmatpush3.bf16.msra.mxu1 %v4004_v42 }
 0x9c8   :  { %5774 = vmatprep.subr.bf16.mxu1 %v6512_v12 }
 0x9cb   :  { %5775 = vmatpush3.bf16.msra.mxu1 %v4005_v43 }
 0x9cc   :  { %5776 = vmatprep.subr.bf16.mxu1 %v6512_v12 }
 0x9cf   :  { %5777 = vmatpush3.bf16.msra.mxu1 %v4006_v44 }
 0x9d0   :  { %5778 = vmatprep.subr.bf16.mxu1 %v6512_v12 }
 0x9d3   :  { %5779 = vmatpush3.bf16.msra.mxu1 %v4007_v45 }
 0x9d4   :  { %4123 = vmatprep.subr.bf16.mxu1 %v4096_v20  ;;  %v4258_v20 = vld [vmem:[#allocation6 + $0x40] sm:$0xff] }
 0xa99   :  { %v3959_v49 = vpop.f32.mrb[20].mxu1 }
 0xa9a   :  { %v3960_v51 = vadd.f32 %v5635_v50, %v3959_v49  ;;  %v5770_v52 = vpop.f32.mrb[21].mxu1 }
 0xa9b   :  { %v3962_v53 = vpop.f32.mrb[22].mxu1 }
 0xa9c   :  { %v3965_v40 = vmax.f32 %v3960_v51, 0.0  ;;  %v5771_v41 = vpop.f32.mrb[23].mxu1 }
 0xa9e   :  { %v3966_v54 = vsel %vm3521_vm1, %v3965_v40, 0.0 }
 0xa9f   :  { %v3967_v55 = vrot.slane %v3966_v54, 4 }
 0xaa1   :  { %v3968_v56 = vadd.f32 %v3967_v55, %v3966_v54 }
 0xaa3   :  { %v3969_v57 = vrot.slane %v3968_v56, 2 }
 0xaa5   :  { %v3970_v58 = vadd.f32 %v3969_v57, %v3968_v56 }
 0xaa7   :  { %v3971_v59 = vrot.slane %v3970_v58, 1 }
 0xaa9   :  { %v3972_v60 = vadd.f32 %v3971_v59, %v3970_v58 }
 0xaab   :  { %v3973_v61 = vmul.f32 0.125, %v3972_v60 }
 0xaad   :  { %v3974_v62 = vsub.f32 %v3965_v40, %v3973_v61 }
 0xaaf   :  { %v3975_v12 = vmul.f32 %v3974_v62, %v3974_v62 }
 0xab1   :  { %v3976_v63 = vsel %vm3521_vm1, %v3975_v12, 0.0  ;;  %v4002_v12 = vld [vmem:[#allocation9 + $0x20] sm:$0x1] }
 0xab2   :  { %v3977_v2 = vrot.slane %v3976_v63, 4 }
 0xab4   :  { %v3978_v3 = vadd.f32 %v3977_v2, %v3976_v63 }
 0xab6   :  { %v3979_v5 = vrot.slane %v3978_v3, 2 }
 0xab8   :  { %v3980_v13 = vadd.f32 %v3979_v5, %v3978_v3  ;;  %v5640_v5 = vld [vmem:[#allocation9 + $0x21] ss:$0 sm:$0xff] }
 0xaba   :  { %v3981_v4 = vrot.slane %v3980_v13, 1 }
 0xabc   :  { %v3982_v6 = vadd.f32 %v3981_v4, %v3980_v13 }
 0xabe   :  { %v3983_v7 = vmul.f32 0.125, %v3982_v6 }
 0xac0   :  { %v3984_v8 = vadd.f32 1e-05, %v3983_v7  ;;  %v4251_v7 = vld [vmem:[#allocation6 + $0x8] sm:$0xff] }
 0xac2   :  { %6334 = vrsqrt.f32 %v3984_v8  ;;  %v4253_v8 = vld [vmem:[#allocation6 + $0x18] sm:$0xff] }
 0xac3   :  { %4378 = vmatprep.subr.bf16.mxu0 %v4253_v8  ;;  %v4308_v8 = vld [vmem:[#allocation6 + $0x1d0] sm:$0xff] }
 0xacc   :  { %v6335_v10 = vpop.eup %6334 }
 0xacd   :  { %v3986_v0 = vmul.f32 %v6335_v10, %v3911_v9  ;;  %v4250_v9 = vld [vmem:[#allocation6] sm:$0xff]  ;;  %v4252_v10 = vld [vmem:[#allocation6 + $0x10] sm:$0xff] }
 0xace   :  { %4379 = vmatpush1.bf16.msra.mxu0 %v4252_v10  ;;  %v4313_v10 = vld [vmem:[#allocation6 + $0x1f8] sm:$0xff] }
 0xacf   :  { %v3991_v11 = vrot.slane %v3986_v0, %v7204_v47  ;;  %v4255_v0 = vld [vmem:[#allocation6 + $0x28] sm:$0xff] }
 0xad1   :  { %v3993_v15 = vmul.f32 %v3991_v11, %v3974_v62  ;;  %v4257_v11 = vld [vmem:[#allocation6 + $0x38] sm:$0xff] }
 0xad2   :  { %4380 = vmatprep.subr.bf16.mxu0 %v4257_v11  ;;  %v4312_v11 = vld [vmem:[#allocation6 + $0x1f0] sm:$0xff] }
 0xad3   :  { %v4000_v17 = vadd.f32 %v5637_v14, %v3993_v15  ;;  %v4254_v14 = vld [vmem:[#allocation6 + $0x20] sm:$0xff]  ;;  %v4256_v15 = vld [vmem:[#allocation6 + $0x30] sm:$0xff] }
 0xad4   :  { %4381 = vmatpush1.bf16.msra.mxu0 %v4256_v15 }
 0xad5   :  { %v4008_v19 = vpack.c.bf16 %v4000_v17, %v4000_v17  ;;  %v4259_v17 = vld [vmem:[#allocation6 + $0x48] sm:$0xff] }
 0xad7   :  { %5781 = vmatmul.mubr.msk.bf16.vlgmr.msra.gmra.mrb[24].mxu1 %vm3521_vm1, %v4008_v19  ;;  %v4261_v19 = vld [vmem:[#allocation6 + $0x58] sm:$0xff] }
 0xad8   :  { %4155 = vmatprep.mubr.bf16.mxu1 %v6510_v38  ;;  %4124 = vmatpush1.bf16.msra.mxu1 %v4095_v1  ;;  %v4106_v38 = vld [vmem:[#allocation5 + $0x58] sm:$0xff]  ;;  %v4260_v1 = vld [vmem:[#allocation6 + $0x50] sm:$0xff] }
 0xad9   :  { %4125 = vmatprep.subr.bf16.mxu1 %v4098_v21  ;;  %4382 = vmatprep.subr.bf16.mxu0 %v4261_v19  ;;  %v4263_v21 = vld [vmem:[#allocation6 + $0x68] sm:$0xff] }
 0xada   :  { %4383 = vmatpush1.bf16.msra.mxu0 %v4260_v1 }
 0xadc   :  { %4126 = vmatpush1.bf16.msra.mxu1 %v4097_v22  ;;  %v4265_v22 = vld [vmem:[#allocation6 + $0x78] sm:$0xff] }
 0xadd   :  { %4127 = vmatprep.subr.bf16.mxu1 %v4100_v23  ;;  %4384 = vmatprep.subr.bf16.mxu0 %v4265_v22  ;;  %v4262_v23 = vld [vmem:[#allocation6 + $0x60] sm:$0xff] }
 0xae0   :  { %4128 = vmatpush1.bf16.msra.mxu1 %v4099_v24  ;;  %v4264_v24 = vld [vmem:[#allocation6 + $0x70] sm:$0xff] }
 0xae1   :  { %4129 = vmatprep.subr.bf16.mxu1 %v4102_v25  ;;  %4385 = vmatpush1.bf16.msra.mxu0 %v4264_v24  ;;  %v4267_v25 = vld [vmem:[#allocation6 + $0x88] sm:$0xff] }
 0xae4   :  { %4130 = vmatpush1.bf16.msra.mxu1 %v4101_v26  ;;  %v4269_v26 = vld [vmem:[#allocation6 + $0x98] sm:$0xff] }
 0xae5   :  { %4131 = vmatprep.subr.bf16.mxu1 %v4104_v27  ;;  %4386 = vmatprep.subr.bf16.mxu0 %v4269_v26  ;;  %v4266_v27 = vld [vmem:[#allocation6 + $0x80] sm:$0xff] }
 0xae8   :  { %4132 = vmatpush1.bf16.msra.mxu1 %v4103_v28  ;;  %v4268_v28 = vld [vmem:[#allocation6 + $0x90] sm:$0xff] }
 0xae9   :  { %4133 = vmatprep.subr.bf16.mxu1 %v4106_v38  ;;  %4387 = vmatpush1.bf16.msra.mxu0 %v4268_v28  ;;  %v4271_v38 = vld [vmem:[#allocation6 + $0xa8] sm:$0xff] }
 0xaec   :  { %4134 = vmatpush1.bf16.msra.mxu1 %v4105_v29  ;;  %v4273_v29 = vld [vmem:[#allocation6 + $0xb8] sm:$0xff] }
 0xaed   :  { %4135 = vmatprep.subr.bf16.mxu1 %v4108_v30  ;;  %4388 = vmatprep.subr.bf16.mxu0 %v4273_v29  ;;  %v4270_v30 = vld [vmem:[#allocation6 + $0xa0] sm:$0xff] }
 0xaf0   :  { %4136 = vmatpush1.bf16.msra.mxu1 %v4107_v31  ;;  %v4272_v31 = vld [vmem:[#allocation6 + $0xb0] sm:$0xff] }
 0xaf1   :  { %4137 = vmatprep.subr.bf16.mxu1 %v4110_v32  ;;  %4389 = vmatpush1.bf16.msra.mxu0 %v4272_v31  ;;  %v4275_v32 = vld [vmem:[#allocation6 + $0xc8] sm:$0xff] }
 0xaf4   :  { %4138 = vmatpush1.bf16.msra.mxu1 %v4109_v34  ;;  %v4277_v34 = vld [vmem:[#allocation6 + $0xd8] sm:$0xff] }
 0xaf5   :  { %4337 = vmatprep.subr.bf16.mxu1 %v4251_v7  ;;  %4390 = vmatprep.subr.bf16.mxu0 %v4277_v34  ;;  %v4306_v7 = vld [vmem:[#allocation6 + $0x1c0] sm:$0xff] }
 0xbaa   :  { %v4052_v36 = vpop.f32.mrb[24].mxu1 }
 0xbab   :  { %v4053_v37 = vadd.f32 %v5638_v35, %v4052_v36  ;;  %v5782_v39 = vpop.f32.mrb[25].mxu1  ;;  %v4274_v35 = vld [vmem:[#allocation6 + $0xc0] sm:$0xff]  ;;  %v4276_v36 = vld [vmem:[#allocation6 + $0xd0] sm:$0xff] }
 0xbac   :  { %v4055_v42 = vpop.f32.mrb[26].mxu1  ;;  %4391 = vmatpush1.bf16.msra.mxu0 %v4276_v36  ;;  %v4281_v39 = vld [vmem:[#allocation6 + $0xf8] sm:$0xff] }
 0xbad   :  { %v4058_v43 = vmax.f32 %v4053_v37, 0.0  ;;  %v5783_v44 = vpop.f32.mrb[27].mxu1  ;;  %v4279_v37 = vld [vmem:[#allocation6 + $0xe8] sm:$0xff]  ;;  %4392 = vmatprep.subr.bf16.mxu0 %v4281_v39  ;;  %v4278_v42 = vld [vmem:[#allocation6 + $0xe0] sm:$0xff] }
 0xbae   :  { %v4283_v44 = vld [vmem:[#allocation6 + $0x108] sm:$0xff] }
 0xbaf   :  { %v4059_v45 = vrot.slane %v4058_v43, 4 }
 0xbb1   :  { %v4060_v50 = vadd.f32 %v4059_v45, %v4058_v43  ;;  %v4285_v45 = vld [vmem:[#allocation6 + $0x118] sm:$0xff] }
 0xbb3   :  { %v4061_v49 = vrot.slane %v4060_v50, 2 }
 0xbb5   :  { %v4062_v51 = vadd.f32 %v4061_v49, %v4060_v50  ;;  %v4282_v50 = vld [vmem:[#allocation6 + $0x100] sm:$0xff]  ;;  %v4284_v49 = vld [vmem:[#allocation6 + $0x110] sm:$0xff] }
 0xbb7   :  { %v4063_v52 = vrot.slane %v4062_v51, 1 }
 0xbb9   :  { %v4064_v53 = vadd.f32 %v4063_v52, %v4062_v51  ;;  %v4287_v51 = vld [vmem:[#allocation6 + $0x128] sm:$0xff]  ;;  %v4289_v52 = vld [vmem:[#allocation6 + $0x138] sm:$0xff] }
 0xbbb   :  { %v4065_v40 = vmul.f32 0.125, %v4064_v53  ;;  %v4286_v53 = vld [vmem:[#allocation6 + $0x120] sm:$0xff] }
 0xbbd   :  { %v4066_v41 = vsub.f32 %v4058_v43, %v4065_v40  ;;  %v4280_v43 = vld [vmem:[#allocation6 + $0xf0] sm:$0xff] }
 0xbbe   :  { %4393 = vmatpush1.bf16.msra.mxu0 %v4280_v43  ;;  %v4288_v40 = vld [vmem:[#allocation6 + $0x130] sm:$0xff] }
 0xbbf   :  { %v4067_v54 = vmul.f32 %v4066_v41, %v4066_v41  ;;  %4394 = vmatprep.subr.bf16.mxu0 %v4285_v45 }
 0xbc1   :  { %v4068_v55 = vrot.slane %v4067_v54, 4 }
 0xbc2   :  { %4395 = vmatpush1.bf16.msra.mxu0 %v4284_v49 }
 0xbc3   :  { %v4069_v56 = vadd.f32 %v4068_v55, %v4067_v54  ;;  %4396 = vmatprep.subr.bf16.mxu0 %v4289_v52  ;;  %v4293_v54 = vld [vmem:[#allocation6 + $0x158] sm:$0xff]  ;;  %v4290_v55 = vld [vmem:[#allocation6 + $0x140] sm:$0xff] }
 0xbc5   :  { %v4070_v57 = vrot.slane %v4069_v56, 2 }
 0xbc6   :  { %4397 = vmatpush1.bf16.msra.mxu0 %v4288_v40 }
 0xbc7   :  { %v4071_v58 = vadd.f32 %v4070_v57, %v4069_v56  ;;  %4398 = vmatprep.subr.bf16.mxu0 %v4293_v54  ;;  %v4292_v56 = vld [vmem:[#allocation6 + $0x150] sm:$0xff]  ;;  %v4295_v57 = vld [vmem:[#allocation6 + $0x168] sm:$0xff] }
 0xbc9   :  { %v4072_v59 = vrot.slane %v4071_v58, 1 }
 0xbca   :  { %4399 = vmatpush1.bf16.msra.mxu0 %v4292_v56 }
 0xbcb   :  { %v4073_v60 = vadd.f32 %v4072_v59, %v4071_v58  ;;  %v4297_v58 = vld [vmem:[#allocation6 + $0x178] sm:$0xff]  ;;  %v4294_v59 = vld [vmem:[#allocation6 + $0x160] sm:$0xff] }
 0xbcc   :  { %4400 = vmatprep.subr.bf16.mxu0 %v4297_v58 }
 0xbcd   :  { %v4074_v61 = vmul.f32 0.125, %v4073_v60  ;;  %v4296_v60 = vld [vmem:[#allocation6 + $0x170] sm:$0xff] }
 0xbce   :  { %4401 = vmatpush1.bf16.msra.mxu0 %v4296_v60 }
 0xbcf   :  { %v4075_v62 = vadd.f32 1e-05, %v4074_v61  ;;  %v4299_v61 = vld [vmem:[#allocation6 + $0x188] sm:$0xff] }
 0xbd1   :  { %6336 = vrsqrt.f32 %v4075_v62  ;;  %v4301_v62 = vld [vmem:[#allocation6 + $0x198] sm:$0xff] }
 0xbd2   :  { %4402 = vmatprep.subr.bf16.mxu0 %v4301_v62 }
 0xbdb   :  { %v6337_v63 = vpop.eup %6336 }
 0xbdc   :  { %v4077_v2 = vmul.f32 %v6337_v63, %v4002_v12  ;;  %v4298_v12 = vld [vmem:[#allocation6 + $0x180] sm:$0xff]  ;;  %v4300_v63 = vld [vmem:[#allocation6 + $0x190] sm:$0xff] }
 0xbdd   :  { %4403 = vmatpush1.bf16.msra.mxu0 %v4300_v63 }
 0xbde   :  { %v4082_v3 = vrot.slane %v4077_v2, %v7204_v47  ;;  %v4303_v2 = vld [vmem:[#allocation6 + $0x1a8] sm:$0xff] }
 0xbe0   :  { %v4084_v13 = vmul.f32 %v4082_v3, %v4066_v41  ;;  %v4291_v41 = vld [vmem:[#allocation6 + $0x148] sm:$0xff]  ;;  %v4305_v3 = vld [vmem:[#allocation6 + $0x1b8] sm:$0xff] }
 0xbe1   :  { %4404 = vmatprep.subr.bf16.mxu0 %v4305_v3 }
 0xbe2   :  { %v4091_v4 = vadd.f32 %v5640_v5, %v4084_v13  ;;  %v4302_v5 = vld [vmem:[#allocation6 + $0x1a0] sm:$0xff]  ;;  %v4304_v13 = vld [vmem:[#allocation6 + $0x1b0] sm:$0xff] }
 0xbe3   :  { %4405 = vmatpush1.bf16.msra.mxu0 %v4304_v13  ;;  %v4093_v13 = vld [vmem:[#allocation9 + $0x24] sm:$0x3] }
 0xbe4   :  { %v4111_v6 = vpack.c.bf16 %v4091_v4, %v4091_v4  ;;  %v4307_v4 = vld [vmem:[#allocation6 + $0x1c8] sm:$0xff] }
 0xbe6   :  { %4156 = vmatmul.mubr.bf16.vlgmr.msra.gmra.mrb[28].mxu1 %v4111_v6  ;;  %v4309_v6 = vld [vmem:[#allocation6 + $0x1d8] sm:$0xff] }
 0xbe7   :  { %4338 = vmatpush1.bf16.msra.mxu1 %v4250_v9  ;;  %4406 = vmatprep.subr.bf16.mxu0 %v4309_v6  ;;  %v4311_v9 = vld [vmem:[#allocation6 + $0x1e8] sm:$0xff]  ;;  %v4094_v6 = vld [vmem:[#allocation9 + $0x26] sm:$0x3] }
 0xbe8   :  { %4339 = vmatprep.subr.bf16.mxu1 %v4255_v0  ;;  %4407 = vmatpush1.bf16.msra.mxu0 %v4308_v8  ;;  %v4310_v0 = vld [vmem:[#allocation6 + $0x1e0] sm:$0xff] }
 0xbe9   :  { %4408 = vmatprep.subr.bf16.mxu0 %v4313_v10  ;;  %v4242_v10 = vrot.slane %v4094_v6, %v7207_v48 }
 0xbeb   :  { %4340 = vmatpush1.bf16.msra.mxu1 %v4254_v14  ;;  %v4092_v14 = vld [vmem:[#allocation9 + $0x22] sm:$0x3] }
 0xbec   :  { %4341 = vmatprep.subr.bf16.mxu1 %v4259_v17  ;;  %4409 = vmatpush1.bf16.msra.mxu0 %v4312_v11  ;;  %v4116_v15 = vrot.slane %v4092_v14, %v7204_v47  ;;  %v4120_v17 = vrot.slane %v4092_v14, %v7207_v48 }
 0xbef   :  { %4342 = vmatpush1.bf16.msra.mxu1 %v4258_v20 }
 0xbf0   :  { %4343 = vmatprep.subr.bf16.mxu1 %v4263_v21 }
 0xbf3   :  { %4344 = vmatpush1.bf16.msra.mxu1 %v4262_v23 }
 0xbf4   :  { %4345 = vmatprep.subr.bf16.mxu1 %v4267_v25 }
 0xbf7   :  { %4346 = vmatpush1.bf16.msra.mxu1 %v4266_v27 }
 0xbf8   :  { %4347 = vmatprep.subr.bf16.mxu1 %v4271_v38 }
 0xbfb   :  { %4348 = vmatpush1.bf16.msra.mxu1 %v4270_v30 }
 0xbfc   :  { %4349 = vmatprep.subr.bf16.mxu1 %v4275_v32 }
 0xbff   :  { %4350 = vmatpush1.bf16.msra.mxu1 %v4274_v35 }
 0xc00   :  { %4351 = vmatprep.subr.bf16.mxu1 %v4279_v37 }
 0xc03   :  { %4352 = vmatpush1.bf16.msra.mxu1 %v4278_v42 }
 0xc04   :  { %4353 = vmatprep.subr.bf16.mxu1 %v4283_v44 }
 0xc07   :  { %4354 = vmatpush1.bf16.msra.mxu1 %v4282_v50 }
 0xc08   :  { %4355 = vmatprep.subr.bf16.mxu1 %v4287_v51 }
 0xc0b   :  { %4356 = vmatpush1.bf16.msra.mxu1 %v4286_v53 }
 0xc0c   :  { %4357 = vmatprep.subr.bf16.mxu1 %v4291_v41 }
 0xc0f   :  { %4358 = vmatpush1.bf16.msra.mxu1 %v4290_v55 }
 0xc10   :  { %4359 = vmatprep.subr.bf16.mxu1 %v4295_v57 }
 0xc13   :  { %4360 = vmatpush1.bf16.msra.mxu1 %v4294_v59 }
 0xc14   :  { %4361 = vmatprep.subr.bf16.mxu1 %v4299_v61 }
 0xc17   :  { %4362 = vmatpush1.bf16.msra.mxu1 %v4298_v12 }
 0xc18   :  { %4363 = vmatprep.subr.bf16.mxu1 %v4303_v2 }
 0xc1b   :  { %4364 = vmatpush1.bf16.msra.mxu1 %v4302_v5 }
 0xc1c   :  { %4365 = vmatprep.subr.bf16.mxu1 %v4307_v4 }
 0xc1f   :  { %4366 = vmatpush1.bf16.msra.mxu1 %v4306_v7 }
 0xc20   :  { %4367 = vmatprep.subr.bf16.mxu1 %v4311_v9  ;;  %v4238_v9 = vrot.slane %v4094_v6, %v7204_v47  ;;  %v4657_v6 = vld [vmem:[#allocation7 + $0x268] sm:$0xff] }
 0xc23   :  { %4368 = vmatpush1.bf16.msra.mxu1 %v4310_v0 }
 0xcb9   :  { %v4157_v19 = vpop.f32.mrb[28].mxu1 }
 0xcba   :  { %v4158_v20 = vadd.f32 %v4157_v19, %v4116_v15  ;;  %v4159_v1 = vpop.f32.mrb[29].mxu1 }
 0xcbb   :  { %v4160_v21 = vadd.f32 %v4159_v1, %v4120_v17  ;;  %v4161_v22 = vpop.f32.mrb[30].mxu1  ;;  %v4581_v1 = vld [vmem:[#allocation7 + $0x8] sm:$0xff] }
 0xcbc   :  { %v4164_v23 = vmax.f32 %v4158_v20, 0.0  ;;  %v4162_v24 = vpop.f32.mrb[31].mxu1  ;;  %4840 = vmatprep.subr.bf16.mxu1 %v4581_v1  ;;  %v4580_v22 = vld [vmem:[#allocation7] sm:$0xff]  ;;  %v4678_v1 = vld [vmem:[#allocation7 + $0x310] sm:$0xff] }
 0xcbd   :  { %v4165_v25 = vmax.f32 %v4160_v21, 0.0  ;;  %v4583_v21 = vld [vmem:[#allocation7 + $0x18] sm:$0xff]  ;;  %v4588_v24 = vld [vmem:[#allocation7 + $0x40] sm:$0xff] }
 0xcbe   :  { %v4166_v26 = vrot.slane %v4164_v23, 4  ;;  %4922 = vmatprep.subr.bf16.mxu0 %v4583_v21  ;;  %v4680_v21 = vld [vmem:[#allocation7 + $0x320] sm:$0xff] }
 0xcbf   :  { %v4172_v27 = vrot.slane %v4165_v25, 4 }
 0xcc0   :  { %v4167_v28 = vadd.f32 %v4166_v26, %v4164_v23  ;;  %v4587_v26 = vld [vmem:[#allocation7 + $0x38] sm:$0xff] }
 0xcc1   :  { %v4173_v38 = vadd.f32 %v4172_v27, %v4165_v25  ;;  %v4589_v27 = vld [vmem:[#allocation7 + $0x48] sm:$0xff] }
 0xcc2   :  { %v4168_v29 = vrot.slane %v4167_v28, 2 }
 0xcc3   :  { %v4174_v30 = vrot.slane %v4173_v38, 2 }
 0xcc4   :  { %v4169_v31 = vadd.f32 %v4168_v29, %v4167_v28  ;;  %v4595_v28 = vld [vmem:[#allocation7 + $0x78] sm:$0xff]  ;;  %v4594_v29 = vld [vmem:[#allocation7 + $0x70] sm:$0xff] }
 0xcc5   :  { %v4175_v32 = vadd.f32 %v4174_v30, %v4173_v38  ;;  %v4597_v38 = vld [vmem:[#allocation7 + $0x88] sm:$0xff]  ;;  %v4596_v30 = vld [vmem:[#allocation7 + $0x80] sm:$0xff] }
 0xcc6   :  { %v4170_v34 = vrot.slane %v4169_v31, 1 }
 0xcc7   :  { %v4176_v35 = vrot.slane %v4175_v32, 1 }
 0xcc8   :  { %v4171_v36 = vadd.f32 %v4170_v34, %v4169_v31  ;;  %v4602_v31 = vld [vmem:[#allocation7 + $0xb0] sm:$0xff]  ;;  %v4601_v34 = vld [vmem:[#allocation7 + $0xa8] sm:$0xff] }
 0xcc9   :  { %v4177_v37 = vadd.f32 %v4176_v35, %v4175_v32  ;;  %v4604_v32 = vld [vmem:[#allocation7 + $0xc0] sm:$0xff]  ;;  %v4603_v35 = vld [vmem:[#allocation7 + $0xb8] sm:$0xff] }
 0xcca   :  { %v4178_v39 = vmul.f32 0.125, %v4171_v36  ;;  %v4609_v36 = vld [vmem:[#allocation7 + $0xe8] sm:$0xff] }
 0xccb   :  { %v4179_v42 = vmul.f32 0.125, %v4177_v37  ;;  %v4611_v37 = vld [vmem:[#allocation7 + $0xf8] sm:$0xff] }
 0xccc   :  { %v4180_v43 = vsub.f32 %v4164_v23, %v4178_v39  ;;  %v4582_v23 = vld [vmem:[#allocation7 + $0x10] sm:$0xff]  ;;  %v4608_v39 = vld [vmem:[#allocation7 + $0xe0] sm:$0xff] }
 0xccd   :  { %v4181_v44 = vsub.f32 %v4165_v25, %v4179_v42  ;;  %v4590_v25 = vld [vmem:[#allocation7 + $0x50] sm:$0xff] }
 0xcce   :  { %v4182_v45 = vmul.f32 %v4180_v43, %v4180_v43  ;;  %v4610_v42 = vld [vmem:[#allocation7 + $0xf0] sm:$0xff] }
 0xccf   :  { %v4183_v50 = vmul.f32 %v4181_v44, %v4181_v44 }
 0xcd0   :  { %v4184_v49 = vrot.slane %v4182_v45, 4 }
 0xcd1   :  { %v4190_v51 = vrot.slane %v4183_v50, 4 }
 0xcd2   :  { %v4185_v52 = vadd.f32 %v4184_v49, %v4182_v45  ;;  %v4615_v45 = vld [vmem:[#allocation7 + $0x118] sm:$0xff] }
 0xcd3   :  { %v4191_v53 = vadd.f32 %v4190_v51, %v4183_v50  ;;  %v4617_v50 = vld [vmem:[#allocation7 + $0x128] sm:$0xff]  ;;  %v4623_v49 = vld [vmem:[#allocation7 + $0x158] sm:$0xff] }
 0xcd4   :  { %v4186_v40 = vrot.slane %v4185_v52, 2  ;;  %v4625_v51 = vld [vmem:[#allocation7 + $0x168] sm:$0xff] }
 0xcd5   :  { %v4192_v41 = vrot.slane %v4191_v53, 2 }
 0xcd6   :  { %v4187_v54 = vadd.f32 %v4186_v40, %v4185_v52  ;;  %v4622_v52 = vld [vmem:[#allocation7 + $0x150] sm:$0xff] }
 0xcd7   :  { %v4193_v55 = vadd.f32 %v4192_v41, %v4191_v53  ;;  %v4624_v53 = vld [vmem:[#allocation7 + $0x160] sm:$0xff]  ;;  %v4630_v40 = vld [vmem:[#allocation7 + $0x190] sm:$0xff] }
 0xcd8   :  { %v4188_v56 = vrot.slane %v4187_v54, 1  ;;  %v4632_v41 = vld [vmem:[#allocation7 + $0x1a0] sm:$0xff] }
 0xcd9   :  { %v4194_v57 = vrot.slane %v4193_v55, 1 }
 0xcda   :  { %v4189_v58 = vadd.f32 %v4188_v56, %v4187_v54  ;;  %v4629_v54 = vld [vmem:[#allocation7 + $0x188] sm:$0xff] }
 0xcdb   :  { %v4195_v59 = vadd.f32 %v4194_v57, %v4193_v55  ;;  %v4631_v55 = vld [vmem:[#allocation7 + $0x198] sm:$0xff]  ;;  %v4637_v56 = vld [vmem:[#allocation7 + $0x1c8] sm:$0xff] }
 0xcdc   :  { %v4196_v60 = vmul.f32 0.125, %v4189_v58  ;;  %v4639_v57 = vld [vmem:[#allocation7 + $0x1d8] sm:$0xff]  ;;  %v4636_v58 = vld [vmem:[#allocation7 + $0x1c0] sm:$0xff] }
 0xcdd   :  { %v4197_v61 = vmul.f32 0.125, %v4195_v59  ;;  %v4638_v59 = vld [vmem:[#allocation7 + $0x1d0] sm:$0xff] }
 0xcde   :  { %v4198_v62 = vadd.f32 1e-05, %v4196_v60  ;;  %v4644_v60 = vld [vmem:[#allocation7 + $0x200] sm:$0xff] }
 0xcdf   :  { %v4199_v12 = vadd.f32 1e-05, %v4197_v61  ;;  %v4646_v61 = vld [vmem:[#allocation7 + $0x210] sm:$0xff] }
 0xce0   :  { %6338 = vrsqrt.f32 %v4198_v62  ;;  %v4643_v62 = vld [vmem:[#allocation7 + $0x1f8] sm:$0xff] }
 0xce1   :  { %6340 = vrsqrt.f32 %v4199_v12  ;;  %v4645_v12 = vld [vmem:[#allocation7 + $0x208] sm:$0xff] }
 0xcea   :  { %v6339_v63 = vpop.eup %6338 }
 0xceb   :  { %v6341_v2 = vpop.eup %6340 }
 0xcec   :  { %v4204_v3 = vcombine.low %v6339_v63, %v6341_v2  ;;  %v4651_v63 = vld [vmem:[#allocation7 + $0x238] sm:$0xff]  ;;  %v4653_v2 = vld [vmem:[#allocation7 + $0x248] sm:$0xff] }
 0xcee   :  { %v4211_v5 = vrot.slane %v4204_v3, %v7228_v33  ;;  %v4650_v3 = vld [vmem:[#allocation7 + $0x230] sm:$0xff] }
 0xcf0   :  { %v4218_v4 = vrot.slane %v4211_v5, %v7228_v33  ;;  %v4652_v5 = vld [vmem:[#allocation7 + $0x240] sm:$0xff] }
 0xcf2   :  { %v4220_v7 = vmul.f32 %v4218_v4, %v4093_v13  ;;  %v4658_v13 = vld [vmem:[#allocation7 + $0x270] sm:$0xff]  ;;  %v4660_v4 = vld [vmem:[#allocation7 + $0x280] sm:$0xff] }
 0xcf4   :  { %v4229_v8 = vrot.slane %v4220_v7, %v7207_v48  ;;  %v4225_v0 = vrot.slane %v4220_v7, %v7204_v47  ;;  %v4659_v7 = vld [vmem:[#allocation7 + $0x278] sm:$0xff] }
 0xcf6   :  { %v4233_v11 = vmul.f32 %v4229_v8, %v4181_v44  ;;  %v4232_v14 = vmul.f32 %v4225_v0, %v4180_v43  ;;  %v4616_v43 = vld [vmem:[#allocation7 + $0x120] sm:$0xff]  ;;  %v4618_v44 = vld [vmem:[#allocation7 + $0x130] sm:$0xff]  ;;  %v4665_v8 = vld [vmem:[#allocation7 + $0x2a8] sm:$0xff] }
 0xcf7   :  { %v4666_v0 = vld [vmem:[#allocation7 + $0x2b0] sm:$0xff] }
 0xcf8   :  { %v4246_v15 = vadd.f32 %v4242_v10, %v4233_v11  ;;  %v4245_v17 = vadd.f32 %v4238_v9, %v4232_v14  ;;  %v4667_v9 = vld [vmem:[#allocation7 + $0x2b8] sm:$0xff]  ;;  %v4664_v10 = vld [vmem:[#allocation7 + $0x2a0] sm:$0xff]  ;;  %v4674_v14 = vld [vmem:[#allocation7 + $0x2f0] sm:$0xff] }
 0xcf9   :  { %v4672_v11 = vld [vmem:[#allocation7 + $0x2e0] sm:$0xff] }
 0xcfa   :  { %v4315_v19 = vpack.c.bf16 %v4246_v15, %v4246_v15  ;;  %v4314_v20 = vpack.c.bf16 %v4245_v17, %v4245_v17  ;;  %v4671_v15 = vld [vmem:[#allocation7 + $0x2d8] sm:$0xff]  ;;  %v4673_v17 = vld [vmem:[#allocation7 + $0x2e8] sm:$0xff] }
 0xcfc   :  { %4369 = vmatprep.mubr.bf16.mxu1 %v4315_v19  ;;  %4410 = vmatprep.mubr.bf16.mxu0 %v4315_v19  ;;  %v4679_v19 = vld [vmem:[#allocation7 + $0x318] sm:$0xff] }
 0xcfd   :  { %4370 = vmatmul.mubr.bf16.vlgmr.msra.gmra.mrb[32].mxu1 %v4314_v20  ;;  %4411 = vmatmul.mubr.bf16.vlgmr.msra.gmra.mrb[12].mxu0 %v4314_v20  ;;  %v4681_v20 = vld [vmem:[#allocation7 + $0x328] sm:$0xff] }
 0xcfe   :  { %4841 = vmatpush1.bf16.msra.mxu1 %v4580_v22  ;;  %4923 = vmatpush1.bf16.msra.mxu0 %v4582_v23  ;;  %v4686_v22 = vld [vmem:[#allocation7 + $0x350] sm:$0xff]  ;;  %v4688_v23 = vld [vmem:[#allocation7 + $0x360] sm:$0xff] }
 0xcff   :  { %4842 = vmatprep.subr.bf16.mxu1 %v4588_v24  ;;  %4924 = vmatprep.subr.bf16.mxu0 %v4590_v25  ;;  %v4685_v24 = vld [vmem:[#allocation7 + $0x348] sm:$0xff]  ;;  %v4687_v25 = vld [vmem:[#allocation7 + $0x358] sm:$0xff] }
 0xd02   :  { %4843 = vmatpush1.bf16.msra.mxu1 %v4587_v26  ;;  %4925 = vmatpush1.bf16.msra.mxu0 %v4589_v27  ;;  %v4693_v26 = vld [vmem:[#allocation7 + $0x388] sm:$0xff]  ;;  %v4695_v27 = vld [vmem:[#allocation7 + $0x398] sm:$0xff] }
 0xd03   :  { %4844 = vmatprep.subr.bf16.mxu1 %v4595_v28  ;;  %4926 = vmatprep.subr.bf16.mxu0 %v4597_v38  ;;  %v4247_v28 = vld [vmem:[#allocation9 + $0x28] sm:$0xf] }
 0xd04   :  { %v4320_v38 = vrot.slane %v4247_v28, %v7204_v47 }
 0xd06   :  { %4845 = vmatpush1.bf16.msra.mxu1 %v4594_v29  ;;  %4927 = vmatpush1.bf16.msra.mxu0 %v4596_v30  ;;  %v4328_v29 = vrot.slane %v4247_v28, %v7220_v16  ;;  %v4324_v30 = vrot.slane %v4247_v28, %v7207_v48 }
 0xd07   :  { %4846 = vmatprep.subr.bf16.mxu1 %v4602_v31  ;;  %4928 = vmatprep.subr.bf16.mxu0 %v4604_v32  ;;  %v4332_v31 = vrot.slane %v4247_v28, %v7223_v18 }
 0xd0a   :  { %4847 = vmatpush1.bf16.msra.mxu1 %v4601_v34  ;;  %4929 = vmatpush1.bf16.msra.mxu0 %v4603_v35 }
 0xd0b   :  { %4848 = vmatprep.subr.bf16.mxu1 %v4609_v36  ;;  %4930 = vmatprep.subr.bf16.mxu0 %v4611_v37 }
 0xd0e   :  { %4849 = vmatpush1.bf16.msra.mxu1 %v4608_v39  ;;  %4931 = vmatpush1.bf16.msra.mxu0 %v4610_v42 }
 0xd0f   :  { %4850 = vmatprep.subr.bf16.mxu1 %v4616_v43  ;;  %4932 = vmatprep.subr.bf16.mxu0 %v4618_v44 }
 0xd12   :  { %4851 = vmatpush1.bf16.msra.mxu1 %v4615_v45  ;;  %4933 = vmatpush1.bf16.msra.mxu0 %v4617_v50 }
 0xd13   :  { %4852 = vmatprep.subr.bf16.mxu1 %v4623_v49  ;;  %4934 = vmatprep.subr.bf16.mxu0 %v4625_v51 }
 0xd16   :  { %4853 = vmatpush1.bf16.msra.mxu1 %v4622_v52  ;;  %4935 = vmatpush1.bf16.msra.mxu0 %v4624_v53 }
 0xd17   :  { %4854 = vmatprep.subr.bf16.mxu1 %v4630_v40  ;;  %4936 = vmatprep.subr.bf16.mxu0 %v4632_v41 }
 0xd1a   :  { %4855 = vmatpush1.bf16.msra.mxu1 %v4629_v54  ;;  %4937 = vmatpush1.bf16.msra.mxu0 %v4631_v55 }
 0xd1b   :  { %4856 = vmatprep.subr.bf16.mxu1 %v4637_v56  ;;  %4938 = vmatprep.subr.bf16.mxu0 %v4639_v57 }
 0xd1e   :  { %4857 = vmatpush1.bf16.msra.mxu1 %v4636_v58  ;;  %4939 = vmatpush1.bf16.msra.mxu0 %v4638_v59 }
 0xd1f   :  { %4858 = vmatprep.subr.bf16.mxu1 %v4644_v60  ;;  %4940 = vmatprep.subr.bf16.mxu0 %v4646_v61 }
 0xd22   :  { %4859 = vmatpush1.bf16.msra.mxu1 %v4643_v62  ;;  %4941 = vmatpush1.bf16.msra.mxu0 %v4645_v12 }
 0xd23   :  { %4860 = vmatprep.subr.bf16.mxu1 %v4651_v63  ;;  %4942 = vmatprep.subr.bf16.mxu0 %v4653_v2 }
 0xd26   :  { %4861 = vmatpush1.bf16.msra.mxu1 %v4650_v3  ;;  %4943 = vmatpush1.bf16.msra.mxu0 %v4652_v5 }
 0xd27   :  { %4862 = vmatprep.subr.bf16.mxu1 %v4658_v13  ;;  %4944 = vmatprep.subr.bf16.mxu0 %v4660_v4 }
 0xd2a   :  { %4863 = vmatpush1.bf16.msra.mxu1 %v4657_v6  ;;  %4945 = vmatpush1.bf16.msra.mxu0 %v4659_v7 }
 0xd2b   :  { %4864 = vmatprep.subr.bf16.mxu1 %v4665_v8  ;;  %4946 = vmatprep.subr.bf16.mxu0 %v4667_v9 }
 0xd2e   :  { %4865 = vmatpush1.bf16.msra.mxu1 %v4664_v10  ;;  %4947 = vmatpush1.bf16.msra.mxu0 %v4666_v0 }
 0xd2f   :  { %4866 = vmatprep.subr.bf16.mxu1 %v4672_v11  ;;  %4948 = vmatprep.subr.bf16.mxu0 %v4674_v14 }
 0xd32   :  { %4867 = vmatpush1.bf16.msra.mxu1 %v4671_v15  ;;  %4949 = vmatpush1.bf16.msra.mxu0 %v4673_v17 }
 0xd33   :  { %4868 = vmatprep.subr.bf16.mxu1 %v4679_v19  ;;  %4950 = vmatprep.subr.bf16.mxu0 %v4681_v20 }
 0xd36   :  { %4869 = vmatpush1.bf16.msra.mxu1 %v4678_v1  ;;  %4951 = vmatpush1.bf16.msra.mxu0 %v4680_v21 }
 0xd37   :  { %4870 = vmatprep.subr.bf16.mxu1 %v4686_v22  ;;  %4952 = vmatprep.subr.bf16.mxu0 %v4688_v23 }
 0xd3a   :  { %4871 = vmatpush1.bf16.msra.mxu1 %v4685_v24  ;;  %4953 = vmatpush1.bf16.msra.mxu0 %v4687_v25 }
 0xd3b   :  { %4881 = vmatprep.subr.bf16.mxu1 %v4693_v26  ;;  %4963 = vmatprep.subr.bf16.mxu0 %v4695_v27 }
 0xdd0   :  { %v4371_v32 = vpop.f32.mrb[32].mxu1  ;;  %v4412_v34 = vpop.f32.mrb[12].mxu0 }
 0xdd1   :  { %v4372_v35 = vadd.f32 %v4371_v32, %v4320_v38  ;;  %v4413_v36 = vadd.f32 %v4412_v34, %v4328_v29  ;;  %v4373_v37 = vpop.f32.mrb[33].mxu1  ;;  %v4414_v39 = vpop.f32.mrb[13].mxu0 }
 0xdd2   :  { %v4374_v42 = vadd.f32 %v4373_v37, %v4324_v30  ;;  %v4415_v43 = vadd.f32 %v4414_v39, %v4332_v31  ;;  %v4375_v44 = vpop.f32.mrb[34].mxu1  ;;  %v4416_v45 = vpop.f32.mrb[14].mxu0 }
 0xdd3   :  { %v4419_v50 = vmax.f32 %v4372_v35, 0.0  ;;  %v4421_v49 = vmax.f32 %v4413_v36, 0.0  ;;  %v4376_v51 = vpop.f32.mrb[35].mxu1  ;;  %v4417_v52 = vpop.f32.mrb[15].mxu0 }
 0xdd4   :  { %v4420_v53 = vmax.f32 %v4374_v42, 0.0  ;;  %v4422_v40 = vmax.f32 %v4415_v43, 0.0 }
 0xdd5   :  { %v4423_v41 = vrot.slane %v4419_v50, 4  ;;  %v4435_v54 = vrot.slane %v4421_v49, 4 }
 0xdd6   :  { %v4429_v55 = vrot.slane %v4420_v53, 4  ;;  %v4441_v56 = vrot.slane %v4422_v40, 4 }
 0xdd7   :  { %v4424_v57 = vadd.f32 %v4423_v41, %v4419_v50  ;;  %v4436_v58 = vadd.f32 %v4435_v54, %v4421_v49 }
 0xdd8   :  { %v4430_v59 = vadd.f32 %v4429_v55, %v4420_v53  ;;  %v4442_v60 = vadd.f32 %v4441_v56, %v4422_v40 }
 0xdd9   :  { %v4425_v61 = vrot.slane %v4424_v57, 2  ;;  %v4437_v62 = vrot.slane %v4436_v58, 2 }
 0xdda   :  { %v4431_v12 = vrot.slane %v4430_v59, 2  ;;  %v4443_v63 = vrot.slane %v4442_v60, 2 }
 0xddb   :  { %v4426_v2 = vadd.f32 %v4425_v61, %v4424_v57  ;;  %v4438_v3 = vadd.f32 %v4437_v62, %v4436_v58 }
 0xddc   :  { %v4432_v5 = vadd.f32 %v4431_v12, %v4430_v59  ;;  %v4444_v13 = vadd.f32 %v4443_v63, %v4442_v60 }
 0xddd   :  { %v4427_v4 = vrot.slane %v4426_v2, 1  ;;  %v4439_v6 = vrot.slane %v4438_v3, 1 }
 0xdde   :  { %v4433_v7 = vrot.slane %v4432_v5, 1  ;;  %v4445_v8 = vrot.slane %v4444_v13, 1 }
 0xddf   :  { %v4428_v9 = vadd.f32 %v4427_v4, %v4426_v2  ;;  %v4440_v10 = vadd.f32 %v4439_v6, %v4438_v3 }
 0xde0   :  { %v4434_v0 = vadd.f32 %v4433_v7, %v4432_v5  ;;  %v4446_v11 = vadd.f32 %v4445_v8, %v4444_v13  ;;  %v4248_v8 = vld [vmem:[#allocation9 + $0x2c] sm:$0xf] }
 0xde1   :  { %v4447_v14 = vmul.f32 0.125, %v4428_v9  ;;  %v4449_v15 = vmul.f32 0.125, %v4440_v10  ;;  %v4249_v10 = vld [vmem:[#allocation9 + $0x30] sm:$0xf] }
 0xde2   :  { %v4448_v17 = vmul.f32 0.125, %v4434_v0  ;;  %v4450_v19 = vmul.f32 0.125, %v4446_v11  ;;  %v4558_v11 = vrot.slane %v4249_v10, %v7207_v48 }
 0xde3   :  { %v7474_v20 = vsub.f32 %v4419_v50, %v4447_v14  ;;  %v7476_v1 = vsub.f32 %v4421_v49, %v4449_v15  ;;  %v4554_v14 = vrot.slane %v4249_v10, %v7204_v47  ;;  %v4562_v15 = vrot.slane %v4249_v10, %v7220_v16 }
 0xde4   :  { %v7478_v21 = vsub.f32 %v4420_v53, %v4448_v17  ;;  %v4454_v22 = vsub.f32 %v4422_v40, %v4450_v19 }
 0xde5   :  { %v4455_v23 = vmul.f32 %v7474_v20, %v7474_v20  ;;  %v4457_v24 = vmul.f32 %v7476_v1, %v7476_v1 }
 0xde6   :  { %v4456_v25 = vmul.f32 %v7478_v21, %v7478_v21  ;;  %v4458_v26 = vmul.f32 %v4454_v22, %v4454_v22 }
 0xde7   :  { %v4459_v27 = vrot.slane %v4455_v23, 4  ;;  %v4471_v28 = vrot.slane %v4457_v24, 4 }
 0xde8   :  { %v4465_v38 = vrot.slane %v4456_v25, 4  ;;  %v4477_v29 = vrot.slane %v4458_v26, 4 }
 0xde9   :  { %v4460_v30 = vadd.f32 %v4459_v27, %v4455_v23  ;;  %v4472_v31 = vadd.f32 %v4471_v28, %v4457_v24 }
 0xdea   :  { %v4466_v32 = vadd.f32 %v4465_v38, %v4456_v25  ;;  %v4478_v34 = vadd.f32 %v4477_v29, %v4458_v26  ;;  %v4566_v25 = vrot.slane %v4249_v10, %v7223_v18  ;;  %v4763_v10 = vld [vmem:[#allocation7 + $0x5b8] sm:$0xff] }
 0xdeb   :  { %v4461_v35 = vrot.slane %v4460_v30, 2  ;;  %v4473_v36 = vrot.slane %v4472_v31, 2 }
 0xdec   :  { %v4467_v37 = vrot.slane %v4466_v32, 2  ;;  %v4479_v39 = vrot.slane %v4478_v34, 2 }
 0xded   :  { %v4462_v42 = vadd.f32 %v4461_v35, %v4460_v30  ;;  %v4474_v43 = vadd.f32 %v4473_v36, %v4472_v31  ;;  %v4692_v35 = vld [vmem:[#allocation7 + $0x380] sm:$0xff]  ;;  %v4694_v36 = vld [vmem:[#allocation7 + $0x390] sm:$0xff] }
 0xdee   :  { %v4468_v44 = vadd.f32 %v4467_v37, %v4466_v32  ;;  %v4480_v45 = vadd.f32 %v4479_v39, %v4478_v34  ;;  %v4701_v37 = vld [vmem:[#allocation7 + $0x3c8] sm:$0xff]  ;;  %v4707_v39 = vld [vmem:[#allocation7 + $0x3f8] sm:$0xff] }
 0xdef   :  { %v4463_v50 = vrot.slane %v4462_v42, 1  ;;  %v4475_v49 = vrot.slane %v4474_v43, 1 }
 0xdf0   :  { %v4469_v51 = vrot.slane %v4468_v44, 1  ;;  %v4481_v52 = vrot.slane %v4480_v45, 1 }
 0xdf1   :  { %v4464_v53 = vadd.f32 %v4463_v50, %v4462_v42  ;;  %v4476_v40 = vadd.f32 %v4475_v49, %v4474_v43  ;;  %v4709_v42 = vld [vmem:[#allocation7 + $0x408] sm:$0xff]  ;;  %v4706_v43 = vld [vmem:[#allocation7 + $0x3f0] sm:$0xff]  ;;  %v4716_v50 = vld [vmem:[#allocation7 + $0x440] sm:$0xff] }
 0xdf2   :  { %v4470_v41 = vadd.f32 %v4469_v51, %v4468_v44  ;;  %v4482_v54 = vadd.f32 %v4481_v52, %v4480_v45  ;;  %v4708_v44 = vld [vmem:[#allocation7 + $0x400] sm:$0xff]  ;;  %v4714_v45 = vld [vmem:[#allocation7 + $0x430] sm:$0xff]  ;;  %v4713_v49 = vld [vmem:[#allocation7 + $0x428] sm:$0xff] }
 0xdf3   :  { %v4483_v55 = vmul.f32 0.125, %v4464_v53  ;;  %v4485_v56 = vmul.f32 0.125, %v4476_v40  ;;  %v4715_v51 = vld [vmem:[#allocation7 + $0x438] sm:$0xff]  ;;  %v4721_v52 = vld [vmem:[#allocation7 + $0x468] sm:$0xff]  ;;  %v4720_v40 = vld [vmem:[#allocation7 + $0x460] sm:$0xff] }
 0xdf4   :  { %v4484_v57 = vmul.f32 0.125, %v4470_v41  ;;  %v4486_v58 = vmul.f32 0.125, %v4482_v54  ;;  %v4723_v53 = vld [vmem:[#allocation7 + $0x478] sm:$0xff]  ;;  %v4722_v41 = vld [vmem:[#allocation7 + $0x470] sm:$0xff]  ;;  %v4728_v54 = vld [vmem:[#allocation7 + $0x4a0] sm:$0xff] }
 0xdf5   :  { %v4487_v59 = vadd.f32 1e-05, %v4483_v55  ;;  %v4489_v60 = vadd.f32 1e-05, %v4485_v56  ;;  %v4730_v55 = vld [vmem:[#allocation7 + $0x4b0] sm:$0xff]  ;;  %v4727_v56 = vld [vmem:[#allocation7 + $0x498] sm:$0xff] }
 0xdf6   :  { %v4488_v61 = vadd.f32 1e-05, %v4484_v57  ;;  %v4490_v62 = vadd.f32 1e-05, %v4486_v58  ;;  %v4729_v57 = vld [vmem:[#allocation7 + $0x4a8] sm:$0xff]  ;;  %v4735_v58 = vld [vmem:[#allocation7 + $0x4d8] sm:$0xff] }
 0xdf7   :  { %6342 = vrsqrt.f32 %v4487_v59  ;;  %v4737_v59 = vld [vmem:[#allocation7 + $0x4e8] sm:$0xff] }
 0xdf8   :  { %6344 = vrsqrt.f32 %v4489_v60  ;;  %v4734_v60 = vld [vmem:[#allocation7 + $0x4d0] sm:$0xff] }
 0xdf9   :  { %6346 = vrsqrt.f32 %v4488_v61  ;;  %v4736_v61 = vld [vmem:[#allocation7 + $0x4e0] sm:$0xff] }
 0xdfa   :  { %6348 = vrsqrt.f32 %v4490_v62  ;;  %v4742_v62 = vld [vmem:[#allocation7 + $0x510] sm:$0xff] }
 0xe01   :  { %v6343_v12 = vpop.eup %6342 }
 0xe02   :  { %v6345_v63 = vpop.eup %6344 }
 0xe03   :  { %v6347_v2 = vpop.eup %6346 }
 0xe04   :  { %v6349_v3 = vpop.eup %6348  ;;  %v4499_v5 = vcombine.low %v6343_v12, %v6347_v2  ;;  %v4744_v12 = vld [vmem:[#allocation7 + $0x520] sm:$0xff]  ;;  %v4743_v2 = vld [vmem:[#allocation7 + $0x518] sm:$0xff] }
 0xe05   :  { %v4500_v13 = vcombine.low %v6345_v63, %v6349_v3  ;;  %v4741_v63 = vld [vmem:[#allocation7 + $0x508] sm:$0xff] }
 0xe06   :  { %v4507_v4 = vrot.slane %v4499_v5, %v7228_v33  ;;  %v4749_v3 = vld [vmem:[#allocation7 + $0x548] sm:$0xff]  ;;  %v4751_v5 = vld [vmem:[#allocation7 + $0x558] sm:$0xff] }
 0xe07   :  { %v4514_v6 = vrot.slane %v4500_v13, %v7228_v33  ;;  %v4748_v13 = vld [vmem:[#allocation7 + $0x540] sm:$0xff] }
 0xe09   :  { %v4515_v7 = vcombine.low %v4507_v4, %v4514_v6  ;;  %v4750_v4 = vld [vmem:[#allocation7 + $0x550] sm:$0xff]  ;;  %v4756_v6 = vld [vmem:[#allocation7 + $0x580] sm:$0xff] }
 0xe0b   :  { %v4522_v9 = vrot.slane %v4515_v7, %v7228_v33  ;;  %v4758_v7 = vld [vmem:[#allocation7 + $0x590] sm:$0xff] }
 0xe0d   :  { %v4524_v0 = vmul.f32 %v4522_v9, %v4248_v8  ;;  %v4755_v8 = vld [vmem:[#allocation7 + $0x578] sm:$0xff]  ;;  %v4757_v9 = vld [vmem:[#allocation7 + $0x588] sm:$0xff] }
 0xe0f   :  { %v4541_v17 = vrot.slane %v4524_v0, %v7223_v18  ;;  %v4533_v19 = vrot.slane %v4524_v0, %v7207_v48  ;;  %v4529_v23 = vrot.slane %v4524_v0, %v7204_v47  ;;  %v4537_v24 = vrot.slane %v4524_v0, %v7220_v16  ;;  %v4765_v0 = vld [vmem:[#allocation7 + $0x5c8] sm:$0xff] }
 0xe11   :  { %v4549_v26 = vmul.f32 %v4541_v17, %v4454_v22  ;;  %v4547_v33 = vmul.f32 %v4533_v19, %v7478_v21  ;;  %v4546_v27 = vmul.f32 %v4529_v23, %v7474_v20  ;;  %v4548_v28 = vmul.f32 %v4537_v24, %v7476_v1  ;;  %v4700_v1 = vld [vmem:[#allocation7 + $0x3c0] sm:$0xff]  ;;  %v4702_v21 = vld [vmem:[#allocation7 + $0x3d0] sm:$0xff]  ;;  %v4699_v22 = vld [vmem:[#allocation7 + $0x3b8] sm:$0xff] }
 0xe12   :  { %v4772_v17 = vld [vmem:[#allocation7 + $0x600] sm:$0xff]  ;;  %v4769_v19 = vld [vmem:[#allocation7 + $0x5e8] sm:$0xff]  ;;  %v4771_v23 = vld [vmem:[#allocation7 + $0x5f8] sm:$0xff] }
 0xe13   :  { %v4572_v38 = vadd.f32 %v4558_v11, %v4547_v33  ;;  %v4571_v29 = vadd.f32 %v4554_v14, %v4546_v27  ;;  %v7500_v30 = vadd.f32 %v4562_v15, %v4548_v28  ;;  %v4574_v31 = vadd.f32 %v4566_v25, %v4549_v26  ;;  %v4762_v11 = vld [vmem:[#allocation7 + $0x5b0] sm:$0xff]  ;;  %v4764_v14 = vld [vmem:[#allocation7 + $0x5c0] sm:$0xff]  ;;  %v4777_v24 = vld [vmem:[#allocation7 + $0x628] sm:$0xff] }
 0xe14   :  { %v4770_v15 = vld [vmem:[#allocation7 + $0x5f0] sm:$0xff]  ;;  %v4779_v25 = vld [vmem:[#allocation7 + $0x638] sm:$0xff]  ;;  %v4776_v26 = vld [vmem:[#allocation7 + $0x620] sm:$0xff] }
 0xe15   :  { %v7502_v32 = vpack.c.bf16 %v4572_v38, %v4572_v38  ;;  %v7504_v34 = vpack.c.bf16 %v4571_v29, %v4571_v29  ;;  %v7510_v20 = vpack.c.bf16 %v4574_v31, %v4574_v31  ;;  %v4778_v33 = vld [vmem:[#allocation7 + $0x630] sm:$0xff]  ;;  %v4784_v27 = vld [vmem:[#allocation7 + $0x660] sm:$0xff]  ;;  %v4783_v38 = vld [vmem:[#allocation7 + $0x658] sm:$0xff] }
 0xe16   :  { %v4786_v28 = vld [vmem:[#allocation7 + $0x670] sm:$0xff]  ;;  %v4785_v29 = vld [vmem:[#allocation7 + $0x668] sm:$0xff]  ;;  %v4791_v31 = vld [vmem:[#allocation7 + $0x698] sm:$0xff] }
 0xe17   :  { %4872 = vmatprep.mubr.bf16.mxu1 %v7502_v32  ;;  %4954 = vmatprep.mubr.bf16.mxu0 %v7502_v32 }
 0xe18   :  { %4873 = vmatmul.mubr.bf16.vlgmr.msra.gmra.mrb[36].mxu1 %v7504_v34  ;;  %4955 = vmatmul.mubr.bf16.vlgmr.msra.gmra.mrb[16].mxu0 %v7504_v34 }
 0xe19   :  { %4882 = vmatpush1.bf16.msra.mxu1 %v4692_v35  ;;  %4964 = vmatpush1.bf16.msra.mxu0 %v4694_v36  ;;  %v4793_v35 = vld [vmem:[#allocation7 + $0x6a8] sm:$0xff]  ;;  %v4790_v36 = vld [vmem:[#allocation7 + $0x690] sm:$0xff] }
 0xe1a   :  { %4913 = vmatprep.mubr.bf16.mxu1 %v7510_v20  ;;  %4995 = vmatprep.mubr.bf16.mxu0 %v7510_v20 }
 0xe1b   :  { %4883 = vmatprep.subr.bf16.mxu1 %v4700_v1  ;;  %4965 = vmatprep.subr.bf16.mxu0 %v4702_v21  ;;  %v4792_v1 = vld [vmem:[#allocation7 + $0x6a0] sm:$0xff]  ;;  %v4798_v21 = vld [vmem:[#allocation7 + $0x6d0] sm:$0xff] }
 0xe1d   :  { %4884 = vmatpush1.bf16.msra.mxu1 %v4699_v22  ;;  %4966 = vmatpush1.bf16.msra.mxu0 %v4701_v37  ;;  %v4800_v22 = vld [vmem:[#allocation7 + $0x6e0] sm:$0xff]  ;;  %v4797_v37 = vld [vmem:[#allocation7 + $0x6c8] sm:$0xff] }
 0xe1e   :  { %4885 = vmatprep.subr.bf16.mxu1 %v4707_v39  ;;  %4967 = vmatprep.subr.bf16.mxu0 %v4709_v42  ;;  %v4799_v39 = vld [vmem:[#allocation7 + $0x6d8] sm:$0xff]  ;;  %v4585_v42 = vld [vmem:[#allocation7 + $0x28] sm:$0xff] }
 0xe21   :  { %4886 = vmatpush1.bf16.msra.mxu1 %v4706_v43  ;;  %4968 = vmatpush1.bf16.msra.mxu0 %v4708_v44  ;;  %v4642_v43 = vld [vmem:[#allocation7 + $0x1f0] sm:$0xff]  ;;  %v7516_v44 = vpack.c.bf16 %v7500_v30, %v7500_v30  ;;  %v4593_v30 = vld [vmem:[#allocation7 + $0x68] sm:$0xff] }
 0xe22   :  { %4887 = vmatprep.subr.bf16.mxu1 %v4714_v45  ;;  %4969 = vmatprep.subr.bf16.mxu0 %v4716_v50  ;;  %v4584_v45 = vld [vmem:[#allocation7 + $0x20] sm:$0xff]  ;;  %v4586_v50 = vld [vmem:[#allocation7 + $0x30] sm:$0xff] }
 0xe25   :  { %4888 = vmatpush1.bf16.msra.mxu1 %v4713_v49  ;;  %4970 = vmatpush1.bf16.msra.mxu0 %v4715_v51  ;;  %v4592_v49 = vld [vmem:[#allocation7 + $0x60] sm:$0xff]  ;;  %v4649_v51 = vld [vmem:[#allocation7 + $0x228] sm:$0xff] }
 0xe26   :  { %4889 = vmatprep.subr.bf16.mxu1 %v4721_v52  ;;  %4971 = vmatprep.subr.bf16.mxu0 %v4723_v53  ;;  %v4591_v52 = vld [vmem:[#allocation7 + $0x58] sm:$0xff] }
 0xe27   :  { %v4599_v53 = vld [vmem:[#allocation7 + $0x98] sm:$0xff] }
 0xe29   :  { %4890 = vmatpush1.bf16.msra.mxu1 %v4720_v40  ;;  %4972 = vmatpush1.bf16.msra.mxu0 %v4722_v41  ;;  %v4656_v40 = vld [vmem:[#allocation7 + $0x260] sm:$0xff]  ;;  %v4598_v41 = vld [vmem:[#allocation7 + $0x90] sm:$0xff] }
 0xe2a   :  { %4891 = vmatprep.subr.bf16.mxu1 %v4728_v54  ;;  %4973 = vmatprep.subr.bf16.mxu0 %v4730_v55  ;;  %v4600_v54 = vld [vmem:[#allocation7 + $0xa0] sm:$0xff]  ;;  %v4606_v55 = vld [vmem:[#allocation7 + $0xd0] sm:$0xff] }
 0xe2d   :  { %4892 = vmatpush1.bf16.msra.mxu1 %v4727_v56  ;;  %4974 = vmatpush1.bf16.msra.mxu0 %v4729_v57  ;;  %v4663_v56 = vld [vmem:[#allocation7 + $0x298] sm:$0xff]  ;;  %v4605_v57 = vld [vmem:[#allocation7 + $0xc8] sm:$0xff] }
 0xe2e   :  { %4893 = vmatprep.subr.bf16.mxu1 %v4735_v58  ;;  %4975 = vmatprep.subr.bf16.mxu0 %v4737_v59  ;;  %v4613_v58 = vld [vmem:[#allocation7 + $0x108] sm:$0xff]  ;;  %v4670_v59 = vld [vmem:[#allocation7 + $0x2d0] sm:$0xff] }
 0xe31   :  { %4894 = vmatpush1.bf16.msra.mxu1 %v4734_v60  ;;  %4976 = vmatpush1.bf16.msra.mxu0 %v4736_v61  ;;  %v4612_v60 = vld [vmem:[#allocation7 + $0x100] sm:$0xff]  ;;  %v4614_v61 = vld [vmem:[#allocation7 + $0x110] sm:$0xff] }
 0xe32   :  { %4895 = vmatprep.subr.bf16.mxu1 %v4742_v62  ;;  %4977 = vmatprep.subr.bf16.mxu0 %v4744_v12  ;;  %v4620_v62 = vld [vmem:[#allocation7 + $0x140] sm:$0xff]  ;;  %v4677_v12 = vld [vmem:[#allocation7 + $0x308] sm:$0xff] }
 0xe35   :  { %4896 = vmatpush1.bf16.msra.mxu1 %v4741_v63  ;;  %4978 = vmatpush1.bf16.msra.mxu0 %v4743_v2  ;;  %v4619_v63 = vld [vmem:[#allocation7 + $0x138] sm:$0xff]  ;;  %v4621_v2 = vld [vmem:[#allocation7 + $0x148] sm:$0xff] }
 0xe36   :  { %4897 = vmatprep.subr.bf16.mxu1 %v4749_v3  ;;  %4979 = vmatprep.subr.bf16.mxu0 %v4751_v5  ;;  %v4627_v3 = vld [vmem:[#allocation7 + $0x178] sm:$0xff]  ;;  %v4684_v5 = vld [vmem:[#allocation7 + $0x340] sm:$0xff] }
 0xe39   :  { %4898 = vmatpush1.bf16.msra.mxu1 %v4748_v13  ;;  %4980 = vmatpush1.bf16.msra.mxu0 %v4750_v4  ;;  %v4626_v13 = vld [vmem:[#allocation7 + $0x170] sm:$0xff]  ;;  %v4628_v4 = vld [vmem:[#allocation7 + $0x180] sm:$0xff] }
 0xe3a   :  { %4899 = vmatprep.subr.bf16.mxu1 %v4756_v6  ;;  %4981 = vmatprep.subr.bf16.mxu0 %v4758_v7  ;;  %v4634_v6 = vld [vmem:[#allocation7 + $0x1b0] sm:$0xff]  ;;  %v4691_v7 = vld [vmem:[#allocation7 + $0x378] sm:$0xff] }
 0xe3d   :  { %4900 = vmatpush1.bf16.msra.mxu1 %v4755_v8  ;;  %4982 = vmatpush1.bf16.msra.mxu0 %v4757_v9  ;;  %v4633_v8 = vld [vmem:[#allocation7 + $0x1a8] sm:$0xff]  ;;  %v4635_v9 = vld [vmem:[#allocation7 + $0x1b8] sm:$0xff] }
 0xe3e   :  { %4901 = vmatprep.subr.bf16.mxu1 %v4763_v10  ;;  %4983 = vmatprep.subr.bf16.mxu0 %v4765_v0  ;;  %v4641_v10 = vld [vmem:[#allocation7 + $0x1e8] sm:$0xff]  ;;  %v4754_v0 = vld [vmem:[#allocation7 + $0x570] sm:$0xff] }
 0xe41   :  { %4902 = vmatpush1.bf16.msra.mxu1 %v4762_v11  ;;  %4984 = vmatpush1.bf16.msra.mxu0 %v4764_v14  ;;  %v4640_v11 = vld [vmem:[#allocation7 + $0x1e0] sm:$0xff]  ;;  %v4698_v14 = vld [vmem:[#allocation7 + $0x3b0] sm:$0xff] }
 0xe42   :  { %4903 = vmatprep.subr.bf16.mxu1 %v4770_v15  ;;  %4985 = vmatprep.subr.bf16.mxu0 %v4772_v17  ;;  %v4648_v15 = vld [vmem:[#allocation7 + $0x220] sm:$0xff]  ;;  %v4761_v17 = vld [vmem:[#allocation7 + $0x5a8] sm:$0xff] }
 0xe45   :  { %4904 = vmatpush1.bf16.msra.mxu1 %v4769_v19  ;;  %4986 = vmatpush1.bf16.msra.mxu0 %v4771_v23  ;;  %v4647_v19 = vld [vmem:[#allocation7 + $0x218] sm:$0xff]  ;;  %v4705_v23 = vld [vmem:[#allocation7 + $0x3e8] sm:$0xff] }
 0xe46   :  { %4905 = vmatprep.subr.bf16.mxu1 %v4777_v24  ;;  %4987 = vmatprep.subr.bf16.mxu0 %v4779_v25  ;;  %v4655_v24 = vld [vmem:[#allocation7 + $0x258] sm:$0xff]  ;;  %v4768_v25 = vld [vmem:[#allocation7 + $0x5e0] sm:$0xff] }
 0xe49   :  { %4906 = vmatpush1.bf16.msra.mxu1 %v4776_v26  ;;  %4988 = vmatpush1.bf16.msra.mxu0 %v4778_v33  ;;  %v4654_v26 = vld [vmem:[#allocation7 + $0x250] sm:$0xff]  ;;  %v4712_v33 = vld [vmem:[#allocation7 + $0x420] sm:$0xff] }
 0xe4a   :  { %4907 = vmatprep.subr.bf16.mxu1 %v4784_v27  ;;  %4989 = vmatprep.subr.bf16.mxu0 %v4786_v28  ;;  %v4662_v27 = vld [vmem:[#allocation7 + $0x290] sm:$0xff]  ;;  %v4775_v28 = vld [vmem:[#allocation7 + $0x618] sm:$0xff] }
 0xe4d   :  { %4908 = vmatpush1.bf16.msra.mxu1 %v4783_v38  ;;  %4990 = vmatpush1.bf16.msra.mxu0 %v4785_v29  ;;  %v4661_v38 = vld [vmem:[#allocation7 + $0x288] sm:$0xff]  ;;  %v4719_v29 = vld [vmem:[#allocation7 + $0x458] sm:$0xff] }
 0xe4e   :  { %4909 = vmatprep.subr.bf16.mxu1 %v4791_v31  ;;  %4991 = vmatprep.subr.bf16.mxu0 %v4793_v35  ;;  %v4669_v31 = vld [vmem:[#allocation7 + $0x2c8] sm:$0xff]  ;;  %v4782_v35 = vld [vmem:[#allocation7 + $0x650] sm:$0xff] }
 0xe51   :  { %4910 = vmatpush1.bf16.msra.mxu1 %v4790_v36  ;;  %4992 = vmatpush1.bf16.msra.mxu0 %v4792_v1  ;;  %v4668_v36 = vld [vmem:[#allocation7 + $0x2c0] sm:$0xff]  ;;  %v4726_v1 = vld [vmem:[#allocation7 + $0x490] sm:$0xff] }
 0xe52   :  { %4911 = vmatprep.subr.bf16.mxu1 %v4798_v21  ;;  %4993 = vmatprep.subr.bf16.mxu0 %v4800_v22  ;;  %v4676_v21 = vld [vmem:[#allocation7 + $0x300] sm:$0xff]  ;;  %v4789_v22 = vld [vmem:[#allocation7 + $0x688] sm:$0xff] }
 0xe55   :  { %4912 = vmatpush1.bf16.msra.mxu1 %v4797_v37  ;;  %4994 = vmatpush1.bf16.msra.mxu0 %v4799_v39  ;;  %v4675_v37 = vld [vmem:[#allocation7 + $0x2f8] sm:$0xff]  ;;  %v4733_v39 = vld [vmem:[#allocation7 + $0x4c8] sm:$0xff] }
 0xe56   :  { %5004 = vmatprep.subr.bf16.mxu1 %v4585_v42  ;;  %5694 = vmatprep.subr.bf16.mxu0 %v4642_v43  ;;  %v4683_v42 = vld [vmem:[#allocation7 + $0x338] sm:$0xff]  ;;  %v4796_v43 = vld [vmem:[#allocation7 + $0x6c0] sm:$0xff] }
 0xe58   :  { %4914 = vmatmul.mubr.bf16.vlgmr.msra.gmra.mrb[36].mxu1 %v7516_v44  ;;  %4996 = vmatmul.mubr.bf16.vlgmr.msra.gmra.mrb[16].mxu0 %v7516_v44 }
 0xe59   :  { %5005 = vmatpush1.bf16.msra.mxu1 %v4584_v45  ;;  %5036 = vmatprep.mubr.bf16.mxu1 %v7502_v32  ;;  %v4682_v45 = vld [vmem:[#allocation7 + $0x330] sm:$0xff] }
 0xe5a   :  { %5695 = vmatpush3.bf16.msra.mxu0 %v4586_v50  ;;  %5118 = vmatprep.mubr.bf16.mxu0 %v7502_v32  ;;  %v4607_v32 = vld [vmem:[#allocation7 + $0xd8] sm:$0xff]  ;;  %v4740_v50 = vld [vmem:[#allocation7 + $0x500] sm:$0xff] }
 0xe5b   :  { %5006 = vmatprep.subr.bf16.mxu1 %v4592_v49  ;;  %5696 = vmatprep.subr.bf16.mxu0 %v4649_v51  ;;  %v4690_v49 = vld [vmem:[#allocation7 + $0x370] sm:$0xff]  ;;  %v4803_v51 = vld [vmem:[#allocation7 + $0x6f8] sm:$0xff] }
 0xe5d   :  { %5007 = vmatpush1.bf16.msra.mxu1 %v4591_v52  ;;  %v4689_v52 = vld [vmem:[#allocation7 + $0x368] sm:$0xff] }
 0xe5e   :  { %5697 = vmatpush3.bf16.msra.mxu0 %v4593_v30  ;;  %5008 = vmatprep.subr.bf16.mxu1 %v4599_v53  ;;  %v4747_v30 = vld [vmem:[#allocation7 + $0x538] sm:$0xff]  ;;  %v4697_v53 = vld [vmem:[#allocation7 + $0x3a8] sm:$0xff] }
 0xe5f   :  { %5698 = vmatprep.subr.bf16.mxu0 %v4656_v40  ;;  %v4696_v40 = vld [vmem:[#allocation7 + $0x3a0] sm:$0xff] }
 0xe61   :  { %5009 = vmatpush1.bf16.msra.mxu1 %v4598_v41  ;;  %v4704_v41 = vld [vmem:[#allocation7 + $0x3e0] sm:$0xff] }
 0xe62   :  { %5699 = vmatpush3.bf16.msra.mxu0 %v4600_v54  ;;  %5010 = vmatprep.subr.bf16.mxu1 %v4606_v55  ;;  %v4703_v54 = vld [vmem:[#allocation7 + $0x3d8] sm:$0xff] }
 0xe63   :  { %5700 = vmatprep.subr.bf16.mxu0 %v4663_v56  ;;  %v4711_v55 = vld [vmem:[#allocation7 + $0x418] sm:$0xff]  ;;  %v4710_v56 = vld [vmem:[#allocation7 + $0x410] sm:$0xff] }
 0xe65   :  { %5011 = vmatpush1.bf16.msra.mxu1 %v4605_v57  ;;  %v4718_v57 = vld [vmem:[#allocation7 + $0x450] sm:$0xff] }
 0xe66   :  { %5701 = vmatpush3.bf16.msra.mxu0 %v4607_v32  ;;  %5012 = vmatprep.subr.bf16.mxu1 %v4613_v58  ;;  %v4717_v32 = vld [vmem:[#allocation7 + $0x448] sm:$0xff] }
 0xe67   :  { %5702 = vmatprep.subr.bf16.mxu0 %v4670_v59  ;;  %v4725_v58 = vld [vmem:[#allocation7 + $0x488] sm:$0xff]  ;;  %v4724_v59 = vld [vmem:[#allocation7 + $0x480] sm:$0xff] }
 0xe69   :  { %5013 = vmatpush1.bf16.msra.mxu1 %v4612_v60  ;;  %v4731_v60 = vld [vmem:[#allocation7 + $0x4b8] sm:$0xff] }
 0xe6a   :  { %5703 = vmatpush3.bf16.msra.mxu0 %v4614_v61  ;;  %5014 = vmatprep.subr.bf16.mxu1 %v4620_v62  ;;  %v4739_v61 = vld [vmem:[#allocation7 + $0x4f8] sm:$0xff]  ;;  %v4746_v62 = vld [vmem:[#allocation7 + $0x530] sm:$0xff] }
 0xe6b   :  { %5704 = vmatprep.subr.bf16.mxu0 %v4677_v12  ;;  %v4745_v12 = vld [vmem:[#allocation7 + $0x528] sm:$0xff] }
 0xe6d   :  { %5015 = vmatpush1.bf16.msra.mxu1 %v4619_v63  ;;  %v4753_v63 = vld [vmem:[#allocation7 + $0x568] sm:$0xff] }
 0xe6e   :  { %5705 = vmatpush3.bf16.msra.mxu0 %v4621_v2  ;;  %5016 = vmatprep.subr.bf16.mxu1 %v4627_v3  ;;  %v4752_v2 = vld [vmem:[#allocation7 + $0x560] sm:$0xff] }
 0xe6f   :  { %5706 = vmatprep.subr.bf16.mxu0 %v4684_v5  ;;  %v4760_v3 = vld [vmem:[#allocation7 + $0x5a0] sm:$0xff]  ;;  %v4759_v5 = vld [vmem:[#allocation7 + $0x598] sm:$0xff] }
 0xe71   :  { %5017 = vmatpush1.bf16.msra.mxu1 %v4626_v13  ;;  %v4767_v13 = vld [vmem:[#allocation7 + $0x5d8] sm:$0xff] }
 0xe72   :  { %5707 = vmatpush3.bf16.msra.mxu0 %v4628_v4  ;;  %5018 = vmatprep.subr.bf16.mxu1 %v4634_v6  ;;  %v4766_v4 = vld [vmem:[#allocation7 + $0x5d0] sm:$0xff] }
 0xe73   :  { %5708 = vmatprep.subr.bf16.mxu0 %v4691_v7  ;;  %v4774_v6 = vld [vmem:[#allocation7 + $0x610] sm:$0xff]  ;;  %v4773_v7 = vld [vmem:[#allocation7 + $0x608] sm:$0xff] }
 0xe75   :  { %5019 = vmatpush1.bf16.msra.mxu1 %v4633_v8  ;;  %v4781_v8 = vld [vmem:[#allocation7 + $0x648] sm:$0xff] }
 0xe76   :  { %5709 = vmatpush3.bf16.msra.mxu0 %v4635_v9  ;;  %5020 = vmatprep.subr.bf16.mxu1 %v4641_v10  ;;  %v4780_v9 = vld [vmem:[#allocation7 + $0x640] sm:$0xff] }
 0xe77   :  { %5716 = vmatprep.subr.bf16.mxu0 %v4754_v0  ;;  %v4788_v10 = vld [vmem:[#allocation7 + $0x680] sm:$0xff]  ;;  %v4787_v0 = vld [vmem:[#allocation7 + $0x678] sm:$0xff] }
 0xe79   :  { %5119 = vmatmul.mubr.bf16.vlgmr.msra.gmra.mrb[20].mxu0 %v7504_v34  ;;  %5021 = vmatpush1.bf16.msra.mxu1 %v4640_v11  ;;  %v4795_v11 = vld [vmem:[#allocation7 + $0x6b8] sm:$0xff] }
 0xe7a   :  { %5717 = vmatpush3.bf16.msra.mxu0 %v4698_v14  ;;  %5158 = vmatprep.mubr.bf16.mxu0 %v7510_v20  ;;  %v4794_v14 = vld [vmem:[#allocation7 + $0x6b0] sm:$0xff] }
 0xe7b   :  { %5022 = vmatprep.subr.bf16.mxu1 %v4648_v15  ;;  %5718 = vmatprep.subr.bf16.mxu0 %v4761_v17  ;;  %v4802_v15 = vld [vmem:[#allocation7 + $0x6f0] sm:$0xff]  ;;  %v4801_v17 = vld [vmem:[#allocation7 + $0x6e8] sm:$0xff] }
 0xe7d   :  { %5023 = vmatpush1.bf16.msra.mxu1 %v4647_v19  ;;  %v7528_v19 = vld [vmem:[#allocation9 + $0x34] sm:$0xff] }
 0xe7e   :  { %5719 = vmatpush3.bf16.msra.mxu0 %v4705_v23  ;;  %5024 = vmatprep.subr.bf16.mxu1 %v4655_v24  ;;  %v4808_v23 = vrot.slane %v7528_v19, %v7204_v47  ;;  %v4816_v24 = vrot.slane %v7528_v19, %v7220_v16 }
 0xe7f   :  { %5720 = vmatprep.subr.bf16.mxu0 %v4768_v25  ;;  %v4812_v25 = vrot.slane %v7528_v19, %v7207_v48 }
 0xe81   :  { %5025 = vmatpush1.bf16.msra.mxu1 %v4654_v26  ;;  %v4820_v26 = vrot.slane %v7528_v19, %v7223_v18 }
 0xe82   :  { %5721 = vmatpush3.bf16.msra.mxu0 %v4712_v33  ;;  %5026 = vmatprep.subr.bf16.mxu1 %v4662_v27 }
 0xe83   :  { %5722 = vmatprep.subr.bf16.mxu0 %v4775_v28 }
 0xe85   :  { %5027 = vmatpush1.bf16.msra.mxu1 %v4661_v38 }
 0xe86   :  { %5723 = vmatpush3.bf16.msra.mxu0 %v4719_v29  ;;  %5028 = vmatprep.subr.bf16.mxu1 %v4669_v31 }
 0xe87   :  { %5724 = vmatprep.subr.bf16.mxu0 %v4782_v35 }
 0xe89   :  { %5029 = vmatpush1.bf16.msra.mxu1 %v4668_v36 }
 0xe8a   :  { %5725 = vmatpush3.bf16.msra.mxu0 %v4726_v1  ;;  %5030 = vmatprep.subr.bf16.mxu1 %v4676_v21 }
 0xe8b   :  { %5726 = vmatprep.subr.bf16.mxu0 %v4789_v22 }
 0xe8d   :  { %5031 = vmatpush1.bf16.msra.mxu1 %v4675_v37 }
 0xe8e   :  { %5727 = vmatpush3.bf16.msra.mxu0 %v4733_v39  ;;  %5032 = vmatprep.subr.bf16.mxu1 %v4683_v42 }
 0xe8f   :  { %5728 = vmatprep.subr.bf16.mxu0 %v4796_v43 }
 0xe91   :  { %5033 = vmatpush1.bf16.msra.mxu1 %v4682_v45 }
 0xe92   :  { %5729 = vmatpush3.bf16.msra.mxu0 %v4740_v50  ;;  %5034 = vmatprep.subr.bf16.mxu1 %v4690_v49 }
 0xe93   :  { %5730 = vmatprep.subr.bf16.mxu0 %v4803_v51 }
 0xe95   :  { %5035 = vmatpush1.bf16.msra.mxu1 %v4689_v52 }
 0xe96   :  { %5731 = vmatpush3.bf16.msra.mxu0 %v4747_v30  ;;  %5045 = vmatprep.subr.bf16.mxu1 %v4697_v53 }
 0xe98   :  { %5037 = vmatmul.mubr.bf16.vlgmr.msra.gmra.mrb[40].mxu1 %v7504_v34  ;;  %v4732_v34 = vld [vmem:[#allocation7 + $0x4c0] sm:$0xff] }
 0xe99   :  { %5159 = vmatmul.mubr.bf16.vlgmr.msra.gmra.mrb[24].mxu0 %v7516_v44  ;;  %5046 = vmatpush1.bf16.msra.mxu1 %v4696_v40 }
 0xe9a   :  { %5077 = vmatprep.mubr.bf16.mxu1 %v7510_v20  ;;  %5047 = vmatprep.subr.bf16.mxu1 %v4704_v41  ;;  %v4738_v20 = vld [vmem:[#allocation7 + $0x4f0] sm:$0xff] }
 0xe9d   :  { %5048 = vmatpush1.bf16.msra.mxu1 %v4703_v54 }
 0xe9e   :  { %5049 = vmatprep.subr.bf16.mxu1 %v4711_v55 }
 0xea1   :  { %5050 = vmatpush1.bf16.msra.mxu1 %v4710_v56 }
 0xea2   :  { %5051 = vmatprep.subr.bf16.mxu1 %v4718_v57 }
 0xea5   :  { %5052 = vmatpush1.bf16.msra.mxu1 %v4717_v32 }
 0xea6   :  { %5053 = vmatprep.subr.bf16.mxu1 %v4725_v58 }
 0xea9   :  { %5054 = vmatpush1.bf16.msra.mxu1 %v4724_v59 }
 0xeaa   :  { %5055 = vmatprep.subr.bf16.mxu1 %v4732_v34 }
 0xead   :  { %5056 = vmatpush1.bf16.msra.mxu1 %v4731_v60 }
 0xeae   :  { %5057 = vmatprep.subr.bf16.mxu1 %v4739_v61 }
 0xeb1   :  { %5058 = vmatpush1.bf16.msra.mxu1 %v4738_v20 }
 0xeb2   :  { %5059 = vmatprep.subr.bf16.mxu1 %v4746_v62 }
 0xeb5   :  { %5060 = vmatpush1.bf16.msra.mxu1 %v4745_v12 }
 0xeb6   :  { %5061 = vmatprep.subr.bf16.mxu1 %v4753_v63 }
 0xeb9   :  { %5062 = vmatpush1.bf16.msra.mxu1 %v4752_v2 }
 0xeba   :  { %5063 = vmatprep.subr.bf16.mxu1 %v4760_v3 }
 0xebd   :  { %5064 = vmatpush1.bf16.msra.mxu1 %v4759_v5 }
 0xebe   :  { %5065 = vmatprep.subr.bf16.mxu1 %v4767_v13 }
 0xec1   :  { %5066 = vmatpush1.bf16.msra.mxu1 %v4766_v4 }
 0xec2   :  { %5067 = vmatprep.subr.bf16.mxu1 %v4774_v6 }
 0xec5   :  { %5068 = vmatpush1.bf16.msra.mxu1 %v4773_v7 }
 0xec6   :  { %5069 = vmatprep.subr.bf16.mxu1 %v4781_v8 }
 0xec9   :  { %5070 = vmatpush1.bf16.msra.mxu1 %v4780_v9 }
 0xeca   :  { %5071 = vmatprep.subr.bf16.mxu1 %v4788_v10 }
 0xecd   :  { %5072 = vmatpush1.bf16.msra.mxu1 %v4787_v0 }
 0xece   :  { %5073 = vmatprep.subr.bf16.mxu1 %v4795_v11 }
 0xed1   :  { %5074 = vmatpush1.bf16.msra.mxu1 %v4794_v14 }
 0xed2   :  { %5075 = vmatprep.subr.bf16.mxu1 %v4802_v15 }
 0xed5   :  { %5076 = vmatpush1.bf16.msra.mxu1 %v4801_v17 }
 0xed8   :  { %5078 = vmatmul.mubr.bf16.vlgmr.msra.gmra.mrb[40].mxu1 %v7516_v44 }
 0xf2b   :  { %v4915_v33 = vpop.f32.mrb[36].mxu1  ;;  %v4997_v27 = vpop.f32.mrb[16].mxu0 }
 0xf2c   :  { %v5792_v28 = vadd.f32 %v4915_v33, %v4808_v23  ;;  %v5794_v38 = vadd.f32 %v4997_v27, %v4816_v24  ;;  %v4917_v29 = vpop.f32.mrb[37].mxu1  ;;  %v4999_v44 = vpop.f32.mrb[17].mxu0 }
 0xf2d   :  { %v5793_v31 = vadd.f32 %v4917_v29, %v4812_v25  ;;  %v5795_v35 = vadd.f32 %v4999_v44, %v4820_v26  ;;  %v4919_v36 = vpop.f32.mrb[38].mxu1  ;;  %v5001_v1 = vpop.f32.mrb[18].mxu0 }
 0xf2e   :  { %v5641_v47 = vmul.f32 -1.442695, %v5792_v28  ;;  %v5643_v21 = vmul.f32 -1.442695, %v5794_v38  ;;  %v4920_v22 = vpop.f32.mrb[39].mxu1  ;;  %v5002_v16 = vpop.f32.mrb[19].mxu0 }
 0xf2f   :  { %v5642_v37 = vmul.f32 -1.442695, %v5793_v31  ;;  %v5644_v39 = vmul.f32 -1.442695, %v5795_v35 }
 0xf30   :  { %6350 = vpow2.f32 %v5641_v47 }
 0xf31   :  { %6352 = vpow2.f32 %v5643_v21 }
 0xf32   :  { %6354 = vpow2.f32 %v5642_v37 }
 0xf33   :  { %6356 = vpow2.f32 %v5644_v39 }
 0xf3a   :  { %v6351_v48 = vpop.eup %6350 }
 0xf3b   :  { %v6353_v18 = vpop.eup %6352  ;;  %v5187_v42 = vadd.f32 1.0, %v6351_v48 }
 0xf3c   :  { %v6355_v43 = vpop.eup %6354  ;;  %v5189_v45 = vadd.f32 1.0, %v6353_v18 }
 0xf3d   :  { %v6357_v50 = vpop.eup %6356  ;;  %6358 = vrcp.f32 %v5187_v42  ;;  %v5188_v49 = vadd.f32 1.0, %v6355_v43 }
 0xf3e   :  { %6360 = vrcp.f32 %v5189_v45  ;;  %v5190_v51 = vadd.f32 1.0, %v6357_v50 }
 0xf3f   :  { %6362 = vrcp.f32 %v5188_v49 }
 0xf40   :  { %6364 = vrcp.f32 %v5190_v51 }
 0xf47   :  { %v6359_v52 = vpop.eup %6358 }
 0xf48   :  { %v6361_v30 = vpop.eup %6360  ;;  %5208 = vst [vmem:[%s7591_s14] sm:$0xff] %v6359_v52 }
 0xf49   :  { %v6363_v53 = vpop.eup %6362  ;;  %5210 = vst [vmem:[%s7591_s14 + $0x10] sm:$0xff] %v6361_v30 }
 0xf4a   :  { %v6365_v40 = vpop.eup %6364  ;;  %5209 = vst [vmem:[%s7591_s14 + $0x8] sm:$0xff] %v6363_v53 }
 0xf4b   :  { %6475 = shalt.err (!%p6472_p6)
}
 0xf4c   :  { %s6516_s19 = smov [#allocation14]   ;;  %5211 = vst [vmem:[%s7591_s14 + $0x18] sm:$0xff] %v6365_v40  ;;  %v5710_v41 = vpop.f32.mrb[20].mxu0  ;;  %v4831_v32 = vsub.s32 6, %v7201_v46  ;;  %v4823_v13 = vsub.s32 4, %v7201_v46  ;;  %v4827_v4 = vsub.s32 5, %v7201_v46 }
 0xf4d   :  { %5224 = dma.smem_to_hbm %s6516_s19, 16, %s7592_s15, [#allocation11]   ;;  %v5711_v54 = vpop.f32.mrb[21].mxu0 }
 0xf4e   :  { %v5712_v55 = vadd.f32 %v5711_v54, %v5710_v41  ;;  %v5713_v56 = vpop.f32.mrb[22].mxu0  ;;  %v4832_v58 = vrot.slane %v7528_v19, %v4831_v32  ;;  %v4824_v6 = vrot.slane %v7528_v19, %v4823_v13  ;;  %v4828_v7 = vrot.slane %v7528_v19, %v4827_v4 }
 0xf4f   :  { %v5714_v57 = vpop.f32.mrb[23].mxu0 }
 0xf50   :  { %v5121_v60 = vadd.f32 %v5712_v55, %v4832_v58 }
 0xf6c   :  { %v5732_v59 = vpop.f32.mrb[24].mxu0 }
 0xf6d   :  { %v5733_v34 = vpop.f32.mrb[25].mxu0 }
 0xf6e   :  { %v5734_v61 = vadd.f32 %v5733_v34, %v5732_v59  ;;  %v5735_v20 = vpop.f32.mrb[26].mxu0 }
 0xf6f   :  { %v5736_v62 = vpop.f32.mrb[27].mxu0 }
 0xf70   :  { %v5161_v12 = vadd.f32 %v5734_v61, %v5121_v60 }
 0xf72   :  { %v5647_v63 = vmul.f32 -1.442695, %v5161_v12 }
 0xf74   :  { %6366 = vpow2.f32 %v5647_v63 }
 0xf7e   :  { %v6367_v2 = vpop.eup %6366 }
 0xf7f   :  { %v5193_v3 = vadd.f32 1.0, %v6367_v2 }
 0xf81   :  { %6368 = vrcp.f32 %v5193_v3 }
 0xf8b   :  { %v6369_v5 = vpop.eup %6368 }
 0xf8c   :  { %5214 = vst [vmem:[%s7591_s14 + $0x30] sm:$0xff] %v6369_v5 }
 0xfab   :  { %v5079_v8 = vpop.f32.mrb[40].mxu1 }
 0xfac   :  { %v5796_v9 = vadd.f32 %v5079_v8, %v4824_v6  ;;  %v5081_v10 = vpop.f32.mrb[41].mxu1 }
 0xfad   :  { %v5797_v0 = vadd.f32 %v5081_v10, %v4828_v7  ;;  %v5083_v11 = vpop.f32.mrb[42].mxu1 }
 0xfae   :  { %v5645_v14 = vmul.f32 -1.442695, %v5796_v9  ;;  %v5084_v15 = vpop.f32.mrb[43].mxu1 }
 0xfaf   :  { %v5646_v17 = vmul.f32 -1.442695, %v5797_v0 }
 0xfb0   :  { %6370 = vpow2.f32 %v5645_v14 }
 0xfb1   :  { %6372 = vpow2.f32 %v5646_v17 }
 0xfba   :  { %v6371_v23 = vpop.eup %6370 }
 0xfbb   :  { %v6373_v24 = vpop.eup %6372  ;;  %v5191_v25 = vadd.f32 1.0, %v6371_v23 }
 0xfbc   :  { %v5192_v26 = vadd.f32 1.0, %v6373_v24 }
 0xfbd   :  { %6374 = vrcp.f32 %v5191_v25 }
 0xfbe   :  { %6376 = vrcp.f32 %v5192_v26 }
 0xfc7   :  { %v6375_v46 = vpop.eup %6374 }
 0xfc8   :  { %v6377_v33 = vpop.eup %6376  ;;  %5212 = vst [vmem:[%s7591_s14 + $0x20] sm:$0xff] %v6375_v46 }
 0xfc9   :  { %5213 = vst [vmem:[%s7591_s14 + $0x28] sm:$0xff] %v6377_v33 }
 0xfca   :  { %6492 = dma.done.wait [#allocation11], 16  }
 0xfcb   :  { %6493 = vsyncadd [#allocation11], 4294967280 }
 0xfcc   :  { %5230 = sfence }
 0xfcd   :  { %5231 = vsyncpa [#allocation10], 1 }
 0xfce   :  { %5232 = vsyncpa [#allocation13], 1 }
 0xfcf   :  { %5233 = vsyncpa [#allocation11], 1 }
 0xfd0   :  { %5234 = vsyncmov [#allocation8] }
 0xfd3   :  { %s5235_s7 = vpop.sfrf %5234 }
 0xfd4   :  { %p5648_p7 = scmp.ne.s32.totalorder %s5235_s7, 0 }
 0xfd6   :  { %5239 = shalt.err (%p5648_p7)  }
 0xfd7   :  { %5241 = vsyncmov [#allocation8 + $0x1] }
 0xfda   :  { %s5242_s0 = vpop.sfrf %5241 }
 0xfdb   :  { %p5649_p8 = scmp.ne.s32.totalorder %s5242_s0, 0 }
 0xfdd   :  { %5246 = shalt.err (%p5649_p8)  }
 0xfde   :  { %5248 = vsyncmov [#allocation8 + $0x2] }
 0xfe1   :  { %s5249_s20 = vpop.sfrf %5248 }
 0xfe2   :  { %p5650_p9 = scmp.ne.s32.totalorder %s5249_s20, 0 }
 0xfe4   :  { %5253 = shalt.err (%p5650_p9)  }
 0xfe5   :  { %5255 = vsyncmov [#allocation8 + $0x3] }
 0xfe8   :  { %s5256_s14 = vpop.sfrf %5255 }
 0xfe9   :  { %p5651_p10 = scmp.ne.s32.totalorder %s5256_s14, 0 }
 0xfeb   :  { %5260 = shalt.err (%p5651_p10)  }
 0xfec   :  { %5262 = vsyncmov [#allocation8 + $0x4] }
 0xfef   :  { %s5263_s22 = vpop.sfrf %5262 }
 0xff0   :  { %p5652_p11 = scmp.ne.s32.totalorder %s5263_s22, 0 }
 0xff2   :  { %5267 = shalt.err (%p5652_p11)  }
 0xff3   :  { %5269 = vsyncmov [#allocation8 + $0x5] }
 0xff6   :  { %s5270_s12 = vpop.sfrf %5269 }
 0xff7   :  { %p5653_p12 = scmp.ne.s32.totalorder %s5270_s12, 0 }
 0xff9   :  { %5274 = shalt.err (%p5653_p12)  }

</bundles_post_ra>
